<compile_context>
chip_gen: v7x
topology: tpu7x:2x2x1
jax: 0.10.0
libtpu: 0.0.40
codegen_flags: <defaults>
</compile_context>

<pallas_src>
import jax
import jax.numpy as jnp
from jax import lax
from jax.experimental import pallas as pl
from jax.experimental.pallas import tpu as pltpu

# --- model config (small, consistent with the module's forward) -------------
VOCAB = 50
EMB = 32            # embedding_dim
HID = 32            # hidden_dim
H2 = 2 * HID        # 64  (bidirectional feature width)
G8 = 8 * HID        # 256 (fused fwd+bwd gate width)
NUM_LAYERS = 2
NUM_CLASSES = 3
BATCH = 2
SEQ = 8
TB = SEQ * BATCH    # 16 (time-major stacked rows: row = t*B + b)
LN_EPS = 1e-5
BN_EPS = 1e-5
NEG_INF = -1e9
OUT_PAD = 128       # lane-dense logits tile; sliced to NUM_CLASSES outside

# --- head-slab row map (HEAD_ROWS x 128, f32) --------------------------------
ROW_LN_G, ROW_LN_B, ROW_ATT_W, ROW_ATT_B = 0, 1, 2, 3
ROW_FC1_B, ROW_BN1_S, ROW_BN1_B = 4, 5, 6
ROW_FC2_B, ROW_BN2_S, ROW_BN2_B = 7, 8, 9
ROW_FC3_B = 10
ROW_POOL = 12                  # 12:12+BATCH   constant time-pooling selector
ROW_FC1_W = 16                 # 16:80   (64 x 32)
ROW_FC2_W = 80                 # 80:112  (32 x 16)
ROW_FC3_W = 112                # 112:128 (16 x 128, zero-padded past classes)
HEAD_ROWS = 128


# --------------------------------------------------------------------------
# In-kernel helper: one bidirectional LSTM layer, fwd+bwd fused per step.
# --------------------------------------------------------------------------
def _fused_bilstm_layer(x_stacked, slab_ref, d_in, gxf_s, gxb_s, outf_s, outb_s):
    """x_stacked: (T*B, d_in) f32, row r -> (time r//B, batch r%B).

    slab_ref rows: [0:d_in) W_ih_fwd, [d_in:2*d_in) W_ih_bwd,
    [2*d_in:2*d_in+2H) block-diagonal W_hh, last row = b_ih+b_hh (both dirs),
    all pre-interleaved so gates come out as [i_f i_b | f_f f_b | g_f g_b | o_f o_b].
    Returns the stacked (T*B, 2H) output [h_fwd | h_bwd] per time step.
    """
    r_hh = 2 * d_in
    r_b = r_hh + H2
    wih_f = slab_ref[0:d_in, :]                                # bf16 (d_in, 8H)
    wih_b = slab_ref[d_in:r_hh, :]
    whh = slab_ref[r_hh:r_b, :]                                # bf16 (2H, 8H)
    bias = slab_ref[r_b:r_b + 1, :].astype(jnp.float32)        # (1, 8H)

    # Batched input projections (off the serial h-chain): one matmul per
    # direction over all T*B rows; results parked in VMEM scratch.
    xb = x_stacked.astype(jnp.bfloat16)
    gxf_s[...] = jnp.dot(xb, wih_f, preferred_element_type=jnp.float32) + bias
    gxb_s[...] = jnp.dot(xb, wih_b, preferred_element_type=jnp.float32)

    h = jnp.zeros((BATCH, H2), jnp.float32)                    # [h_f | h_b]
    c = jnp.zeros((BATCH, H2), jnp.float32)                    # [c_f | c_b]
    for s in range(SEQ):
        t_fwd, t_bwd = s, SEQ - 1 - s
        gx = (gxf_s[t_fwd * BATCH:(t_fwd + 1) * BATCH, :]
              + gxb_s[t_bwd * BATCH:(t_bwd + 1) * BATCH, :])   # (B, 8H)
        # One MXU op per step drives BOTH directions (block-diagonal W_hh).
        gates = gx + jnp.dot(h.astype(jnp.bfloat16), whh,
                             preferred_element_type=jnp.float32)
        sif = jax.nn.sigmoid(gates[:, 0:2 * H2])               # i and f together
        i_g = sif[:, 0:H2]
        f_g = sif[:, H2:2 * H2]
        g_g = jnp.tanh(gates[:, 2 * H2:3 * H2])
        o_g = jax.nn.sigmoid(gates[:, 3 * H2:4 * H2])
        c = f_g * c + i_g * g_g
        h = o_g * jnp.tanh(c)
        # Re-pair per-time outputs (fwd output at t_fwd, bwd output at t_bwd).
        outf_s[t_fwd * BATCH:(t_fwd + 1) * BATCH, :] = h[:, 0:HID]
        outb_s[t_bwd * BATCH:(t_bwd + 1) * BATCH, :] = h[:, HID:H2]
    return jnp.concatenate([outf_s[...], outb_s[...]], axis=1)  # (T*B, 2H)


# --------------------------------------------------------------------------
# The single fused forward kernel (no grid; everything VMEM-resident).
# --------------------------------------------------------------------------
def _fused_forward_kernel(inp_ref, emb_ref, l0_ref, l1_ref, head_ref, out_ref,
                          gxf_s, gxb_s, outf_s, outb_s):
    inp = inp_ref[...]                                          # (T*B, V+1) f32
    onehot = inp[:, 0:VOCAB]
    maskcol = inp[:, VOCAB:VOCAB + 1]                           # 1.0 tok / 0.0 pad

    # Embedding: one (T*B, V) @ (V, E) matmul.  Row 0 of the table is zeroed
    # (nn.Embedding padding_idx=0).  embedding_dropout = identity (eval).
    x0 = jnp.dot(onehot, emb_ref[...], preferred_element_type=jnp.float32)

    # 2-layer bidirectional LSTM (inter-layer dropout = identity, eval).
    x1 = _fused_bilstm_layer(x0, l0_ref, EMB, gxf_s, gxb_s, outf_s, outb_s)
    x2 = _fused_bilstm_layer(x1, l1_ref, H2, gxf_s, gxb_s, outf_s, outb_s)

    # LayerNorm over the stacked (T*B, 2H) tile (biased variance, as PyTorch).
    ln_g = head_ref[ROW_LN_G:ROW_LN_G + 1, 0:H2]
    ln_b = head_ref[ROW_LN_B:ROW_LN_B + 1, 0:H2]
    mu = jnp.mean(x2, axis=-1, keepdims=True)
    var = jnp.mean((x2 - mu) ** 2, axis=-1, keepdims=True)
    ln = (x2 - mu) * lax.rsqrt(var + LN_EPS) * ln_g + ln_b      # (T*B, 2H)

    # Attention scores + padding mask.  Scores are tanh-bounded in [-1, 1]
    # (masked -> -1e9 whose exp underflows to exactly 0), so the unshifted
    # softmax below is numerically identical to torch.softmax for any input
    # with at least one non-pad token per sequence.
    attn_w = head_ref[ROW_ATT_W:ROW_ATT_W + 1, 0:H2]
    attn_b = head_ref[ROW_ATT_B:ROW_ATT_B + 1, 0:1]
    s = jnp.tanh(jnp.sum(ln * attn_w, axis=-1, keepdims=True) + attn_b)
    s = jnp.where(maskcol > 0.5, s, NEG_INF)                    # (T*B, 1)
    e = jnp.exp(s)

    # Masked softmax pooling over time as ONE matmul: pool[b, r] = 1 iff row r
    # belongs to batch element b; numerator and denominator pooled together.
    pool = head_ref[ROW_POOL:ROW_POOL + BATCH, 0:TB]            # (B, T*B) const
    num_den = jnp.dot(pool, jnp.concatenate([ln * e, e], axis=1),
                      preferred_element_type=jnp.float32)       # (B, 2H + 1)
    denom = num_den[:, H2:H2 + 1]
    attended = num_den[:, 0:H2] * pl.reciprocal(denom, approx=True)  # (B, 2H)
    # dropout1 = identity (eval)

    # MLP head.  Reference order is fc -> ReLU -> BatchNorm (eval running
    # stats folded into scale/shift at prep time).  dropout2 = identity.
    fc1_w = head_ref[ROW_FC1_W:ROW_FC1_W + H2, 0:HID]           # (64, 32)
    h1 = (jnp.dot(attended, fc1_w, preferred_element_type=jnp.float32)
          + head_ref[ROW_FC1_B:ROW_FC1_B + 1, 0:HID])
    h1 = (jnp.maximum(h1, 0.0) * head_ref[ROW_BN1_S:ROW_BN1_S + 1, 0:HID]
          + head_ref[ROW_BN1_B:ROW_BN1_B + 1, 0:HID])
    fc2_w = head_ref[ROW_FC2_W:ROW_FC2_W + HID, 0:HID // 2]     # (32, 16)
    h2 = (jnp.dot(h1, fc2_w, preferred_element_type=jnp.float32)
          + head_ref[ROW_FC2_B:ROW_FC2_B + 1, 0:HID // 2])
    h2 = (jnp.maximum(h2, 0.0) * head_ref[ROW_BN2_S:ROW_BN2_S + 1, 0:HID // 2]
          + head_ref[ROW_BN2_B:ROW_BN2_B + 1, 0:HID // 2])
    fc3_w = head_ref[ROW_FC3_W:ROW_FC3_W + HID // 2, :]         # (16, 128) padded
    out_ref[...] = (jnp.dot(h2, fc3_w, preferred_element_type=jnp.float32)
                    + head_ref[ROW_FC3_B:ROW_FC3_B + 1, :])     # (B, 128)


# --------------------------------------------------------------------------
# One-time parameter packing (hoisted out of the forward hot path).
# --------------------------------------------------------------------------
def prepare_inference_params(p):
    def interleave(w_t, direction):
        # w_t: (rows, 4H) in PyTorch gate order [i|f|g|o] -> (rows, 8H) in the
        # fused layout [i_f i_b | f_f f_b | g_f g_b | o_f o_b]; other slots 0.
        out = jnp.zeros((w_t.shape[0], G8), jnp.float32)
        off = 0 if direction == "f" else HID
        for k in range(4):
            out = out.at[:, k * H2 + off:k * H2 + off + HID].set(
                w_t[:, k * HID:(k + 1) * HID])
        return out

    def lstm_slab(layer, d_in):
        wih_f = interleave(jnp.transpose(p[f"w_ih_l{layer}_fwd"]), "f")
        wih_b = interleave(jnp.transpose(p[f"w_ih_l{layer}_bwd"]), "b")
        whh = jnp.concatenate(    # block-diagonal: h_f -> fwd cols, h_b -> bwd cols
            [interleave(jnp.transpose(p[f"w_hh_l{layer}_fwd"]), "f"),
             interleave(jnp.transpose(p[f"w_hh_l{layer}_bwd"]), "b")], axis=0)
        bias = (interleave(p[f"b_l{layer}_fwd"].reshape(1, 4 * HID), "f")
                + interleave(p[f"b_l{layer}_bwd"].reshape(1, 4 * HID), "b"))
        slab = jnp.concatenate([wih_f, wih_b, whh, bias], axis=0)
        return slab.astype(jnp.bfloat16)   # bf16 operands, f32 accumulation

    head = jnp.zeros((HEAD_ROWS, OUT_PAD), jnp.float32)
    head = head.at[ROW_LN_G, 0:H2].set(p["ln_gamma"])
    head = head.at[ROW_LN_B, 0:H2].set(p["ln_beta"])
    head = head.at[ROW_ATT_W, 0:H2].set(p["attn_w"].reshape(H2))
    head = head.at[ROW_ATT_B, 0].set(p["attn_b"][0])
    head = head.at[ROW_FC1_B, 0:HID].set(p["fc1_b"])
    bn1_s = p["bn1_gamma"] * lax.rsqrt(p["bn1_var"] + BN_EPS)
    head = head.at[ROW_BN1_S, 0:HID].set(bn1_s)
    head = head.at[ROW_BN1_B, 0:HID].set(p["bn1_beta"] - p["bn1_mean"] * bn1_s)
    head = head.at[ROW_FC2_B, 0:HID // 2].set(p["fc2_b"])
    bn2_s = p["bn2_gamma"] * lax.rsqrt(p["bn2_var"] + BN_EPS)
    head = head.at[ROW_BN2_S, 0:HID // 2].set(bn2_s)
    head = head.at[ROW_BN2_B, 0:HID // 2].set(p["bn2_beta"] - p["bn2_mean"] * bn2_s)
    head = head.at[ROW_FC3_B, 0:NUM_CLASSES].set(p["fc3_b"])
    pool = (jnp.arange(TB)[None, :] % BATCH
            == jnp.arange(BATCH)[:, None]).astype(jnp.float32)      # (B, T*B)
    head = head.at[ROW_POOL:ROW_POOL + BATCH, 0:TB].set(pool)
    head = head.at[ROW_FC1_W:ROW_FC1_W + H2, 0:HID].set(jnp.transpose(p["fc1_w"]))
    head = head.at[ROW_FC2_W:ROW_FC2_W + HID, 0:HID // 2].set(jnp.transpose(p["fc2_w"]))
    head = head.at[ROW_FC3_W:ROW_FC3_W + HID // 2, 0:NUM_CLASSES].set(
        jnp.transpose(p["fc3_w"]))

    return {
        "emb": p["embedding"].at[0, :].set(0.0),   # padding_idx=0 -> zero row
        "l0": lstm_slab(0, EMB),
        "l1": lstm_slab(1, H2),
        "head": head,
    }


# --------------------------------------------------------------------------
# Forward pass: tiny one-hot/mask glue in the wrapper + a single pallas_call.
# --------------------------------------------------------------------------
def forward(x_tokens, prep):
    """x_tokens: (BATCH, SEQ) int32 token ids (0 = padding)."""
    tok = jnp.transpose(x_tokens.astype(jnp.int32)).reshape(TB)      # row = t*B+b
    onehot = jax.nn.one_hot(tok, VOCAB, dtype=jnp.float32)           # (T*B, V)
    maskcol = (tok != 0).astype(jnp.float32)[:, None]                # (T*B, 1)
    inp = jnp.concatenate([onehot, maskcol], axis=1)                 # (T*B, V+1)

    logits = pl.pallas_call(
        _fused_forward_kernel,
        out_shape=jax.ShapeDtypeStruct((BATCH, OUT_PAD), jnp.float32),
        scratch_shapes=[
            pltpu.VMEM((TB, G8), jnp.float32),    # batched fwd input projections
            pltpu.VMEM((TB, G8), jnp.float32),    # batched bwd input projections
            pltpu.VMEM((TB, HID), jnp.float32),   # per-layer fwd outputs (stacked)
            pltpu.VMEM((TB, HID), jnp.float32),   # per-layer bwd outputs (stacked)
        ],
    )(inp, prep["emb"], prep["l0"], prep["l1"], prep["head"])
    return logits[:, :NUM_CLASSES]


# --------------------------------------------------------------------------
# Parameter init (deterministic, Xavier-style scales).
# --------------------------------------------------------------------------
def init_params(key):
    def xavier(k, shape):
        fan_out, fan_in = shape
        std = (2.0 / (fan_in + fan_out)) ** 0.5
        return std * jax.random.normal(k, shape, dtype=jnp.float32)

    keys = jax.random.split(key, 16)
    p = {}
    p["embedding"] = xavier(keys[0], (VOCAB, EMB))
    ki = 1
    for l in range(NUM_LAYERS):
        d_in = EMB if l == 0 else H2
        for tag in ("fwd", "bwd"):
            p[f"w_ih_l{l}_{tag}"] = xavier(keys[ki], (4 * HID, d_in)); ki += 1
            p[f"w_hh_l{l}_{tag}"] = xavier(keys[ki], (4 * HID, HID)); ki += 1
            p[f"b_l{l}_{tag}"] = jnp.zeros((4 * HID,), jnp.float32)   # b_ih + b_hh
    p["attn_w"] = xavier(keys[ki], (1, H2)); ki += 1
    p["attn_b"] = jnp.zeros((1,), jnp.float32)
    p["ln_gamma"] = jnp.ones((H2,), jnp.float32)
    p["ln_beta"] = jnp.zeros((H2,), jnp.float32)
    p["fc1_w"] = xavier(keys[ki], (HID, H2)); ki += 1
    p["fc1_b"] = jnp.zeros((HID,), jnp.float32)
    p["fc2_w"] = xavier(keys[ki], (HID // 2, HID)); ki += 1
    p["fc2_b"] = jnp.zeros((HID // 2,), jnp.float32)
    p["fc3_w"] = xavier(keys[ki], (NUM_CLASSES, HID // 2)); ki += 1
    p["fc3_b"] = jnp.zeros((NUM_CLASSES,), jnp.float32)
    for n, dim in (("bn1", HID), ("bn2", HID // 2)):
        p[f"{n}_gamma"] = jnp.ones((dim,), jnp.float32)
        p[f"{n}_beta"] = jnp.zeros((dim,), jnp.float32)
        p[f"{n}_mean"] = jnp.zeros((dim,), jnp.float32)
        p[f"{n}_var"] = jnp.ones((dim,), jnp.float32)
    return p


if __name__ == "__main__":
    key = jax.random.PRNGKey(0)
    pkey, xkey = jax.random.split(key)
    params = init_params(pkey)
    prep = prepare_inference_params(params)     # one-time weight packing

    x = jax.random.randint(xkey, (BATCH, SEQ), 0, VOCAB, dtype=jnp.int32)
    x = x.at[0, -2:].set(0)   # trailing padding tokens to exercise the mask

    logits = jax.jit(forward)(x, prep)
    jax.block_until_ready(logits)
    assert logits.shape == (BATCH, NUM_CLASSES)
    print("KERNEL_OK")
</pallas_src>

<mosaic_0001>
module attributes {stable_mosaic.version = 11 : i64} {
  func.func @_fused_forward_kernel(%arg0: memref<16x51xf32, #tpu.memory_space<vmem>>, %arg1: memref<50x32xf32, #tpu.memory_space<vmem>>, %arg2: memref<129x256xbf16, #tpu.memory_space<vmem>>, %arg3: memref<193x256xbf16, #tpu.memory_space<vmem>>, %arg4: memref<128x128xf32, #tpu.memory_space<vmem>>, %arg5: memref<2x128xf32, #tpu.memory_space<vmem>>, %arg6: memref<16x256xf32, #tpu.memory_space<vmem>>, %arg7: memref<16x256xf32, #tpu.memory_space<vmem>>, %arg8: memref<16x32xf32, #tpu.memory_space<vmem>>, %arg9: memref<16x32xf32, #tpu.memory_space<vmem>>) attributes {dimension_semantics = [], scalar_prefetch = 0 : i64, scratch_operands = 4 : i64, tpu.core_type = #tpu.core_type<tc>} {
    %c0 = arith.constant 0 : index
    %c0_0 = arith.constant 0 : index
    %0 = vector.load %arg0[%c0, %c0_0] : memref<16x51xf32, #tpu.memory_space<vmem>>, vector<16x51xf32>
    %1 = vector.extract_strided_slice %0 {offsets = [0, 0], sizes = [16, 50], strides = [1, 1]} : vector<16x51xf32> to vector<16x50xf32>
    %2 = vector.extract_strided_slice %0 {offsets = [0, 50], sizes = [16, 1], strides = [1, 1]} : vector<16x51xf32> to vector<16x1xf32>
    %c0_1 = arith.constant 0 : index
    %c0_2 = arith.constant 0 : index
    %3 = vector.load %arg1[%c0_1, %c0_2] : memref<50x32xf32, #tpu.memory_space<vmem>>, vector<50x32xf32>
    %cst = arith.constant dense<0.000000e+00> : vector<16x32xf32>
    %4 = tpu.matmul %1, %3, %cst {dimension_numbers = #tpu.dot_dimension_numbers<[1], [0], [0], [1], [0, 0, 1, 1], [], []>} : vector<16x50xf32>, vector<50x32xf32>, vector<16x32xf32> -> vector<16x32xf32>
    %c0_3 = arith.constant 0 : index
    %c0_4 = arith.constant 0 : index
    %5 = vector.load %arg2[%c0_3, %c0_4] : memref<129x256xbf16, #tpu.memory_space<vmem>>, vector<32x256xbf16>
    %c32 = arith.constant 32 : index
    %c0_5 = arith.constant 0 : index
    %6 = vector.load %arg2[%c32, %c0_5] : memref<129x256xbf16, #tpu.memory_space<vmem>>, vector<32x256xbf16>
    %c64 = arith.constant 64 : index
    %c0_6 = arith.constant 0 : index
    %7 = vector.load %arg2[%c64, %c0_6] : memref<129x256xbf16, #tpu.memory_space<vmem>>, vector<64x256xbf16>
    %c128 = arith.constant 128 : index
    %c0_7 = arith.constant 0 : index
    %8 = vector.load %arg2[%c128, %c0_7] : memref<129x256xbf16, #tpu.memory_space<vmem>>, vector<1x256xbf16>
    %9 = arith.extf %8 : vector<1x256xbf16> to vector<1x256xf32>
    %10 = arith.truncf %4 : vector<16x32xf32> to vector<16x32xbf16>
    %cst_8 = arith.constant dense<0.000000e+00> : vector<16x256xf32>
    %11 = tpu.matmul %10, %5, %cst_8 {dimension_numbers = #tpu.dot_dimension_numbers<[1], [0], [0], [1], [0, 0, 1, 1], [], []>} : vector<16x32xbf16>, vector<32x256xbf16>, vector<16x256xf32> -> vector<16x256xf32>
    %12 = vector.broadcast %9 : vector<1x256xf32> to vector<16x256xf32>
    %13 = arith.addf %11, %12 : vector<16x256xf32>
    %c0_9 = arith.constant 0 : index
    %c0_10 = arith.constant 0 : index
    %14 = vector.load %arg6[%c0_9, %c0_10] : memref<16x256xf32, #tpu.memory_space<vmem>>, vector<16x256xf32>
    tpu.vector_store %arg6[%c0_9, %c0_10], %13 {strides = array<i32>} : memref<16x256xf32, #tpu.memory_space<vmem>>, vector<16x256xf32>,
    %cst_11 = arith.constant dense<0.000000e+00> : vector<16x256xf32>
    %15 = tpu.matmul %10, %6, %cst_11 {dimension_numbers = #tpu.dot_dimension_numbers<[1], [0], [0], [1], [0, 0, 1, 1], [], []>} : vector<16x32xbf16>, vector<32x256xbf16>, vector<16x256xf32> -> vector<16x256xf32>
    %c0_12 = arith.constant 0 : index
    %c0_13 = arith.constant 0 : index
    %16 = vector.load %arg7[%c0_12, %c0_13] : memref<16x256xf32, #tpu.memory_space<vmem>>, vector<16x256xf32>
    tpu.vector_store %arg7[%c0_12, %c0_13], %15 {strides = array<i32>} : memref<16x256xf32, #tpu.memory_space<vmem>>, vector<16x256xf32>,
    %cst_14 = arith.constant 0.000000e+00 : f32
    %17 = vector.broadcast %cst_14 : f32 to vector<2x64xf32>
    %cst_15 = arith.constant 0.000000e+00 : f32
    %18 = vector.broadcast %cst_15 : f32 to vector<2x64xf32>
    %c0_16 = arith.constant 0 : index
    %c0_17 = arith.constant 0 : index
    %19 = vector.load %arg6[%c0_16, %c0_17] : memref<16x256xf32, #tpu.memory_space<vmem>>, vector<2x256xf32>
    %c14 = arith.constant 14 : index
    %c0_18 = arith.constant 0 : index
    %20 = vector.load %arg7[%c14, %c0_18] : memref<16x256xf32, #tpu.memory_space<vmem>>, vector<2x256xf32>
    %21 = arith.addf %19, %20 : vector<2x256xf32>
    %22 = arith.truncf %17 : vector<2x64xf32> to vector<2x64xbf16>
    %cst_19 = arith.constant dense<0.000000e+00> : vector<2x256xf32>
    %23 = tpu.matmul %22, %7, %cst_19 {dimension_numbers = #tpu.dot_dimension_numbers<[1], [0], [0], [1], [0, 0, 1, 1], [], []>} : vector<2x64xbf16>, vector<64x256xbf16>, vector<2x256xf32> -> vector<2x256xf32>
    %24 = arith.addf %21, %23 : vector<2x256xf32>
    %25 = vector.extract_strided_slice %24 {offsets = [0, 0], sizes = [2, 128], strides = [1, 1]} : vector<2x256xf32> to vector<2x128xf32>
    %26 = arith.negf %25 : vector<2x128xf32>
    %27 = math.exp %26 : vector<2x128xf32>
    %cst_20 = arith.constant 1.000000e+00 : f32
    %28 = vector.broadcast %cst_20 : f32 to vector<2x128xf32>
    %29 = arith.addf %28, %27 : vector<2x128xf32>
    %30 = arith.divf %28, %29 : vector<2x128xf32>
    %31 = vector.extract_strided_slice %30 {offsets = [0, 0], sizes = [2, 64], strides = [1, 1]} : vector<2x128xf32> to vector<2x64xf32>
    %32 = vector.extract_strided_slice %30 {offsets = [0, 64], sizes = [2, 64], strides = [1, 1]} : vector<2x128xf32> to vector<2x64xf32>
    %33 = vector.extract_strided_slice %24 {offsets = [0, 128], sizes = [2, 64], strides = [1, 1]} : vector<2x256xf32> to vector<2x64xf32>
    %34 = math.tanh %33 : vector<2x64xf32>
    %35 = vector.extract_strided_slice %24 {offsets = [0, 192], sizes = [2, 64], strides = [1, 1]} : vector<2x256xf32> to vector<2x64xf32>
    %36 = arith.negf %35 : vector<2x64xf32>
    %37 = math.exp %36 : vector<2x64xf32>
    %cst_21 = arith.constant 1.000000e+00 : f32
    %38 = vector.broadcast %cst_21 : f32 to vector<2x64xf32>
    %39 = arith.addf %38, %37 : vector<2x64xf32>
    %40 = arith.divf %38, %39 : vector<2x64xf32>
    %41 = arith.mulf %32, %18 : vector<2x64xf32>
    %42 = arith.mulf %31, %34 : vector<2x64xf32>
    %43 = arith.addf %41, %42 : vector<2x64xf32>
    %44 = math.tanh %43 : vector<2x64xf32>
    %45 = arith.mulf %40, %44 : vector<2x64xf32>
    %46 = vector.extract_strided_slice %45 {offsets = [0, 0], sizes = [2, 32], strides = [1, 1]} : vector<2x64xf32> to vector<2x32xf32>
    %c0_22 = arith.constant 0 : index
    %c0_23 = arith.constant 0 : index
    %47 = vector.load %arg8[%c0_22, %c0_23] : memref<16x32xf32, #tpu.memory_space<vmem>>, vector<2x32xf32>
    tpu.vector_store %arg8[%c0_22, %c0_23], %46 {strides = array<i32>} : memref<16x32xf32, #tpu.memory_space<vmem>>, vector<2x32xf32>,
    %48 = vector.extract_strided_slice %45 {offsets = [0, 32], sizes = [2, 32], strides = [1, 1]} : vector<2x64xf32> to vector<2x32xf32>
    %c14_24 = arith.constant 14 : index
    %c0_25 = arith.constant 0 : index
    %49 = vector.load %arg9[%c14_24, %c0_25] : memref<16x32xf32, #tpu.memory_space<vmem>>, vector<2x32xf32>
    tpu.vector_store %arg9[%c14_24, %c0_25], %48 {strides = array<i32>} : memref<16x32xf32, #tpu.memory_space<vmem>>, vector<2x32xf32>,
    %c2 = arith.constant 2 : index
    %c0_26 = arith.constant 0 : index
    %50 = vector.load %arg6[%c2, %c0_26] : memref<16x256xf32, #tpu.memory_space<vmem>>, vector<2x256xf32>
    %c12 = arith.constant 12 : index
    %c0_27 = arith.constant 0 : index
    %51 = vector.load %arg7[%c12, %c0_27] : memref<16x256xf32, #tpu.memory_space<vmem>>, vector<2x256xf32>
    %52 = arith.addf %50, %51 : vector<2x256xf32>
    %53 = arith.truncf %45 : vector<2x64xf32> to vector<2x64xbf16>
    %cst_28 = arith.constant dense<0.000000e+00> : vector<2x256xf32>
    %54 = tpu.matmul %53, %7, %cst_28 {dimension_numbers = #tpu.dot_dimension_numbers<[1], [0], [0], [1], [0, 0, 1, 1], [], []>} : vector<2x64xbf16>, vector<64x256xbf16>, vector<2x256xf32> -> vector<2x256xf32>
    %55 = arith.addf %52, %54 : vector<2x256xf32>
    %56 = vector.extract_strided_slice %55 {offsets = [0, 0], sizes = [2, 128], strides = [1, 1]} : vector<2x256xf32> to vector<2x128xf32>
    %57 = arith.negf %56 : vector<2x128xf32>
    %58 = math.exp %57 : vector<2x128xf32>
    %cst_29 = arith.constant 1.000000e+00 : f32
    %59 = vector.broadcast %cst_29 : f32 to vector<2x128xf32>
    %60 = arith.addf %59, %58 : vector<2x128xf32>
    %61 = arith.divf %59, %60 : vector<2x128xf32>
    %62 = vector.extract_strided_slice %61 {offsets = [0, 0], sizes = [2, 64], strides = [1, 1]} : vector<2x128xf32> to vector<2x64xf32>
    %63 = vector.extract_strided_slice %61 {offsets = [0, 64], sizes = [2, 64], strides = [1, 1]} : vector<2x128xf32> to vector<2x64xf32>
    %64 = vector.extract_strided_slice %55 {offsets = [0, 128], sizes = [2, 64], strides = [1, 1]} : vector<2x256xf32> to vector<2x64xf32>
    %65 = math.tanh %64 : vector<2x64xf32>
    %66 = vector.extract_strided_slice %55 {offsets = [0, 192], sizes = [2, 64], strides = [1, 1]} : vector<2x256xf32> to vector<2x64xf32>
    %67 = arith.negf %66 : vector<2x64xf32>
    %68 = math.exp %67 : vector<2x64xf32>
    %cst_30 = arith.constant 1.000000e+00 : f32
    %69 = vector.broadcast %cst_30 : f32 to vector<2x64xf32>
    %70 = arith.addf %69, %68 : vector<2x64xf32>
    %71 = arith.divf %69, %70 : vector<2x64xf32>
    %72 = arith.mulf %63, %43 : vector<2x64xf32>
    %73 = arith.mulf %62, %65 : vector<2x64xf32>
    %74 = arith.addf %72, %73 : vector<2x64xf32>
    %75 = math.tanh %74 : vector<2x64xf32>
    %76 = arith.mulf %71, %75 : vector<2x64xf32>
    %77 = vector.extract_strided_slice %76 {offsets = [0, 0], sizes = [2, 32], strides = [1, 1]} : vector<2x64xf32> to vector<2x32xf32>
    %c2_31 = arith.constant 2 : index
    %c0_32 = arith.constant 0 : index
    %78 = vector.load %arg8[%c2_31, %c0_32] : memref<16x32xf32, #tpu.memory_space<vmem>>, vector<2x32xf32>
    tpu.vector_store %arg8[%c2_31, %c0_32], %77 {strides = array<i32>} : memref<16x32xf32, #tpu.memory_space<vmem>>, vector<2x32xf32>,
    %79 = vector.extract_strided_slice %76 {offsets = [0, 32], sizes = [2, 32], strides = [1, 1]} : vector<2x64xf32> to vector<2x32xf32>
    %c12_33 = arith.constant 12 : index
    %c0_34 = arith.constant 0 : index
    %80 = vector.load %arg9[%c12_33, %c0_34] : memref<16x32xf32, #tpu.memory_space<vmem>>, vector<2x32xf32>
    tpu.vector_store %arg9[%c12_33, %c0_34], %79 {strides = array<i32>} : memref<16x32xf32, #tpu.memory_space<vmem>>, vector<2x32xf32>,
    %c4 = arith.constant 4 : index
    %c0_35 = arith.constant 0 : index
    %81 = vector.load %arg6[%c4, %c0_35] : memref<16x256xf32, #tpu.memory_space<vmem>>, vector<2x256xf32>
    %c10 = arith.constant 10 : index
    %c0_36 = arith.constant 0 : index
    %82 = vector.load %arg7[%c10, %c0_36] : memref<16x256xf32, #tpu.memory_space<vmem>>, vector<2x256xf32>
    %83 = arith.addf %81, %82 : vector<2x256xf32>
    %84 = arith.truncf %76 : vector<2x64xf32> to vector<2x64xbf16>
    %cst_37 = arith.constant dense<0.000000e+00> : vector<2x256xf32>
    %85 = tpu.matmul %84, %7, %cst_37 {dimension_numbers = #tpu.dot_dimension_numbers<[1], [0], [0], [1], [0, 0, 1, 1], [], []>} : vector<2x64xbf16>, vector<64x256xbf16>, vector<2x256xf32> -> vector<2x256xf32>
    %86 = arith.addf %83, %85 : vector<2x256xf32>
    %87 = vector.extract_strided_slice %86 {offsets = [0, 0], sizes = [2, 128], strides = [1, 1]} : vector<2x256xf32> to vector<2x128xf32>
    %88 = arith.negf %87 : vector<2x128xf32>
    %89 = math.exp %88 : vector<2x128xf32>
    %cst_38 = arith.constant 1.000000e+00 : f32
    %90 = vector.broadcast %cst_38 : f32 to vector<2x128xf32>
    %91 = arith.addf %90, %89 : vector<2x128xf32>
    %92 = arith.divf %90, %91 : vector<2x128xf32>
    %93 = vector.extract_strided_slice %92 {offsets = [0, 0], sizes = [2, 64], strides = [1, 1]} : vector<2x128xf32> to vector<2x64xf32>
    %94 = vector.extract_strided_slice %92 {offsets = [0, 64], sizes = [2, 64], strides = [1, 1]} : vector<2x128xf32> to vector<2x64xf32>
    %95 = vector.extract_strided_slice %86 {offsets = [0, 128], sizes = [2, 64], strides = [1, 1]} : vector<2x256xf32> to vector<2x64xf32>
    %96 = math.tanh %95 : vector<2x64xf32>
    %97 = vector.extract_strided_slice %86 {offsets = [0, 192], sizes = [2, 64], strides = [1, 1]} : vector<2x256xf32> to vector<2x64xf32>
    %98 = arith.negf %97 : vector<2x64xf32>
    %99 = math.exp %98 : vector<2x64xf32>
    %cst_39 = arith.constant 1.000000e+00 : f32
    %100 = vector.broadcast %cst_39 : f32 to vector<2x64xf32>
    %101 = arith.addf %100, %99 : vector<2x64xf32>
    %102 = arith.divf %100, %101 : vector<2x64xf32>
    %103 = arith.mulf %94, %74 : vector<2x64xf32>
    %104 = arith.mulf %93, %96 : vector<2x64xf32>
    %105 = arith.addf %103, %104 : vector<2x64xf32>
    %106 = math.tanh %105 : vector<2x64xf32>
    %107 = arith.mulf %102, %106 : vector<2x64xf32>
    %108 = vector.extract_strided_slice %107 {offsets = [0, 0], sizes = [2, 32], strides = [1, 1]} : vector<2x64xf32> to vector<2x32xf32>
    %c4_40 = arith.constant 4 : index
    %c0_41 = arith.constant 0 : index
    %109 = vector.load %arg8[%c4_40, %c0_41] : memref<16x32xf32, #tpu.memory_space<vmem>>, vector<2x32xf32>
    tpu.vector_store %arg8[%c4_40, %c0_41], %108 {strides = array<i32>} : memref<16x32xf32, #tpu.memory_space<vmem>>, vector<2x32xf32>,
    %110 = vector.extract_strided_slice %107 {offsets = [0, 32], sizes = [2, 32], strides = [1, 1]} : vector<2x64xf32> to vector<2x32xf32>
    %c10_42 = arith.constant 10 : index
    %c0_43 = arith.constant 0 : index
    %111 = vector.load %arg9[%c10_42, %c0_43] : memref<16x32xf32, #tpu.memory_space<vmem>>, vector<2x32xf32>
    tpu.vector_store %arg9[%c10_42, %c0_43], %110 {strides = array<i32>} : memref<16x32xf32, #tpu.memory_space<vmem>>, vector<2x32xf32>,
    %c6 = arith.constant 6 : index
    %c0_44 = arith.constant 0 : index
    %112 = vector.load %arg6[%c6, %c0_44] : memref<16x256xf32, #tpu.memory_space<vmem>>, vector<2x256xf32>
    %c8 = arith.constant 8 : index
    %c0_45 = arith.constant 0 : index
    %113 = vector.load %arg7[%c8, %c0_45] : memref<16x256xf32, #tpu.memory_space<vmem>>, vector<2x256xf32>
    %114 = arith.addf %112, %113 : vector<2x256xf32>
    %115 = arith.truncf %107 : vector<2x64xf32> to vector<2x64xbf16>
    %cst_46 = arith.constant dense<0.000000e+00> : vector<2x256xf32>
    %116 = tpu.matmul %115, %7, %cst_46 {dimension_numbers = #tpu.dot_dimension_numbers<[1], [0], [0], [1], [0, 0, 1, 1], [], []>} : vector<2x64xbf16>, vector<64x256xbf16>, vector<2x256xf32> -> vector<2x256xf32>
    %117 = arith.addf %114, %116 : vector<2x256xf32>
    %118 = vector.extract_strided_slice %117 {offsets = [0, 0], sizes = [2, 128], strides = [1, 1]} : vector<2x256xf32> to vector<2x128xf32>
    %119 = arith.negf %118 : vector<2x128xf32>
    %120 = math.exp %119 : vector<2x128xf32>
    %cst_47 = arith.constant 1.000000e+00 : f32
    %121 = vector.broadcast %cst_47 : f32 to vector<2x128xf32>
    %122 = arith.addf %121, %120 : vector<2x128xf32>
    %123 = arith.divf %121, %122 : vector<2x128xf32>
    %124 = vector.extract_strided_slice %123 {offsets = [0, 0], sizes = [2, 64], strides = [1, 1]} : vector<2x128xf32> to vector<2x64xf32>
    %125 = vector.extract_strided_slice %123 {offsets = [0, 64], sizes = [2, 64], strides = [1, 1]} : vector<2x128xf32> to vector<2x64xf32>
    %126 = vector.extract_strided_slice %117 {offsets = [0, 128], sizes = [2, 64], strides = [1, 1]} : vector<2x256xf32> to vector<2x64xf32>
    %127 = math.tanh %126 : vector<2x64xf32>
    %128 = vector.extract_strided_slice %117 {offsets = [0, 192], sizes = [2, 64], strides = [1, 1]} : vector<2x256xf32> to vector<2x64xf32>
    %129 = arith.negf %128 : vector<2x64xf32>
    %130 = math.exp %129 : vector<2x64xf32>
    %cst_48 = arith.constant 1.000000e+00 : f32
    %131 = vector.broadcast %cst_48 : f32 to vector<2x64xf32>
    %132 = arith.addf %131, %130 : vector<2x64xf32>
    %133 = arith.divf %131, %132 : vector<2x64xf32>
    %134 = arith.mulf %125, %105 : vector<2x64xf32>
    %135 = arith.mulf %124, %127 : vector<2x64xf32>
    %136 = arith.addf %134, %135 : vector<2x64xf32>
    %137 = math.tanh %136 : vector<2x64xf32>
    %138 = arith.mulf %133, %137 : vector<2x64xf32>
    %139 = vector.extract_strided_slice %138 {offsets = [0, 0], sizes = [2, 32], strides = [1, 1]} : vector<2x64xf32> to vector<2x32xf32>
    %c6_49 = arith.constant 6 : index
    %c0_50 = arith.constant 0 : index
    %140 = vector.load %arg8[%c6_49, %c0_50] : memref<16x32xf32, #tpu.memory_space<vmem>>, vector<2x32xf32>
    tpu.vector_store %arg8[%c6_49, %c0_50], %139 {strides = array<i32>} : memref<16x32xf32, #tpu.memory_space<vmem>>, vector<2x32xf32>,
    %141 = vector.extract_strided_slice %138 {offsets = [0, 32], sizes = [2, 32], strides = [1, 1]} : vector<2x64xf32> to vector<2x32xf32>
    %c8_51 = arith.constant 8 : index
    %c0_52 = arith.constant 0 : index
    %142 = vector.load %arg9[%c8_51, %c0_52] : memref<16x32xf32, #tpu.memory_space<vmem>>, vector<2x32xf32>
    tpu.vector_store %arg9[%c8_51, %c0_52], %141 {strides = array<i32>} : memref<16x32xf32, #tpu.memory_space<vmem>>, vector<2x32xf32>,
    %c8_53 = arith.constant 8 : index
    %c0_54 = arith.constant 0 : index
    %143 = vector.load %arg6[%c8_53, %c0_54] : memref<16x256xf32, #tpu.memory_space<vmem>>, vector<2x256xf32>
    %c6_55 = arith.constant 6 : index
    %c0_56 = arith.constant 0 : index
    %144 = vector.load %arg7[%c6_55, %c0_56] : memref<16x256xf32, #tpu.memory_space<vmem>>, vector<2x256xf32>
    %145 = arith.addf %143, %144 : vector<2x256xf32>
    %146 = arith.truncf %138 : vector<2x64xf32> to vector<2x64xbf16>
    %cst_57 = arith.constant dense<0.000000e+00> : vector<2x256xf32>
    %147 = tpu.matmul %146, %7, %cst_57 {dimension_numbers = #tpu.dot_dimension_numbers<[1], [0], [0], [1], [0, 0, 1, 1], [], []>} : vector<2x64xbf16>, vector<64x256xbf16>, vector<2x256xf32> -> vector<2x256xf32>
    %148 = arith.addf %145, %147 : vector<2x256xf32>
    %149 = vector.extract_strided_slice %148 {offsets = [0, 0], sizes = [2, 128], strides = [1, 1]} : vector<2x256xf32> to vector<2x128xf32>
    %150 = arith.negf %149 : vector<2x128xf32>
    %151 = math.exp %150 : vector<2x128xf32>
    %cst_58 = arith.constant 1.000000e+00 : f32
    %152 = vector.broadcast %cst_58 : f32 to vector<2x128xf32>
    %153 = arith.addf %152, %151 : vector<2x128xf32>
    %154 = arith.divf %152, %153 : vector<2x128xf32>
    %155 = vector.extract_strided_slice %154 {offsets = [0, 0], sizes = [2, 64], strides = [1, 1]} : vector<2x128xf32> to vector<2x64xf32>
    %156 = vector.extract_strided_slice %154 {offsets = [0, 64], sizes = [2, 64], strides = [1, 1]} : vector<2x128xf32> to vector<2x64xf32>
    %157 = vector.extract_strided_slice %148 {offsets = [0, 128], sizes = [2, 64], strides = [1, 1]} : vector<2x256xf32> to vector<2x64xf32>
    %158 = math.tanh %157 : vector<2x64xf32>
    %159 = vector.extract_strided_slice %148 {offsets = [0, 192], sizes = [2, 64], strides = [1, 1]} : vector<2x256xf32> to vector<2x64xf32>
    %160 = arith.negf %159 : vector<2x64xf32>
    %161 = math.exp %160 : vector<2x64xf32>
    %cst_59 = arith.constant 1.000000e+00 : f32
    %162 = vector.broadcast %cst_59 : f32 to vector<2x64xf32>
    %163 = arith.addf %162, %161 : vector<2x64xf32>
    %164 = arith.divf %162, %163 : vector<2x64xf32>
    %165 = arith.mulf %156, %136 : vector<2x64xf32>
    %166 = arith.mulf %155, %158 : vector<2x64xf32>
    %167 = arith.addf %165, %166 : vector<2x64xf32>
    %168 = math.tanh %167 : vector<2x64xf32>
    %169 = arith.mulf %164, %168 : vector<2x64xf32>
    %170 = vector.extract_strided_slice %169 {offsets = [0, 0], sizes = [2, 32], strides = [1, 1]} : vector<2x64xf32> to vector<2x32xf32>
    %c8_60 = arith.constant 8 : index
    %c0_61 = arith.constant 0 : index
    %171 = vector.load %arg8[%c8_60, %c0_61] : memref<16x32xf32, #tpu.memory_space<vmem>>, vector<2x32xf32>
    tpu.vector_store %arg8[%c8_60, %c0_61], %170 {strides = array<i32>} : memref<16x32xf32, #tpu.memory_space<vmem>>, vector<2x32xf32>,
    %172 = vector.extract_strided_slice %169 {offsets = [0, 32], sizes = [2, 32], strides = [1, 1]} : vector<2x64xf32> to vector<2x32xf32>
    %c6_62 = arith.constant 6 : index
    %c0_63 = arith.constant 0 : index
    %173 = vector.load %arg9[%c6_62, %c0_63] : memref<16x32xf32, #tpu.memory_space<vmem>>, vector<2x32xf32>
    tpu.vector_store %arg9[%c6_62, %c0_63], %172 {strides = array<i32>} : memref<16x32xf32, #tpu.memory_space<vmem>>, vector<2x32xf32>,
    %c10_64 = arith.constant 10 : index
    %c0_65 = arith.constant 0 : index
    %174 = vector.load %arg6[%c10_64, %c0_65] : memref<16x256xf32, #tpu.memory_space<vmem>>, vector<2x256xf32>
    %c4_66 = arith.constant 4 : index
    %c0_67 = arith.constant 0 : index
    %175 = vector.load %arg7[%c4_66, %c0_67] : memref<16x256xf32, #tpu.memory_space<vmem>>, vector<2x256xf32>
    %176 = arith.addf %174, %175 : vector<2x256xf32>
    %177 = arith.truncf %169 : vector<2x64xf32> to vector<2x64xbf16>
    %cst_68 = arith.constant dense<0.000000e+00> : vector<2x256xf32>
    %178 = tpu.matmul %177, %7, %cst_68 {dimension_numbers = #tpu.dot_dimension_numbers<[1], [0], [0], [1], [0, 0, 1, 1], [], []>} : vector<2x64xbf16>, vector<64x256xbf16>, vector<2x256xf32> -> vector<2x256xf32>
    %179 = arith.addf %176, %178 : vector<2x256xf32>
    %180 = vector.extract_strided_slice %179 {offsets = [0, 0], sizes = [2, 128], strides = [1, 1]} : vector<2x256xf32> to vector<2x128xf32>
    %181 = arith.negf %180 : vector<2x128xf32>
    %182 = math.exp %181 : vector<2x128xf32>
    %cst_69 = arith.constant 1.000000e+00 : f32
    %183 = vector.broadcast %cst_69 : f32 to vector<2x128xf32>
    %184 = arith.addf %183, %182 : vector<2x128xf32>
    %185 = arith.divf %183, %184 : vector<2x128xf32>
    %186 = vector.extract_strided_slice %185 {offsets = [0, 0], sizes = [2, 64], strides = [1, 1]} : vector<2x128xf32> to vector<2x64xf32>
    %187 = vector.extract_strided_slice %185 {offsets = [0, 64], sizes = [2, 64], strides = [1, 1]} : vector<2x128xf32> to vector<2x64xf32>
    %188 = vector.extract_strided_slice %179 {offsets = [0, 128], sizes = [2, 64], strides = [1, 1]} : vector<2x256xf32> to vector<2x64xf32>
    %189 = math.tanh %188 : vector<2x64xf32>
    %190 = vector.extract_strided_slice %179 {offsets = [0, 192], sizes = [2, 64], strides = [1, 1]} : vector<2x256xf32> to vector<2x64xf32>
    %191 = arith.negf %190 : vector<2x64xf32>
    %192 = math.exp %191 : vector<2x64xf32>
    %cst_70 = arith.constant 1.000000e+00 : f32
    %193 = vector.broadcast %cst_70 : f32 to vector<2x64xf32>
    %194 = arith.addf %193, %192 : vector<2x64xf32>
    %195 = arith.divf %193, %194 : vector<2x64xf32>
    %196 = arith.mulf %187, %167 : vector<2x64xf32>
    %197 = arith.mulf %186, %189 : vector<2x64xf32>
    %198 = arith.addf %196, %197 : vector<2x64xf32>
    %199 = math.tanh %198 : vector<2x64xf32>
    %200 = arith.mulf %195, %199 : vector<2x64xf32>
    %201 = vector.extract_strided_slice %200 {offsets = [0, 0], sizes = [2, 32], strides = [1, 1]} : vector<2x64xf32> to vector<2x32xf32>
    %c10_71 = arith.constant 10 : index
    %c0_72 = arith.constant 0 : index
    %202 = vector.load %arg8[%c10_71, %c0_72] : memref<16x32xf32, #tpu.memory_space<vmem>>, vector<2x32xf32>
    tpu.vector_store %arg8[%c10_71, %c0_72], %201 {strides = array<i32>} : memref<16x32xf32, #tpu.memory_space<vmem>>, vector<2x32xf32>,
    %203 = vector.extract_strided_slice %200 {offsets = [0, 32], sizes = [2, 32], strides = [1, 1]} : vector<2x64xf32> to vector<2x32xf32>
    %c4_73 = arith.constant 4 : index
    %c0_74 = arith.constant 0 : index
    %204 = vector.load %arg9[%c4_73, %c0_74] : memref<16x32xf32, #tpu.memory_space<vmem>>, vector<2x32xf32>
    tpu.vector_store %arg9[%c4_73, %c0_74], %203 {strides = array<i32>} : memref<16x32xf32, #tpu.memory_space<vmem>>, vector<2x32xf32>,
    %c12_75 = arith.constant 12 : index
    %c0_76 = arith.constant 0 : index
    %205 = vector.load %arg6[%c12_75, %c0_76] : memref<16x256xf32, #tpu.memory_space<vmem>>, vector<2x256xf32>
    %c2_77 = arith.constant 2 : index
    %c0_78 = arith.constant 0 : index
    %206 = vector.load %arg7[%c2_77, %c0_78] : memref<16x256xf32, #tpu.memory_space<vmem>>, vector<2x256xf32>
    %207 = arith.addf %205, %206 : vector<2x256xf32>
    %208 = arith.truncf %200 : vector<2x64xf32> to vector<2x64xbf16>
    %cst_79 = arith.constant dense<0.000000e+00> : vector<2x256xf32>
    %209 = tpu.matmul %208, %7, %cst_79 {dimension_numbers = #tpu.dot_dimension_numbers<[1], [0], [0], [1], [0, 0, 1, 1], [], []>} : vector<2x64xbf16>, vector<64x256xbf16>, vector<2x256xf32> -> vector<2x256xf32>
    %210 = arith.addf %207, %209 : vector<2x256xf32>
    %211 = vector.extract_strided_slice %210 {offsets = [0, 0], sizes = [2, 128], strides = [1, 1]} : vector<2x256xf32> to vector<2x128xf32>
    %212 = arith.negf %211 : vector<2x128xf32>
    %213 = math.exp %212 : vector<2x128xf32>
    %cst_80 = arith.constant 1.000000e+00 : f32
    %214 = vector.broadcast %cst_80 : f32 to vector<2x128xf32>
    %215 = arith.addf %214, %213 : vector<2x128xf32>
    %216 = arith.divf %214, %215 : vector<2x128xf32>
    %217 = vector.extract_strided_slice %216 {offsets = [0, 0], sizes = [2, 64], strides = [1, 1]} : vector<2x128xf32> to vector<2x64xf32>
    %218 = vector.extract_strided_slice %216 {offsets = [0, 64], sizes = [2, 64], strides = [1, 1]} : vector<2x128xf32> to vector<2x64xf32>
    %219 = vector.extract_strided_slice %210 {offsets = [0, 128], sizes = [2, 64], strides = [1, 1]} : vector<2x256xf32> to vector<2x64xf32>
    %220 = math.tanh %219 : vector<2x64xf32>
    %221 = vector.extract_strided_slice %210 {offsets = [0, 192], sizes = [2, 64], strides = [1, 1]} : vector<2x256xf32> to vector<2x64xf32>
    %222 = arith.negf %221 : vector<2x64xf32>
    %223 = math.exp %222 : vector<2x64xf32>
    %cst_81 = arith.constant 1.000000e+00 : f32
    %224 = vector.broadcast %cst_81 : f32 to vector<2x64xf32>
    %225 = arith.addf %224, %223 : vector<2x64xf32>
    %226 = arith.divf %224, %225 : vector<2x64xf32>
    %227 = arith.mulf %218, %198 : vector<2x64xf32>
    %228 = arith.mulf %217, %220 : vector<2x64xf32>
    %229 = arith.addf %227, %228 : vector<2x64xf32>
    %230 = math.tanh %229 : vector<2x64xf32>
    %231 = arith.mulf %226, %230 : vector<2x64xf32>
    %232 = vector.extract_strided_slice %231 {offsets = [0, 0], sizes = [2, 32], strides = [1, 1]} : vector<2x64xf32> to vector<2x32xf32>
    %c12_82 = arith.constant 12 : index
    %c0_83 = arith.constant 0 : index
    %233 = vector.load %arg8[%c12_82, %c0_83] : memref<16x32xf32, #tpu.memory_space<vmem>>, vector<2x32xf32>
    tpu.vector_store %arg8[%c12_82, %c0_83], %232 {strides = array<i32>} : memref<16x32xf32, #tpu.memory_space<vmem>>, vector<2x32xf32>,
    %234 = vector.extract_strided_slice %231 {offsets = [0, 32], sizes = [2, 32], strides = [1, 1]} : vector<2x64xf32> to vector<2x32xf32>
    %c2_84 = arith.constant 2 : index
    %c0_85 = arith.constant 0 : index
    %235 = vector.load %arg9[%c2_84, %c0_85] : memref<16x32xf32, #tpu.memory_space<vmem>>, vector<2x32xf32>
    tpu.vector_store %arg9[%c2_84, %c0_85], %234 {strides = array<i32>} : memref<16x32xf32, #tpu.memory_space<vmem>>, vector<2x32xf32>,
    %c14_86 = arith.constant 14 : index
    %c0_87 = arith.constant 0 : index
    %236 = vector.load %arg6[%c14_86, %c0_87] : memref<16x256xf32, #tpu.memory_space<vmem>>, vector<2x256xf32>
    %c0_88 = arith.constant 0 : index
    %c0_89 = arith.constant 0 : index
    %237 = vector.load %arg7[%c0_88, %c0_89] : memref<16x256xf32, #tpu.memory_space<vmem>>, vector<2x256xf32>
    %238 = arith.addf %236, %237 : vector<2x256xf32>
    %239 = arith.truncf %231 : vector<2x64xf32> to vector<2x64xbf16>
    %cst_90 = arith.constant dense<0.000000e+00> : vector<2x256xf32>
    %240 = tpu.matmul %239, %7, %cst_90 {dimension_numbers = #tpu.dot_dimension_numbers<[1], [0], [0], [1], [0, 0, 1, 1], [], []>} : vector<2x64xbf16>, vector<64x256xbf16>, vector<2x256xf32> -> vector<2x256xf32>
    %241 = arith.addf %238, %240 : vector<2x256xf32>
    %242 = vector.extract_strided_slice %241 {offsets = [0, 0], sizes = [2, 128], strides = [1, 1]} : vector<2x256xf32> to vector<2x128xf32>
    %243 = arith.negf %242 : vector<2x128xf32>
    %244 = math.exp %243 : vector<2x128xf32>
    %cst_91 = arith.constant 1.000000e+00 : f32
    %245 = vector.broadcast %cst_91 : f32 to vector<2x128xf32>
    %246 = arith.addf %245, %244 : vector<2x128xf32>
    %247 = arith.divf %245, %246 : vector<2x128xf32>
    %248 = vector.extract_strided_slice %247 {offsets = [0, 0], sizes = [2, 64], strides = [1, 1]} : vector<2x128xf32> to vector<2x64xf32>
    %249 = vector.extract_strided_slice %247 {offsets = [0, 64], sizes = [2, 64], strides = [1, 1]} : vector<2x128xf32> to vector<2x64xf32>
    %250 = vector.extract_strided_slice %241 {offsets = [0, 128], sizes = [2, 64], strides = [1, 1]} : vector<2x256xf32> to vector<2x64xf32>
    %251 = math.tanh %250 : vector<2x64xf32>
    %252 = vector.extract_strided_slice %241 {offsets = [0, 192], sizes = [2, 64], strides = [1, 1]} : vector<2x256xf32> to vector<2x64xf32>
    %253 = arith.negf %252 : vector<2x64xf32>
    %254 = math.exp %253 : vector<2x64xf32>
    %cst_92 = arith.constant 1.000000e+00 : f32
    %255 = vector.broadcast %cst_92 : f32 to vector<2x64xf32>
    %256 = arith.addf %255, %254 : vector<2x64xf32>
    %257 = arith.divf %255, %256 : vector<2x64xf32>
    %258 = arith.mulf %249, %229 : vector<2x64xf32>
    %259 = arith.mulf %248, %251 : vector<2x64xf32>
    %260 = arith.addf %258, %259 : vector<2x64xf32>
    %261 = math.tanh %260 : vector<2x64xf32>
    %262 = arith.mulf %257, %261 : vector<2x64xf32>
    %263 = vector.extract_strided_slice %262 {offsets = [0, 0], sizes = [2, 32], strides = [1, 1]} : vector<2x64xf32> to vector<2x32xf32>
    %c14_93 = arith.constant 14 : index
    %c0_94 = arith.constant 0 : index
    %264 = vector.load %arg8[%c14_93, %c0_94] : memref<16x32xf32, #tpu.memory_space<vmem>>, vector<2x32xf32>
    tpu.vector_store %arg8[%c14_93, %c0_94], %263 {strides = array<i32>} : memref<16x32xf32, #tpu.memory_space<vmem>>, vector<2x32xf32>,
    %265 = vector.extract_strided_slice %262 {offsets = [0, 32], sizes = [2, 32], strides = [1, 1]} : vector<2x64xf32> to vector<2x32xf32>
    %c0_95 = arith.constant 0 : index
    %c0_96 = arith.constant 0 : index
    %266 = vector.load %arg9[%c0_95, %c0_96] : memref<16x32xf32, #tpu.memory_space<vmem>>, vector<2x32xf32>
    tpu.vector_store %arg9[%c0_95, %c0_96], %265 {strides = array<i32>} : memref<16x32xf32, #tpu.memory_space<vmem>>, vector<2x32xf32>,
    %c0_97 = arith.constant 0 : index
    %c0_98 = arith.constant 0 : index
    %267 = vector.load %arg8[%c0_97, %c0_98] : memref<16x32xf32, #tpu.memory_space<vmem>>, vector<16x32xf32>
    %c0_99 = arith.constant 0 : index
    %c0_100 = arith.constant 0 : index
    %268 = vector.load %arg9[%c0_99, %c0_100] : memref<16x32xf32, #tpu.memory_space<vmem>>, vector<16x32xf32>
    %269 = tpu.concatenate %267, %268 in 1 : vector<16x32xf32>, vector<16x32xf32> -> vector<16x64xf32>
    %c0_101 = arith.constant 0 : index
    %c0_102 = arith.constant 0 : index
    %270 = vector.load %arg3[%c0_101, %c0_102] : memref<193x256xbf16, #tpu.memory_space<vmem>>, vector<64x256xbf16>
    %c64_103 = arith.constant 64 : index
    %c0_104 = arith.constant 0 : index
    %271 = vector.load %arg3[%c64_103, %c0_104] : memref<193x256xbf16, #tpu.memory_space<vmem>>, vector<64x256xbf16>
    %c128_105 = arith.constant 128 : index
    %c0_106 = arith.constant 0 : index
    %272 = vector.load %arg3[%c128_105, %c0_106] : memref<193x256xbf16, #tpu.memory_space<vmem>>, vector<64x256xbf16>
    %c192 = arith.constant 192 : index
    %c0_107 = arith.constant 0 : index
    %273 = vector.load %arg3[%c192, %c0_107] : memref<193x256xbf16, #tpu.memory_space<vmem>>, vector<1x256xbf16>
    %274 = arith.extf %273 : vector<1x256xbf16> to vector<1x256xf32>
    %275 = arith.truncf %269 : vector<16x64xf32> to vector<16x64xbf16>
    %cst_108 = arith.constant dense<0.000000e+00> : vector<16x256xf32>
    %276 = tpu.matmul %275, %270, %cst_108 {dimension_numbers = #tpu.dot_dimension_numbers<[1], [0], [0], [1], [0, 0, 1, 1], [], []>} : vector<16x64xbf16>, vector<64x256xbf16>, vector<16x256xf32> -> vector<16x256xf32>
    %277 = vector.broadcast %274 : vector<1x256xf32> to vector<16x256xf32>
    %278 = arith.addf %276, %277 : vector<16x256xf32>
    %c0_109 = arith.constant 0 : index
    %c0_110 = arith.constant 0 : index
    %279 = vector.load %arg6[%c0_109, %c0_110] : memref<16x256xf32, #tpu.memory_space<vmem>>, vector<16x256xf32>
    tpu.vector_store %arg6[%c0_109, %c0_110], %278 {strides = array<i32>} : memref<16x256xf32, #tpu.memory_space<vmem>>, vector<16x256xf32>,
    %cst_111 = arith.constant dense<0.000000e+00> : vector<16x256xf32>
    %280 = tpu.matmul %275, %271, %cst_111 {dimension_numbers = #tpu.dot_dimension_numbers<[1], [0], [0], [1], [0, 0, 1, 1], [], []>} : vector<16x64xbf16>, vector<64x256xbf16>, vector<16x256xf32> -> vector<16x256xf32>
    %c0_112 = arith.constant 0 : index
    %c0_113 = arith.constant 0 : index
    %281 = vector.load %arg7[%c0_112, %c0_113] : memref<16x256xf32, #tpu.memory_space<vmem>>, vector<16x256xf32>
    tpu.vector_store %arg7[%c0_112, %c0_113], %280 {strides = array<i32>} : memref<16x256xf32, #tpu.memory_space<vmem>>, vector<16x256xf32>,
    %cst_114 = arith.constant 0.000000e+00 : f32
    %282 = vector.broadcast %cst_114 : f32 to vector<2x64xf32>
    %cst_115 = arith.constant 0.000000e+00 : f32
    %283 = vector.broadcast %cst_115 : f32 to vector<2x64xf32>
    %c0_116 = arith.constant 0 : index
    %c0_117 = arith.constant 0 : index
    %284 = vector.load %arg6[%c0_116, %c0_117] : memref<16x256xf32, #tpu.memory_space<vmem>>, vector<2x256xf32>
    %c14_118 = arith.constant 14 : index
    %c0_119 = arith.constant 0 : index
    %285 = vector.load %arg7[%c14_118, %c0_119] : memref<16x256xf32, #tpu.memory_space<vmem>>, vector<2x256xf32>
    %286 = arith.addf %284, %285 : vector<2x256xf32>
    %287 = arith.truncf %282 : vector<2x64xf32> to vector<2x64xbf16>
    %cst_120 = arith.constant dense<0.000000e+00> : vector<2x256xf32>
    %288 = tpu.matmul %287, %272, %cst_120 {dimension_numbers = #tpu.dot_dimension_numbers<[1], [0], [0], [1], [0, 0, 1, 1], [], []>} : vector<2x64xbf16>, vector<64x256xbf16>, vector<2x256xf32> -> vector<2x256xf32>
    %289 = arith.addf %286, %288 : vector<2x256xf32>
    %290 = vector.extract_strided_slice %289 {offsets = [0, 0], sizes = [2, 128], strides = [1, 1]} : vector<2x256xf32> to vector<2x128xf32>
    %291 = arith.negf %290 : vector<2x128xf32>
    %292 = math.exp %291 : vector<2x128xf32>
    %cst_121 = arith.constant 1.000000e+00 : f32
    %293 = vector.broadcast %cst_121 : f32 to vector<2x128xf32>
    %294 = arith.addf %293, %292 : vector<2x128xf32>
    %295 = arith.divf %293, %294 : vector<2x128xf32>
    %296 = vector.extract_strided_slice %295 {offsets = [0, 0], sizes = [2, 64], strides = [1, 1]} : vector<2x128xf32> to vector<2x64xf32>
    %297 = vector.extract_strided_slice %295 {offsets = [0, 64], sizes = [2, 64], strides = [1, 1]} : vector<2x128xf32> to vector<2x64xf32>
    %298 = vector.extract_strided_slice %289 {offsets = [0, 128], sizes = [2, 64], strides = [1, 1]} : vector<2x256xf32> to vector<2x64xf32>
    %299 = math.tanh %298 : vector<2x64xf32>
    %300 = vector.extract_strided_slice %289 {offsets = [0, 192], sizes = [2, 64], strides = [1, 1]} : vector<2x256xf32> to vector<2x64xf32>
    %301 = arith.negf %300 : vector<2x64xf32>
    %302 = math.exp %301 : vector<2x64xf32>
    %cst_122 = arith.constant 1.000000e+00 : f32
    %303 = vector.broadcast %cst_122 : f32 to vector<2x64xf32>
    %304 = arith.addf %303, %302 : vector<2x64xf32>
    %305 = arith.divf %303, %304 : vector<2x64xf32>
    %306 = arith.mulf %297, %283 : vector<2x64xf32>
    %307 = arith.mulf %296, %299 : vector<2x64xf32>
    %308 = arith.addf %306, %307 : vector<2x64xf32>
    %309 = math.tanh %308 : vector<2x64xf32>
    %310 = arith.mulf %305, %309 : vector<2x64xf32>
    %311 = vector.extract_strided_slice %310 {offsets = [0, 0], sizes = [2, 32], strides = [1, 1]} : vector<2x64xf32> to vector<2x32xf32>
    %c0_123 = arith.constant 0 : index
    %c0_124 = arith.constant 0 : index
    %312 = vector.load %arg8[%c0_123, %c0_124] : memref<16x32xf32, #tpu.memory_space<vmem>>, vector<2x32xf32>
    tpu.vector_store %arg8[%c0_123, %c0_124], %311 {strides = array<i32>} : memref<16x32xf32, #tpu.memory_space<vmem>>, vector<2x32xf32>,
    %313 = vector.extract_strided_slice %310 {offsets = [0, 32], sizes = [2, 32], strides = [1, 1]} : vector<2x64xf32> to vector<2x32xf32>
    %c14_125 = arith.constant 14 : index
    %c0_126 = arith.constant 0 : index
    %314 = vector.load %arg9[%c14_125, %c0_126] : memref<16x32xf32, #tpu.memory_space<vmem>>, vector<2x32xf32>
    tpu.vector_store %arg9[%c14_125, %c0_126], %313 {strides = array<i32>} : memref<16x32xf32, #tpu.memory_space<vmem>>, vector<2x32xf32>,
    %c2_127 = arith.constant 2 : index
    %c0_128 = arith.constant 0 : index
    %315 = vector.load %arg6[%c2_127, %c0_128] : memref<16x256xf32, #tpu.memory_space<vmem>>, vector<2x256xf32>
    %c12_129 = arith.constant 12 : index
    %c0_130 = arith.constant 0 : index
    %316 = vector.load %arg7[%c12_129, %c0_130] : memref<16x256xf32, #tpu.memory_space<vmem>>, vector<2x256xf32>
    %317 = arith.addf %315, %316 : vector<2x256xf32>
    %318 = arith.truncf %310 : vector<2x64xf32> to vector<2x64xbf16>
    %cst_131 = arith.constant dense<0.000000e+00> : vector<2x256xf32>
    %319 = tpu.matmul %318, %272, %cst_131 {dimension_numbers = #tpu.dot_dimension_numbers<[1], [0], [0], [1], [0, 0, 1, 1], [], []>} : vector<2x64xbf16>, vector<64x256xbf16>, vector<2x256xf32> -> vector<2x256xf32>
    %320 = arith.addf %317, %319 : vector<2x256xf32>
    %321 = vector.extract_strided_slice %320 {offsets = [0, 0], sizes = [2, 128], strides = [1, 1]} : vector<2x256xf32> to vector<2x128xf32>
    %322 = arith.negf %321 : vector<2x128xf32>
    %323 = math.exp %322 : vector<2x128xf32>
    %cst_132 = arith.constant 1.000000e+00 : f32
    %324 = vector.broadcast %cst_132 : f32 to vector<2x128xf32>
    %325 = arith.addf %324, %323 : vector<2x128xf32>
    %326 = arith.divf %324, %325 : vector<2x128xf32>
    %327 = vector.extract_strided_slice %326 {offsets = [0, 0], sizes = [2, 64], strides = [1, 1]} : vector<2x128xf32> to vector<2x64xf32>
    %328 = vector.extract_strided_slice %326 {offsets = [0, 64], sizes = [2, 64], strides = [1, 1]} : vector<2x128xf32> to vector<2x64xf32>
    %329 = vector.extract_strided_slice %320 {offsets = [0, 128], sizes = [2, 64], strides = [1, 1]} : vector<2x256xf32> to vector<2x64xf32>
    %330 = math.tanh %329 : vector<2x64xf32>
    %331 = vector.extract_strided_slice %320 {offsets = [0, 192], sizes = [2, 64], strides = [1, 1]} : vector<2x256xf32> to vector<2x64xf32>
    %332 = arith.negf %331 : vector<2x64xf32>
    %333 = math.exp %332 : vector<2x64xf32>
    %cst_133 = arith.constant 1.000000e+00 : f32
    %334 = vector.broadcast %cst_133 : f32 to vector<2x64xf32>
    %335 = arith.addf %334, %333 : vector<2x64xf32>
    %336 = arith.divf %334, %335 : vector<2x64xf32>
    %337 = arith.mulf %328, %308 : vector<2x64xf32>
    %338 = arith.mulf %327, %330 : vector<2x64xf32>
    %339 = arith.addf %337, %338 : vector<2x64xf32>
    %340 = math.tanh %339 : vector<2x64xf32>
    %341 = arith.mulf %336, %340 : vector<2x64xf32>
    %342 = vector.extract_strided_slice %341 {offsets = [0, 0], sizes = [2, 32], strides = [1, 1]} : vector<2x64xf32> to vector<2x32xf32>
    %c2_134 = arith.constant 2 : index
    %c0_135 = arith.constant 0 : index
    %343 = vector.load %arg8[%c2_134, %c0_135] : memref<16x32xf32, #tpu.memory_space<vmem>>, vector<2x32xf32>
    tpu.vector_store %arg8[%c2_134, %c0_135], %342 {strides = array<i32>} : memref<16x32xf32, #tpu.memory_space<vmem>>, vector<2x32xf32>,
    %344 = vector.extract_strided_slice %341 {offsets = [0, 32], sizes = [2, 32], strides = [1, 1]} : vector<2x64xf32> to vector<2x32xf32>
    %c12_136 = arith.constant 12 : index
    %c0_137 = arith.constant 0 : index
    %345 = vector.load %arg9[%c12_136, %c0_137] : memref<16x32xf32, #tpu.memory_space<vmem>>, vector<2x32xf32>
    tpu.vector_store %arg9[%c12_136, %c0_137], %344 {strides = array<i32>} : memref<16x32xf32, #tpu.memory_space<vmem>>, vector<2x32xf32>,
    %c4_138 = arith.constant 4 : index
    %c0_139 = arith.constant 0 : index
    %346 = vector.load %arg6[%c4_138, %c0_139] : memref<16x256xf32, #tpu.memory_space<vmem>>, vector<2x256xf32>
    %c10_140 = arith.constant 10 : index
    %c0_141 = arith.constant 0 : index
    %347 = vector.load %arg7[%c10_140, %c0_141] : memref<16x256xf32, #tpu.memory_space<vmem>>, vector<2x256xf32>
    %348 = arith.addf %346, %347 : vector<2x256xf32>
    %349 = arith.truncf %341 : vector<2x64xf32> to vector<2x64xbf16>
    %cst_142 = arith.constant dense<0.000000e+00> : vector<2x256xf32>
    %350 = tpu.matmul %349, %272, %cst_142 {dimension_numbers = #tpu.dot_dimension_numbers<[1], [0], [0], [1], [0, 0, 1, 1], [], []>} : vector<2x64xbf16>, vector<64x256xbf16>, vector<2x256xf32> -> vector<2x256xf32>
    %351 = arith.addf %348, %350 : vector<2x256xf32>
    %352 = vector.extract_strided_slice %351 {offsets = [0, 0], sizes = [2, 128], strides = [1, 1]} : vector<2x256xf32> to vector<2x128xf32>
    %353 = arith.negf %352 : vector<2x128xf32>
    %354 = math.exp %353 : vector<2x128xf32>
    %cst_143 = arith.constant 1.000000e+00 : f32
    %355 = vector.broadcast %cst_143 : f32 to vector<2x128xf32>
    %356 = arith.addf %355, %354 : vector<2x128xf32>
    %357 = arith.divf %355, %356 : vector<2x128xf32>
    %358 = vector.extract_strided_slice %357 {offsets = [0, 0], sizes = [2, 64], strides = [1, 1]} : vector<2x128xf32> to vector<2x64xf32>
    %359 = vector.extract_strided_slice %357 {offsets = [0, 64], sizes = [2, 64], strides = [1, 1]} : vector<2x128xf32> to vector<2x64xf32>
    %360 = vector.extract_strided_slice %351 {offsets = [0, 128], sizes = [2, 64], strides = [1, 1]} : vector<2x256xf32> to vector<2x64xf32>
    %361 = math.tanh %360 : vector<2x64xf32>
    %362 = vector.extract_strided_slice %351 {offsets = [0, 192], sizes = [2, 64], strides = [1, 1]} : vector<2x256xf32> to vector<2x64xf32>
    %363 = arith.negf %362 : vector<2x64xf32>
    %364 = math.exp %363 : vector<2x64xf32>
    %cst_144 = arith.constant 1.000000e+00 : f32
    %365 = vector.broadcast %cst_144 : f32 to vector<2x64xf32>
    %366 = arith.addf %365, %364 : vector<2x64xf32>
    %367 = arith.divf %365, %366 : vector<2x64xf32>
    %368 = arith.mulf %359, %339 : vector<2x64xf32>
    %369 = arith.mulf %358, %361 : vector<2x64xf32>
    %370 = arith.addf %368, %369 : vector<2x64xf32>
    %371 = math.tanh %370 : vector<2x64xf32>
    %372 = arith.mulf %367, %371 : vector<2x64xf32>
    %373 = vector.extract_strided_slice %372 {offsets = [0, 0], sizes = [2, 32], strides = [1, 1]} : vector<2x64xf32> to vector<2x32xf32>
    %c4_145 = arith.constant 4 : index
    %c0_146 = arith.constant 0 : index
    %374 = vector.load %arg8[%c4_145, %c0_146] : memref<16x32xf32, #tpu.memory_space<vmem>>, vector<2x32xf32>
    tpu.vector_store %arg8[%c4_145, %c0_146], %373 {strides = array<i32>} : memref<16x32xf32, #tpu.memory_space<vmem>>, vector<2x32xf32>,
    %375 = vector.extract_strided_slice %372 {offsets = [0, 32], sizes = [2, 32], strides = [1, 1]} : vector<2x64xf32> to vector<2x32xf32>
    %c10_147 = arith.constant 10 : index
    %c0_148 = arith.constant 0 : index
    %376 = vector.load %arg9[%c10_147, %c0_148] : memref<16x32xf32, #tpu.memory_space<vmem>>, vector<2x32xf32>
    tpu.vector_store %arg9[%c10_147, %c0_148], %375 {strides = array<i32>} : memref<16x32xf32, #tpu.memory_space<vmem>>, vector<2x32xf32>,
    %c6_149 = arith.constant 6 : index
    %c0_150 = arith.constant 0 : index
    %377 = vector.load %arg6[%c6_149, %c0_150] : memref<16x256xf32, #tpu.memory_space<vmem>>, vector<2x256xf32>
    %c8_151 = arith.constant 8 : index
    %c0_152 = arith.constant 0 : index
    %378 = vector.load %arg7[%c8_151, %c0_152] : memref<16x256xf32, #tpu.memory_space<vmem>>, vector<2x256xf32>
    %379 = arith.addf %377, %378 : vector<2x256xf32>
    %380 = arith.truncf %372 : vector<2x64xf32> to vector<2x64xbf16>
    %cst_153 = arith.constant dense<0.000000e+00> : vector<2x256xf32>
    %381 = tpu.matmul %380, %272, %cst_153 {dimension_numbers = #tpu.dot_dimension_numbers<[1], [0], [0], [1], [0, 0, 1, 1], [], []>} : vector<2x64xbf16>, vector<64x256xbf16>, vector<2x256xf32> -> vector<2x256xf32>
    %382 = arith.addf %379, %381 : vector<2x256xf32>
    %383 = vector.extract_strided_slice %382 {offsets = [0, 0], sizes = [2, 128], strides = [1, 1]} : vector<2x256xf32> to vector<2x128xf32>
    %384 = arith.negf %383 : vector<2x128xf32>
    %385 = math.exp %384 : vector<2x128xf32>
    %cst_154 = arith.constant 1.000000e+00 : f32
    %386 = vector.broadcast %cst_154 : f32 to vector<2x128xf32>
    %387 = arith.addf %386, %385 : vector<2x128xf32>
    %388 = arith.divf %386, %387 : vector<2x128xf32>
    %389 = vector.extract_strided_slice %388 {offsets = [0, 0], sizes = [2, 64], strides = [1, 1]} : vector<2x128xf32> to vector<2x64xf32>
    %390 = vector.extract_strided_slice %388 {offsets = [0, 64], sizes = [2, 64], strides = [1, 1]} : vector<2x128xf32> to vector<2x64xf32>
    %391 = vector.extract_strided_slice %382 {offsets = [0, 128], sizes = [2, 64], strides = [1, 1]} : vector<2x256xf32> to vector<2x64xf32>
    %392 = math.tanh %391 : vector<2x64xf32>
    %393 = vector.extract_strided_slice %382 {offsets = [0, 192], sizes = [2, 64], strides = [1, 1]} : vector<2x256xf32> to vector<2x64xf32>
    %394 = arith.negf %393 : vector<2x64xf32>
    %395 = math.exp %394 : vector<2x64xf32>
    %cst_155 = arith.constant 1.000000e+00 : f32
    %396 = vector.broadcast %cst_155 : f32 to vector<2x64xf32>
    %397 = arith.addf %396, %395 : vector<2x64xf32>
    %398 = arith.divf %396, %397 : vector<2x64xf32>
    %399 = arith.mulf %390, %370 : vector<2x64xf32>
    %400 = arith.mulf %389, %392 : vector<2x64xf32>
    %401 = arith.addf %399, %400 : vector<2x64xf32>
    %402 = math.tanh %401 : vector<2x64xf32>
    %403 = arith.mulf %398, %402 : vector<2x64xf32>
    %404 = vector.extract_strided_slice %403 {offsets = [0, 0], sizes = [2, 32], strides = [1, 1]} : vector<2x64xf32> to vector<2x32xf32>
    %c6_156 = arith.constant 6 : index
    %c0_157 = arith.constant 0 : index
    %405 = vector.load %arg8[%c6_156, %c0_157] : memref<16x32xf32, #tpu.memory_space<vmem>>, vector<2x32xf32>
    tpu.vector_store %arg8[%c6_156, %c0_157], %404 {strides = array<i32>} : memref<16x32xf32, #tpu.memory_space<vmem>>, vector<2x32xf32>,
    %406 = vector.extract_strided_slice %403 {offsets = [0, 32], sizes = [2, 32], strides = [1, 1]} : vector<2x64xf32> to vector<2x32xf32>
    %c8_158 = arith.constant 8 : index
    %c0_159 = arith.constant 0 : index
    %407 = vector.load %arg9[%c8_158, %c0_159] : memref<16x32xf32, #tpu.memory_space<vmem>>, vector<2x32xf32>
    tpu.vector_store %arg9[%c8_158, %c0_159], %406 {strides = array<i32>} : memref<16x32xf32, #tpu.memory_space<vmem>>, vector<2x32xf32>,
    %c8_160 = arith.constant 8 : index
    %c0_161 = arith.constant 0 : index
    %408 = vector.load %arg6[%c8_160, %c0_161] : memref<16x256xf32, #tpu.memory_space<vmem>>, vector<2x256xf32>
    %c6_162 = arith.constant 6 : index
    %c0_163 = arith.constant 0 : index
    %409 = vector.load %arg7[%c6_162, %c0_163] : memref<16x256xf32, #tpu.memory_space<vmem>>, vector<2x256xf32>
    %410 = arith.addf %408, %409 : vector<2x256xf32>
    %411 = arith.truncf %403 : vector<2x64xf32> to vector<2x64xbf16>
    %cst_164 = arith.constant dense<0.000000e+00> : vector<2x256xf32>
    %412 = tpu.matmul %411, %272, %cst_164 {dimension_numbers = #tpu.dot_dimension_numbers<[1], [0], [0], [1], [0, 0, 1, 1], [], []>} : vector<2x64xbf16>, vector<64x256xbf16>, vector<2x256xf32> -> vector<2x256xf32>
    %413 = arith.addf %410, %412 : vector<2x256xf32>
    %414 = vector.extract_strided_slice %413 {offsets = [0, 0], sizes = [2, 128], strides = [1, 1]} : vector<2x256xf32> to vector<2x128xf32>
    %415 = arith.negf %414 : vector<2x128xf32>
    %416 = math.exp %415 : vector<2x128xf32>
    %cst_165 = arith.constant 1.000000e+00 : f32
    %417 = vector.broadcast %cst_165 : f32 to vector<2x128xf32>
    %418 = arith.addf %417, %416 : vector<2x128xf32>
    %419 = arith.divf %417, %418 : vector<2x128xf32>
    %420 = vector.extract_strided_slice %419 {offsets = [0, 0], sizes = [2, 64], strides = [1, 1]} : vector<2x128xf32> to vector<2x64xf32>
    %421 = vector.extract_strided_slice %419 {offsets = [0, 64], sizes = [2, 64], strides = [1, 1]} : vector<2x128xf32> to vector<2x64xf32>
    %422 = vector.extract_strided_slice %413 {offsets = [0, 128], sizes = [2, 64], strides = [1, 1]} : vector<2x256xf32> to vector<2x64xf32>
    %423 = math.tanh %422 : vector<2x64xf32>
    %424 = vector.extract_strided_slice %413 {offsets = [0, 192], sizes = [2, 64], strides = [1, 1]} : vector<2x256xf32> to vector<2x64xf32>
    %425 = arith.negf %424 : vector<2x64xf32>
    %426 = math.exp %425 : vector<2x64xf32>
    %cst_166 = arith.constant 1.000000e+00 : f32
    %427 = vector.broadcast %cst_166 : f32 to vector<2x64xf32>
    %428 = arith.addf %427, %426 : vector<2x64xf32>
    %429 = arith.divf %427, %428 : vector<2x64xf32>
    %430 = arith.mulf %421, %401 : vector<2x64xf32>
    %431 = arith.mulf %420, %423 : vector<2x64xf32>
    %432 = arith.addf %430, %431 : vector<2x64xf32>
    %433 = math.tanh %432 : vector<2x64xf32>
    %434 = arith.mulf %429, %433 : vector<2x64xf32>
    %435 = vector.extract_strided_slice %434 {offsets = [0, 0], sizes = [2, 32], strides = [1, 1]} : vector<2x64xf32> to vector<2x32xf32>
    %c8_167 = arith.constant 8 : index
    %c0_168 = arith.constant 0 : index
    %436 = vector.load %arg8[%c8_167, %c0_168] : memref<16x32xf32, #tpu.memory_space<vmem>>, vector<2x32xf32>
    tpu.vector_store %arg8[%c8_167, %c0_168], %435 {strides = array<i32>} : memref<16x32xf32, #tpu.memory_space<vmem>>, vector<2x32xf32>,
    %437 = vector.extract_strided_slice %434 {offsets = [0, 32], sizes = [2, 32], strides = [1, 1]} : vector<2x64xf32> to vector<2x32xf32>
    %c6_169 = arith.constant 6 : index
    %c0_170 = arith.constant 0 : index
    %438 = vector.load %arg9[%c6_169, %c0_170] : memref<16x32xf32, #tpu.memory_space<vmem>>, vector<2x32xf32>
    tpu.vector_store %arg9[%c6_169, %c0_170], %437 {strides = array<i32>} : memref<16x32xf32, #tpu.memory_space<vmem>>, vector<2x32xf32>,
    %c10_171 = arith.constant 10 : index
    %c0_172 = arith.constant 0 : index
    %439 = vector.load %arg6[%c10_171, %c0_172] : memref<16x256xf32, #tpu.memory_space<vmem>>, vector<2x256xf32>
    %c4_173 = arith.constant 4 : index
    %c0_174 = arith.constant 0 : index
    %440 = vector.load %arg7[%c4_173, %c0_174] : memref<16x256xf32, #tpu.memory_space<vmem>>, vector<2x256xf32>
    %441 = arith.addf %439, %440 : vector<2x256xf32>
    %442 = arith.truncf %434 : vector<2x64xf32> to vector<2x64xbf16>
    %cst_175 = arith.constant dense<0.000000e+00> : vector<2x256xf32>
    %443 = tpu.matmul %442, %272, %cst_175 {dimension_numbers = #tpu.dot_dimension_numbers<[1], [0], [0], [1], [0, 0, 1, 1], [], []>} : vector<2x64xbf16>, vector<64x256xbf16>, vector<2x256xf32> -> vector<2x256xf32>
    %444 = arith.addf %441, %443 : vector<2x256xf32>
    %445 = vector.extract_strided_slice %444 {offsets = [0, 0], sizes = [2, 128], strides = [1, 1]} : vector<2x256xf32> to vector<2x128xf32>
    %446 = arith.negf %445 : vector<2x128xf32>
    %447 = math.exp %446 : vector<2x128xf32>
    %cst_176 = arith.constant 1.000000e+00 : f32
    %448 = vector.broadcast %cst_176 : f32 to vector<2x128xf32>
    %449 = arith.addf %448, %447 : vector<2x128xf32>
    %450 = arith.divf %448, %449 : vector<2x128xf32>
    %451 = vector.extract_strided_slice %450 {offsets = [0, 0], sizes = [2, 64], strides = [1, 1]} : vector<2x128xf32> to vector<2x64xf32>
    %452 = vector.extract_strided_slice %450 {offsets = [0, 64], sizes = [2, 64], strides = [1, 1]} : vector<2x128xf32> to vector<2x64xf32>
    %453 = vector.extract_strided_slice %444 {offsets = [0, 128], sizes = [2, 64], strides = [1, 1]} : vector<2x256xf32> to vector<2x64xf32>
    %454 = math.tanh %453 : vector<2x64xf32>
    %455 = vector.extract_strided_slice %444 {offsets = [0, 192], sizes = [2, 64], strides = [1, 1]} : vector<2x256xf32> to vector<2x64xf32>
    %456 = arith.negf %455 : vector<2x64xf32>
    %457 = math.exp %456 : vector<2x64xf32>
    %cst_177 = arith.constant 1.000000e+00 : f32
    %458 = vector.broadcast %cst_177 : f32 to vector<2x64xf32>
    %459 = arith.addf %458, %457 : vector<2x64xf32>
    %460 = arith.divf %458, %459 : vector<2x64xf32>
    %461 = arith.mulf %452, %432 : vector<2x64xf32>
    %462 = arith.mulf %451, %454 : vector<2x64xf32>
    %463 = arith.addf %461, %462 : vector<2x64xf32>
    %464 = math.tanh %463 : vector<2x64xf32>
    %465 = arith.mulf %460, %464 : vector<2x64xf32>
    %466 = vector.extract_strided_slice %465 {offsets = [0, 0], sizes = [2, 32], strides = [1, 1]} : vector<2x64xf32> to vector<2x32xf32>
    %c10_178 = arith.constant 10 : index
    %c0_179 = arith.constant 0 : index
    %467 = vector.load %arg8[%c10_178, %c0_179] : memref<16x32xf32, #tpu.memory_space<vmem>>, vector<2x32xf32>
    tpu.vector_store %arg8[%c10_178, %c0_179], %466 {strides = array<i32>} : memref<16x32xf32, #tpu.memory_space<vmem>>, vector<2x32xf32>,
    %468 = vector.extract_strided_slice %465 {offsets = [0, 32], sizes = [2, 32], strides = [1, 1]} : vector<2x64xf32> to vector<2x32xf32>
    %c4_180 = arith.constant 4 : index
    %c0_181 = arith.constant 0 : index
    %469 = vector.load %arg9[%c4_180, %c0_181] : memref<16x32xf32, #tpu.memory_space<vmem>>, vector<2x32xf32>
    tpu.vector_store %arg9[%c4_180, %c0_181], %468 {strides = array<i32>} : memref<16x32xf32, #tpu.memory_space<vmem>>, vector<2x32xf32>,
    %c12_182 = arith.constant 12 : index
    %c0_183 = arith.constant 0 : index
    %470 = vector.load %arg6[%c12_182, %c0_183] : memref<16x256xf32, #tpu.memory_space<vmem>>, vector<2x256xf32>
    %c2_184 = arith.constant 2 : index
    %c0_185 = arith.constant 0 : index
    %471 = vector.load %arg7[%c2_184, %c0_185] : memref<16x256xf32, #tpu.memory_space<vmem>>, vector<2x256xf32>
    %472 = arith.addf %470, %471 : vector<2x256xf32>
    %473 = arith.truncf %465 : vector<2x64xf32> to vector<2x64xbf16>
    %cst_186 = arith.constant dense<0.000000e+00> : vector<2x256xf32>
    %474 = tpu.matmul %473, %272, %cst_186 {dimension_numbers = #tpu.dot_dimension_numbers<[1], [0], [0], [1], [0, 0, 1, 1], [], []>} : vector<2x64xbf16>, vector<64x256xbf16>, vector<2x256xf32> -> vector<2x256xf32>
    %475 = arith.addf %472, %474 : vector<2x256xf32>
    %476 = vector.extract_strided_slice %475 {offsets = [0, 0], sizes = [2, 128], strides = [1, 1]} : vector<2x256xf32> to vector<2x128xf32>
    %477 = arith.negf %476 : vector<2x128xf32>
    %478 = math.exp %477 : vector<2x128xf32>
    %cst_187 = arith.constant 1.000000e+00 : f32
    %479 = vector.broadcast %cst_187 : f32 to vector<2x128xf32>
    %480 = arith.addf %479, %478 : vector<2x128xf32>
    %481 = arith.divf %479, %480 : vector<2x128xf32>
    %482 = vector.extract_strided_slice %481 {offsets = [0, 0], sizes = [2, 64], strides = [1, 1]} : vector<2x128xf32> to vector<2x64xf32>
    %483 = vector.extract_strided_slice %481 {offsets = [0, 64], sizes = [2, 64], strides = [1, 1]} : vector<2x128xf32> to vector<2x64xf32>
    %484 = vector.extract_strided_slice %475 {offsets = [0, 128], sizes = [2, 64], strides = [1, 1]} : vector<2x256xf32> to vector<2x64xf32>
    %485 = math.tanh %484 : vector<2x64xf32>
    %486 = vector.extract_strided_slice %475 {offsets = [0, 192], sizes = [2, 64], strides = [1, 1]} : vector<2x256xf32> to vector<2x64xf32>
    %487 = arith.negf %486 : vector<2x64xf32>
    %488 = math.exp %487 : vector<2x64xf32>
    %cst_188 = arith.constant 1.000000e+00 : f32
    %489 = vector.broadcast %cst_188 : f32 to vector<2x64xf32>
    %490 = arith.addf %489, %488 : vector<2x64xf32>
    %491 = arith.divf %489, %490 : vector<2x64xf32>
    %492 = arith.mulf %483, %463 : vector<2x64xf32>
    %493 = arith.mulf %482, %485 : vector<2x64xf32>
    %494 = arith.addf %492, %493 : vector<2x64xf32>
    %495 = math.tanh %494 : vector<2x64xf32>
    %496 = arith.mulf %491, %495 : vector<2x64xf32>
    %497 = vector.extract_strided_slice %496 {offsets = [0, 0], sizes = [2, 32], strides = [1, 1]} : vector<2x64xf32> to vector<2x32xf32>
    %c12_189 = arith.constant 12 : index
    %c0_190 = arith.constant 0 : index
    %498 = vector.load %arg8[%c12_189, %c0_190] : memref<16x32xf32, #tpu.memory_space<vmem>>, vector<2x32xf32>
    tpu.vector_store %arg8[%c12_189, %c0_190], %497 {strides = array<i32>} : memref<16x32xf32, #tpu.memory_space<vmem>>, vector<2x32xf32>,
    %499 = vector.extract_strided_slice %496 {offsets = [0, 32], sizes = [2, 32], strides = [1, 1]} : vector<2x64xf32> to vector<2x32xf32>
    %c2_191 = arith.constant 2 : index
    %c0_192 = arith.constant 0 : index
    %500 = vector.load %arg9[%c2_191, %c0_192] : memref<16x32xf32, #tpu.memory_space<vmem>>, vector<2x32xf32>
    tpu.vector_store %arg9[%c2_191, %c0_192], %499 {strides = array<i32>} : memref<16x32xf32, #tpu.memory_space<vmem>>, vector<2x32xf32>,
    %c14_193 = arith.constant 14 : index
    %c0_194 = arith.constant 0 : index
    %501 = vector.load %arg6[%c14_193, %c0_194] : memref<16x256xf32, #tpu.memory_space<vmem>>, vector<2x256xf32>
    %c0_195 = arith.constant 0 : index
    %c0_196 = arith.constant 0 : index
    %502 = vector.load %arg7[%c0_195, %c0_196] : memref<16x256xf32, #tpu.memory_space<vmem>>, vector<2x256xf32>
    %503 = arith.addf %501, %502 : vector<2x256xf32>
    %504 = arith.truncf %496 : vector<2x64xf32> to vector<2x64xbf16>
    %cst_197 = arith.constant dense<0.000000e+00> : vector<2x256xf32>
    %505 = tpu.matmul %504, %272, %cst_197 {dimension_numbers = #tpu.dot_dimension_numbers<[1], [0], [0], [1], [0, 0, 1, 1], [], []>} : vector<2x64xbf16>, vector<64x256xbf16>, vector<2x256xf32> -> vector<2x256xf32>
    %506 = arith.addf %503, %505 : vector<2x256xf32>
    %507 = vector.extract_strided_slice %506 {offsets = [0, 0], sizes = [2, 128], strides = [1, 1]} : vector<2x256xf32> to vector<2x128xf32>
    %508 = arith.negf %507 : vector<2x128xf32>
    %509 = math.exp %508 : vector<2x128xf32>
    %cst_198 = arith.constant 1.000000e+00 : f32
    %510 = vector.broadcast %cst_198 : f32 to vector<2x128xf32>
    %511 = arith.addf %510, %509 : vector<2x128xf32>
    %512 = arith.divf %510, %511 : vector<2x128xf32>
    %513 = vector.extract_strided_slice %512 {offsets = [0, 0], sizes = [2, 64], strides = [1, 1]} : vector<2x128xf32> to vector<2x64xf32>
    %514 = vector.extract_strided_slice %512 {offsets = [0, 64], sizes = [2, 64], strides = [1, 1]} : vector<2x128xf32> to vector<2x64xf32>
    %515 = vector.extract_strided_slice %506 {offsets = [0, 128], sizes = [2, 64], strides = [1, 1]} : vector<2x256xf32> to vector<2x64xf32>
    %516 = math.tanh %515 : vector<2x64xf32>
    %517 = vector.extract_strided_slice %506 {offsets = [0, 192], sizes = [2, 64], strides = [1, 1]} : vector<2x256xf32> to vector<2x64xf32>
    %518 = arith.negf %517 : vector<2x64xf32>
    %519 = math.exp %518 : vector<2x64xf32>
    %cst_199 = arith.constant 1.000000e+00 : f32
    %520 = vector.broadcast %cst_199 : f32 to vector<2x64xf32>
    %521 = arith.addf %520, %519 : vector<2x64xf32>
    %522 = arith.divf %520, %521 : vector<2x64xf32>
    %523 = arith.mulf %514, %494 : vector<2x64xf32>
    %524 = arith.mulf %513, %516 : vector<2x64xf32>
    %525 = arith.addf %523, %524 : vector<2x64xf32>
    %526 = math.tanh %525 : vector<2x64xf32>
    %527 = arith.mulf %522, %526 : vector<2x64xf32>
    %528 = vector.extract_strided_slice %527 {offsets = [0, 0], sizes = [2, 32], strides = [1, 1]} : vector<2x64xf32> to vector<2x32xf32>
    %c14_200 = arith.constant 14 : index
    %c0_201 = arith.constant 0 : index
    %529 = vector.load %arg8[%c14_200, %c0_201] : memref<16x32xf32, #tpu.memory_space<vmem>>, vector<2x32xf32>
    tpu.vector_store %arg8[%c14_200, %c0_201], %528 {strides = array<i32>} : memref<16x32xf32, #tpu.memory_space<vmem>>, vector<2x32xf32>,
    %530 = vector.extract_strided_slice %527 {offsets = [0, 32], sizes = [2, 32], strides = [1, 1]} : vector<2x64xf32> to vector<2x32xf32>
    %c0_202 = arith.constant 0 : index
    %c0_203 = arith.constant 0 : index
    %531 = vector.load %arg9[%c0_202, %c0_203] : memref<16x32xf32, #tpu.memory_space<vmem>>, vector<2x32xf32>
    tpu.vector_store %arg9[%c0_202, %c0_203], %530 {strides = array<i32>} : memref<16x32xf32, #tpu.memory_space<vmem>>, vector<2x32xf32>,
    %c0_204 = arith.constant 0 : index
    %c0_205 = arith.constant 0 : index
    %532 = vector.load %arg8[%c0_204, %c0_205] : memref<16x32xf32, #tpu.memory_space<vmem>>, vector<16x32xf32>
    %c0_206 = arith.constant 0 : index
    %c0_207 = arith.constant 0 : index
    %533 = vector.load %arg9[%c0_206, %c0_207] : memref<16x32xf32, #tpu.memory_space<vmem>>, vector<16x32xf32>
    %534 = tpu.concatenate %532, %533 in 1 : vector<16x32xf32>, vector<16x32xf32> -> vector<16x64xf32>
    %c0_208 = arith.constant 0 : index
    %c0_209 = arith.constant 0 : index
    %535 = vector.load %arg4[%c0_208, %c0_209] : memref<128x128xf32, #tpu.memory_space<vmem>>, vector<1x64xf32>
    %c1 = arith.constant 1 : index
    %c0_210 = arith.constant 0 : index
    %536 = vector.load %arg4[%c1, %c0_210] : memref<128x128xf32, #tpu.memory_space<vmem>>, vector<1x64xf32>
    %cst_211 = arith.constant dense<0.000000e+00> : vector<16xf32>
    %537 = vector.multi_reduction <add>, %534, %cst_211 [1] : vector<16x64xf32> to vector<16xf32>
    %538 = vector.shape_cast %537 : vector<16xf32> to vector<16x1xf32>
    %cst_212 = arith.constant 6.400000e+01 : f32
    %539 = vector.broadcast %cst_212 : f32 to vector<16x1xf32>
    %540 = arith.divf %538, %539 : vector<16x1xf32>
    %541 = vector.broadcast %540 : vector<16x1xf32> to vector<16x64xf32>
    %542 = arith.subf %534, %541 : vector<16x64xf32>
    %543 = arith.mulf %542, %542 : vector<16x64xf32>
    %cst_213 = arith.constant dense<0.000000e+00> : vector<16xf32>
    %544 = vector.multi_reduction <add>, %543, %cst_213 [1] : vector<16x64xf32> to vector<16xf32>
    %545 = vector.shape_cast %544 : vector<16xf32> to vector<16x1xf32>
    %cst_214 = arith.constant 6.400000e+01 : f32
    %546 = vector.broadcast %cst_214 : f32 to vector<16x1xf32>
    %547 = arith.divf %545, %546 : vector<16x1xf32>
    %548 = vector.broadcast %540 : vector<16x1xf32> to vector<16x64xf32>
    %549 = arith.subf %534, %548 : vector<16x64xf32>
    %cst_215 = arith.constant 9.99999974E-6 : f32
    %550 = vector.broadcast %cst_215 : f32 to vector<16x1xf32>
    %551 = arith.addf %547, %550 : vector<16x1xf32>
    %552 = math.rsqrt %551 : vector<16x1xf32>
    %553 = vector.broadcast %552 : vector<16x1xf32> to vector<16x64xf32>
    %554 = arith.mulf %549, %553 : vector<16x64xf32>
    %555 = vector.broadcast %535 : vector<1x64xf32> to vector<16x64xf32>
    %556 = arith.mulf %554, %555 : vector<16x64xf32>
    %557 = vector.broadcast %536 : vector<1x64xf32> to vector<16x64xf32>
    %558 = arith.addf %556, %557 : vector<16x64xf32>
    %c2_216 = arith.constant 2 : index
    %c0_217 = arith.constant 0 : index
    %559 = vector.load %arg4[%c2_216, %c0_217] : memref<128x128xf32, #tpu.memory_space<vmem>>, vector<1x64xf32>
    %c3 = arith.constant 3 : index
    %c0_218 = arith.constant 0 : index
    %560 = vector.load %arg4[%c3, %c0_218] : memref<128x128xf32, #tpu.memory_space<vmem>>, vector<1x1xf32>
    %561 = vector.broadcast %559 : vector<1x64xf32> to vector<16x64xf32>
    %562 = arith.mulf %558, %561 : vector<16x64xf32>
    %cst_219 = arith.constant dense<0.000000e+00> : vector<16xf32>
    %563 = vector.multi_reduction <add>, %562, %cst_219 [1] : vector<16x64xf32> to vector<16xf32>
    %564 = vector.shape_cast %563 : vector<16xf32> to vector<16x1xf32>
    %565 = vector.broadcast %560 : vector<1x1xf32> to vector<16x1xf32>
    %566 = arith.addf %564, %565 : vector<16x1xf32>
    %567 = math.tanh %566 : vector<16x1xf32>
    %cst_220 = arith.constant 5.000000e-01 : f32
    %568 = vector.broadcast %cst_220 : f32 to vector<16x1xf32>
    %569 = arith.cmpf ogt, %2, %568 : vector<16x1xf32>
    %cst_221 = arith.constant -1.000000e+09 : f32
    %570 = vector.broadcast %cst_221 : f32 to vector<16x1xf32>
    %571 = arith.select %569, %567, %570 : vector<16x1xi1>, vector<16x1xf32>
    %572 = math.exp %571 : vector<16x1xf32>
    %c12_222 = arith.constant 12 : index
    %c0_223 = arith.constant 0 : index
    %573 = vector.load %arg4[%c12_222, %c0_223] : memref<128x128xf32, #tpu.memory_space<vmem>>, vector<2x16xf32>
    %574 = vector.broadcast %572 : vector<16x1xf32> to vector<16x64xf32>
    %575 = arith.mulf %558, %574 : vector<16x64xf32>
    %576 = tpu.concatenate %575, %572 in 1 : vector<16x64xf32>, vector<16x1xf32> -> vector<16x65xf32>
    %cst_224 = arith.constant dense<0.000000e+00> : vector<2x65xf32>
    %577 = tpu.matmul %573, %576, %cst_224 {dimension_numbers = #tpu.dot_dimension_numbers<[1], [0], [0], [1], [0, 0, 1, 1], [], []>} : vector<2x16xf32>, vector<16x65xf32>, vector<2x65xf32> -> vector<2x65xf32>
    %578 = vector.extract_strided_slice %577 {offsets = [0, 64], sizes = [2, 1], strides = [1, 1]} : vector<2x65xf32> to vector<2x1xf32>
    %579 = vector.extract_strided_slice %577 {offsets = [0, 0], sizes = [2, 64], strides = [1, 1]} : vector<2x65xf32> to vector<2x64xf32>
    %580 = tpu.reciprocal %578 {approx = true} : vector<2x1xf32> -> vector<2x1xf32>
    %581 = vector.broadcast %580 : vector<2x1xf32> to vector<2x64xf32>
    %582 = arith.mulf %579, %581 : vector<2x64xf32>
    %c16 = arith.constant 16 : index
    %c0_225 = arith.constant 0 : index
    %583 = vector.load %arg4[%c16, %c0_225] : memref<128x128xf32, #tpu.memory_space<vmem>>, vector<64x32xf32>
    %cst_226 = arith.constant dense<0.000000e+00> : vector<2x32xf32>
    %584 = tpu.matmul %582, %583, %cst_226 {dimension_numbers = #tpu.dot_dimension_numbers<[1], [0], [0], [1], [0, 0, 1, 1], [], []>} : vector<2x64xf32>, vector<64x32xf32>, vector<2x32xf32> -> vector<2x32xf32>
    %c4_227 = arith.constant 4 : index
    %c0_228 = arith.constant 0 : index
    %585 = vector.load %arg4[%c4_227, %c0_228] : memref<128x128xf32, #tpu.memory_space<vmem>>, vector<1x32xf32>
    %586 = vector.broadcast %585 : vector<1x32xf32> to vector<2x32xf32>
    %587 = arith.addf %584, %586 : vector<2x32xf32>
    %cst_229 = arith.constant 0.000000e+00 : f32
    %588 = vector.broadcast %cst_229 : f32 to vector<2x32xf32>
    %589 = arith.maximumf %587, %588 : vector<2x32xf32>
    %c5 = arith.constant 5 : index
    %c0_230 = arith.constant 0 : index
    %590 = vector.load %arg4[%c5, %c0_230] : memref<128x128xf32, #tpu.memory_space<vmem>>, vector<1x32xf32>
    %591 = vector.broadcast %590 : vector<1x32xf32> to vector<2x32xf32>
    %592 = arith.mulf %589, %591 : vector<2x32xf32>
    %c6_231 = arith.constant 6 : index
    %c0_232 = arith.constant 0 : index
    %593 = vector.load %arg4[%c6_231, %c0_232] : memref<128x128xf32, #tpu.memory_space<vmem>>, vector<1x32xf32>
    %594 = vector.broadcast %593 : vector<1x32xf32> to vector<2x32xf32>
    %595 = arith.addf %592, %594 : vector<2x32xf32>
    %c80 = arith.constant 80 : index
    %c0_233 = arith.constant 0 : index
    %596 = vector.load %arg4[%c80, %c0_233] : memref<128x128xf32, #tpu.memory_space<vmem>>, vector<32x16xf32>
    %cst_234 = arith.constant dense<0.000000e+00> : vector<2x16xf32>
    %597 = tpu.matmul %595, %596, %cst_234 {dimension_numbers = #tpu.dot_dimension_numbers<[1], [0], [0], [1], [0, 0, 1, 1], [], []>} : vector<2x32xf32>, vector<32x16xf32>, vector<2x16xf32> -> vector<2x16xf32>
    %c7 = arith.constant 7 : index
    %c0_235 = arith.constant 0 : index
    %598 = vector.load %arg4[%c7, %c0_235] : memref<128x128xf32, #tpu.memory_space<vmem>>, vector<1x16xf32>
    %599 = vector.broadcast %598 : vector<1x16xf32> to vector<2x16xf32>
    %600 = arith.addf %597, %599 : vector<2x16xf32>
    %cst_236 = arith.constant 0.000000e+00 : f32
    %601 = vector.broadcast %cst_236 : f32 to vector<2x16xf32>
    %602 = arith.maximumf %600, %601 : vector<2x16xf32>
    %c8_237 = arith.constant 8 : index
    %c0_238 = arith.constant 0 : index
    %603 = vector.load %arg4[%c8_237, %c0_238] : memref<128x128xf32, #tpu.memory_space<vmem>>, vector<1x16xf32>
    %604 = vector.broadcast %603 : vector<1x16xf32> to vector<2x16xf32>
    %605 = arith.mulf %602, %604 : vector<2x16xf32>
    %c9 = arith.constant 9 : index
    %c0_239 = arith.constant 0 : index
    %606 = vector.load %arg4[%c9, %c0_239] : memref<128x128xf32, #tpu.memory_space<vmem>>, vector<1x16xf32>
    %607 = vector.broadcast %606 : vector<1x16xf32> to vector<2x16xf32>
    %608 = arith.addf %605, %607 : vector<2x16xf32>
    %c112 = arith.constant 112 : index
    %c0_240 = arith.constant 0 : index
    %609 = vector.load %arg4[%c112, %c0_240] : memref<128x128xf32, #tpu.memory_space<vmem>>, vector<16x128xf32>
    %cst_241 = arith.constant dense<0.000000e+00> : vector<2x128xf32>
    %610 = tpu.matmul %608, %609, %cst_241 {dimension_numbers = #tpu.dot_dimension_numbers<[1], [0], [0], [1], [0, 0, 1, 1], [], []>} : vector<2x16xf32>, vector<16x128xf32>, vector<2x128xf32> -> vector<2x128xf32>
    %c10_242 = arith.constant 10 : index
    %c0_243 = arith.constant 0 : index
    %611 = vector.load %arg4[%c10_242, %c0_243] : memref<128x128xf32, #tpu.memory_space<vmem>>, vector<1x128xf32>
    %612 = vector.broadcast %611 : vector<1x128xf32> to vector<2x128xf32>
    %613 = arith.addf %610, %612 : vector<2x128xf32>
    %c0_244 = arith.constant 0 : index
    %c0_245 = arith.constant 0 : index
    %614 = vector.load %arg5[%c0_244, %c0_245] : memref<2x128xf32, #tpu.memory_space<vmem>>, vector<2x128xf32>
    tpu.vector_store %arg5[%c0_244, %c0_245], %613 {strides = array<i32>} : memref<2x128xf32, #tpu.memory_space<vmem>>, vector<2x128xf32>,
    return
  }
}

</mosaic_0001>

<bundles_post_ra>
// kernel: eq.1
= control target key start
LH: loop header
LB: loop body
LE: loop exit
PB: predicated region body
PF: predicated region fallthrough
CT: control target
= control target key end

     0   :  { %s67_s10 = smov 14   ;;  %s68_s11 = smov 10   ;;  %vm3_vm0 = vcmask 15360   ;;  %vm9_vm1 = vcmask 130160   ;;  %vm15_vm2 = vcmask 113760   ;;  %vm21_vm3 = vcmask 97360   ;;  %s111_s0 = inlined_call_operand.vmem [shape: s32[8,2], index: 0, kind: input, shape index: {}]   ;;  %s112_s1 = inlined_call_operand.vmem [shape: s32[16], index: 1, kind: output, shape index: {}]  }
   0x1   :  { %v53_v0 = vld [vmem:[%s111_s0 + $0x7] sm:$0x1]   ;;  %v55_v1 = vld [vmem:[%s111_s0 + $0x5] sm:$0x1]   ;;  %v54_v2 = vld [vmem:[%s111_s0 + $0x6] sm:$0x1]  }
   0x2   :  { %7 = vrot.lane.b32.xlu0 %v53_v0, %s67_s10  ;;  %19 = vrot.lane.b32.xlu1 %v55_v1, %s68_s11  ;;  %v56_v3 = vld [vmem:[%s111_s0 + $0x4] sm:$0x1]   ;;  %v2_v4 = vld [vmem:[%s111_s0] sm:$0x1]   ;;  %s69_s18 = smov 12   ;;  %s70_s19 = smov 8  }
   0x3   :  { %4 = vst.msk [vmem:[#allocation0] sm:$0x1] %vm3_vm0, %v2_v4   ;;  %v57_v5 = vld [vmem:[%s111_s0 + $0x3] sm:$0x1]   ;;  %v58_v6 = vld [vmem:[%s111_s0 + $0x2] sm:$0x1]  }
   0x4   :  { %s71_s24 = smov 6   ;;  %s72_s25 = smov 4   ;;  %v59_v7 = vld [vmem:[%s111_s0 + $0x1] sm:$0x1]   ;;  %vm27_vm4 = vcmask 80960   ;;  %vm33_vm5 = vcmask 64560  }
   0x5   :  { %s73_s0 = smov 2   ;;  %vm39_vm6 = vcmask 48160   ;;  %vm45_vm7 = vcmask 31760  }
   0x6   :  { %13 = vrot.lane.b32.xlu0 %v54_v2, %s69_s18  ;;  %25 = vrot.lane.b32.xlu1 %v56_v3, %s70_s19 }
   0xa   :  { %31 = vrot.lane.b32.xlu0 %v57_v5, %s71_s24  ;;  %37 = vrot.lane.b32.xlu1 %v58_v6, %s72_s25 }
   0xe   :  { %43 = vrot.lane.b32.xlu0 %v59_v7, %s73_s0 }
  0x74   :  { %v8_v8 = vpop.permute.xlu0 %7   ;;  %v20_v9 = vpop.permute.xlu1 %19  }
  0x75   :  { %10 = vst.msk [vmem:[#allocation0] sm:$0x1] %vm9_vm1, %v8_v8  }
  0x78   :  { %v14_v10 = vpop.permute.xlu0 %13   ;;  %v26_v11 = vpop.permute.xlu1 %25  }
  0x79   :  { %16 = vst.msk [vmem:[#allocation0] sm:$0x1] %vm15_vm2, %v14_v10  }
  0x7a   :  { %22 = vst.msk [vmem:[#allocation0] sm:$0x1] %vm21_vm3, %v20_v9  }
  0x7b   :  { %28 = vst.msk [vmem:[#allocation0] sm:$0x1] %vm27_vm4, %v26_v11  }
  0x7c   :  { %v32_v12 = vpop.permute.xlu0 %31   ;;  %v38_v13 = vpop.permute.xlu1 %37  }
  0x7d   :  { %34 = vst.msk [vmem:[#allocation0] sm:$0x1] %vm33_vm5, %v32_v12  }
  0x7e   :  { %40 = vst.msk [vmem:[#allocation0] sm:$0x1] %vm39_vm6, %v38_v13  }
  0x80   :  { %v44_v14 = vpop.permute.xlu0 %43  }
  0x81   :  { %46 = vst.msk [vmem:[#allocation0] sm:$0x1] %vm45_vm7, %v44_v14  }
  0x88   :  { %v50_v15 = vld [vmem:[#allocation0] sm:$0x1] }
  0x89   :  { %52 = vst [vmem:[%s112_s1] sm:$0x1] %v50_v15 }

// kernel: forward.1
= control target key start
LH: loop header
LB: loop body
LE: loop exit
PB: predicated region body
PF: predicated region fallthrough
CT: control target
= control target key end

     0   :  { %10 = vsyncpa [#allocation7], 0  ;;  %s3883_s0 = inlined_call_operand.vmem [shape: f32[16,51], index: 0, kind: input, shape index: {}]   ;;  %s3884_s1 = inlined_call_operand.vmem [shape: f32[50,32], index: 1, kind: input, shape index: {}]   ;;  %s3885_s2 = inlined_call_operand.vmem [shape: bf16[129,256], index: 2, kind: input, shape index: {}]   ;;  %s3886_s3 = inlined_call_operand.hbm [shape: bf16[193,256], index: 3, kind: input, shape index: {}]   ;;  %s3887_s4 = inlined_call_operand.hbm [shape: f32[128,128], index: 4, kind: input, shape index: {}]   ;;  %s3888_s5 = inlined_call_operand.hbm [shape: f32[2,128], index: 5, kind: output, shape index: {}]  }
   0x1   :  { %11 = vsyncpa [#allocation10], 0 }
   0x2   :  { %12 = vsyncpa [#allocation8], 0  ;;  %s3313_s18 = smov [#allocation6]   ;;  %s3241_s22 = scalar_lea.hbm %s3886_s3, 3200 }
   0x3   :  { %s24_s19 = sshll.u32 %s3313_s18, 4  ;;  %p3242_p0 = scmp.ne.s32.totalorder %s3886_s3, %s3241_s22  ;;  %s25_s19 = int_to_ptr.vmem [resolvable:$true] %s24_s19 }
   0x4   :  { %p3245_p1 = scmp.lt.u32.totalorder %s3241_s22, %s3886_s3 }
   0x6   :  { %p3247_p2 = pnand %p3245_p1, %p3242_p0 }
   0x8   :  { %3250 = shalt.err (!%p3247_p2)
}
   0x9   :  { %s3251_s27 = scalar_lea.vmem %s25_s19, 3200  ;;  %p3256_p4 = scmp.lt.s32.totalorder %s25_s19, %s25_s19 }
   0xa   :  { %p3252_p3 = scmp.ne.s32.totalorder %s25_s19, %s3251_s27  ;;  %p3257_p5 = scmp.lt.s32.totalorder %s3251_s27, %s3251_s27 }
   0xc   :  { %p3258_p6 = por %p3257_p5, %p3256_p4 }
   0xe   :  { %p3259_p7 = pnand %p3258_p6, %p3252_p3 }
  0x10   :  { %3262 = shalt.err (!%p3259_p7)
}
  0x11   :  { %s3314_s28 = smov 128   ;;  %s3315_s29 = smov 8  }
  0x12   :  { %30 = dma.hbm_to_vmem [thread:$0]  %s3886_s3, 3200, %s25_s19, [#allocation7], %s3314_s28, %s3314_s28, %s3315_s29  }
  0x13   :  { %s3316_s7 = smov [#allocation9]   ;;  %s3263_s11 = scalar_lea.hbm %s3887_s4, 2048 }
  0x14   :  { %s36_s8 = sshll.u32 %s3316_s7, 4  ;;  %p3264_p8 = scmp.ne.s32.totalorder %s3887_s4, %s3263_s11  ;;  %s37_s8 = int_to_ptr.vmem [resolvable:$true] %s36_s8 }
  0x15   :  { %p3267_p9 = scmp.lt.u32.totalorder %s3263_s11, %s3887_s4 }
  0x17   :  { %p3269_p10 = pnand %p3267_p9, %p3264_p8 }
  0x19   :  { %3272 = shalt.err (!%p3269_p10)
}
  0x1a   :  { %s3273_s16 = scalar_lea.vmem %s37_s8, 2048  ;;  %p3278_p12 = scmp.lt.s32.totalorder %s37_s8, %s37_s8 }
  0x1b   :  { %p3274_p11 = scmp.ne.s32.totalorder %s37_s8, %s3273_s16  ;;  %p3279_p13 = scmp.lt.s32.totalorder %s3273_s16, %s3273_s16 }
  0x1d   :  { %p3280_p0 = por %p3279_p13, %p3278_p12 }
  0x1f   :  { %p3281_p1 = pnand %p3280_p0, %p3274_p11 }
  0x21   :  { %3284 = shalt.err (!%p3281_p1)
}
  0x22   :  { %42 = dma.hbm_to_vmem [thread:$0]  %s3887_s4, 2048, %s37_s8, [#allocation10], %s3314_s28, %s3314_s28, %s3315_s29  }
  0x23   :  { %3307 = dma.done.wait [#allocation7], 3200  }
  0x24   :  { %3308 = vsyncadd [#allocation7], 4294964096 }
  0x25   :  { %3309 = dma.done.wait [#allocation10], 2048  }
  0x26   :  { %3310 = vsyncadd [#allocation10], 4294965248  ;;  %v52_v0 = vld [vmem:[%s3884_s1] sm:$0xff]  ;;  %v53_v1 = vld [vmem:[%s3884_s1 + $0x8] sm:$0xff]  ;;  %vm59_vm0 = vcmask 408576   ;;  %vm66_vm1 = vcmask 1041408   ;;  %v165_v36 = vlaneseq }
  0x27   :  { %v54_v2 = vld [vmem:[%s3884_s1 + $0x10] sm:$0xff]  ;;  %v2908_v3 = vpack.c.bf16 %v53_v1, %v52_v0  ;;  %v55_v4 = vld [vmem:[%s3884_s1 + $0x18] sm:$0xff]  ;;  %v56_v6 = vld [vmem:[%s3884_s1 + $0x20] sm:$0xff]  ;;  %v3317_v17 = vmov 0   ;;  %vm193_vm2 = vcmask 261120   ;;  %vm363_vm3 = vcmask 523264  }
  0x28   :  { %v2912_v5 = vpack.c.bf16 %v55_v4, %v54_v2  ;;  %v57_v7 = vld [vmem:[%s3884_s1 + $0x28] sm:$0xff]  ;;  %v50_v8 = vld [vmem:[%s3883_s0] sm:$0xff]  ;;  %v58_v12 = vld [vmem:[%s3884_s1 + $0x30] sm:$0x3]  ;;  %229 = vmatprep.mubr.bf16.mxu1 %v3317_v17  ;;  %v166_v37 = vshrl.u32 %v165_v36, 7  ;;  %s3319_s16 = smov 32  }
  0x29   :  { %2909 = vmatprep.subr.bf16.mxu0 %v2908_v3  ;;  %2861 = vmatprep.mubr.msk.f32.mxu0 %vm59_vm0, %v50_v8  ;;  %v2973_v9 = vld [vmem:[%s3885_s2 + $0x4] ss:$8 sps:$4 sm:$0xff]   ;;  %v2975_v10 = vld [vmem:[%s3885_s2] ss:$8 sps:$4 sm:$0xff]   ;;  %v2916_v11 = vpack.c.bf16 %v57_v7, %v56_v6  ;;  %v2976_v14 = vld [vmem:[%s3885_s2 + $0x14] ss:$8 sps:$4 sm:$0xff]  }
  0x2a   :  { %2911 = vmatpush3.bf16.msra.mxu0 %v2908_v3  ;;  %197 = vmatprep.subr.bf16.mxu1 %v2973_v9  ;;  %v51_v13 = vld [vmem:[%s3883_s0 + $0x8] sm:$0xff]  ;;  %v2978_v15 = vld [vmem:[%s3885_s2 + $0x10] ss:$8 sps:$4 sm:$0xff]   ;;  %v3443_v20 = vld [vmem:[%s3885_s2 + $0x54] ss:$8 sps:$4 sm:$0xff]   ;;  %v3512_v40 = vsub.s32 0, %v166_v37 }
  0x2b   :  { %2913 = vmatprep.subr.bf16.mxu0 %v2912_v5  ;;  %198 = vmatpush1.bf16.msra.mxu1 %v2975_v10  ;;  %v2981_v16 = vld [vmem:[%s3885_s2 + $0x24] ss:$8 sps:$4 sm:$0xff]   ;;  %v3436_v19 = vld [vmem:[%s3885_s2 + $0x40] ss:$8 sps:$4 sm:$0xff]   ;;  %v3448_v21 = vld [vmem:[%s3885_s2 + $0x50] ss:$8 sps:$4 sm:$0xff]  }
  0x2c   :  { %199 = vmatprep.subr.bf16.mxu1 %v2976_v14  ;;  %v3431_v18 = vld [vmem:[%s3885_s2 + $0x44] ss:$8 sps:$4 sm:$0xff]   ;;  %v3460_v23 = vld [vmem:[%s3885_s2 + $0x60] ss:$8 sps:$4 sm:$0xff]   ;;  %v3465_v24 = vld [vmem:[%s3885_s2 + $0x74] ss:$8 sps:$4 sm:$0xff]  }
  0x2d   :  { %v3455_v22 = vld [vmem:[%s3885_s2 + $0x64] ss:$8 sps:$4 sm:$0xff]   ;;  %v3472_v25 = vld [vmem:[%s3885_s2 + $0x70] ss:$8 sps:$4 sm:$0xff]   ;;  %v2979_v28 = vld [vmem:[%s3885_s2 + $0x20] ss:$8 sps:$4 sm:$0xff]  }
  0x2e   :  { %2915 = vmatpush3.bf16.msra.mxu0 %v2912_v5  ;;  %v2986_v30 = vld [vmem:[%s3885_s2 + $0x34] ss:$8 sps:$4 sm:$0xff]   ;;  %v2984_v31 = vld [vmem:[%s3885_s2 + $0x30] ss:$8 sps:$4 sm:$0xff]   ;;  %v161_v38 = vld [vmem:[%s3885_s2 + $0x80] sm:$0x11] }
  0x2f   :  { %2917 = vmatprep.subr.bf16.mxu0 %v2916_v11  ;;  %200 = vmatpush1.bf16.msra.mxu1 %v2978_v15  ;;  %v162_v39 = vunpack.c.l.bf16 %v161_v38  ;;  %v163_v41 = vunpack.c.h.bf16 %v161_v38  ;;  %s3318_s2 = smov 64   ;;  %vm436_vm4 = vcmask 254976   ;;  %vm643_vm5 = vcmask 259076   ;;  %s3321_s3 = smov 50  }
  0x30   :  { %264 = vmatprep.subr.bf16.mxu1 %v2981_v16  ;;  %vm539_vm6 = vcmask 257026   ;;  %vm747_vm7 = vcmask 261126   ;;  %s3322_s20 = smov 14   ;;  %vm3324_vm10 = vmmov 0   ;;  %vm2338_vm11 = vcmask 130048  }
  0x31   :  { %v168_v42 = vrot.slane %v162_v39, %v3512_v40  ;;  %v172_v43 = vrot.slane %v163_v41, %v3512_v40 }
  0x32   :  { %2919 = vmatpush3.bf16.msra.mxu0 %v2916_v11 }
  0x33   :  { %2859 = vmatprep.subr.msk.mxu0 %vm66_vm1, %v58_v12 }
  0x36   :  { %2860 = vmatpush3.msk.msra.mxu0 %vm66_vm1, %v58_v12 }
  0x37   :  { %2862 = vmatmul.mubr.msk.f32.vlgmr.msra.gmra.mrb[0].mxu0 %vm59_vm0, %v51_v13  ;;  %367 = vmatprep.subr.bf16.mxu0 %v3431_v18 }
  0x38   :  { %399 = vmatprep.mubr.bf16.mxu0 %v3317_v17  ;;  %368 = vmatpush1.bf16.msra.mxu0 %v3436_v19 }
  0x39   :  { %369 = vmatprep.subr.bf16.mxu0 %v3443_v20 }
  0x3c   :  { %370 = vmatpush1.bf16.msra.mxu0 %v3448_v21 }
  0x3d   :  { %371 = vmatprep.subr.bf16.mxu0 %v3455_v22 }
  0x40   :  { %372 = vmatpush1.bf16.msra.mxu0 %v3460_v23 }
  0x41   :  { %373 = vmatprep.subr.bf16.mxu0 %v3465_v24 }
  0x44   :  { %374 = vmatpush1.bf16.msra.mxu0 %v3472_v25 }
  0x45   :  { %565 = vmatprep.subr.bf16.mxu0 %v3431_v18 }
  0x47   :  { %400 = vmatmul.mubr.bf16.vlgmr.msra.gmra.mrb[4].mxu0 %v3317_v17 }
  0x48   :  { %566 = vmatpush1.bf16.msra.mxu0 %v3436_v19  ;;  %597 = vmatprep.mubr.bf16.mxu0 %v3317_v17 }
  0x49   :  { %567 = vmatprep.subr.bf16.mxu0 %v3443_v20 }
  0x4c   :  { %568 = vmatpush1.bf16.msra.mxu0 %v3448_v21 }
  0x4d   :  { %569 = vmatprep.subr.bf16.mxu0 %v3455_v22 }
  0x50   :  { %570 = vmatpush1.bf16.msra.mxu0 %v3460_v23 }
  0x51   :  { %571 = vmatprep.subr.bf16.mxu0 %v3465_v24 }
  0x54   :  { %572 = vmatpush1.bf16.msra.mxu0 %v3472_v25 }
  0x55   :  { %773 = vmatprep.subr.bf16.mxu0 %v3431_v18 }
 0x10a   :  { %v2863_v26 = vpop.f32.mrb[0].mxu0 }
 0x10b   :  { %v136_v27 = vpop.f32.mrb[1].mxu0 }
 0x10c   :  { %v164_v29 = vpack.c.bf16 %v2863_v26, %v136_v27 }
 0x10e   :  { %2717 = vmatmul.mubr.msk.bf16.vlgmr.msra.gmra.mrb[0].mxu1 %vm193_vm2, %v164_v29 }
 0x10f   :  { %265 = vmatpush1.bf16.msra.mxu1 %v2979_v28  ;;  %296 = vmatprep.mubr.bf16.mxu1 %v3317_v17 }
 0x110   :  { %266 = vmatprep.subr.bf16.mxu1 %v2986_v30 }
 0x113   :  { %267 = vmatpush1.bf16.msra.mxu1 %v2984_v31 }
 0x114   :  { %461 = vmatprep.subr.bf16.mxu1 %v3431_v18 }
 0x116   :  { %2722 = vmatmul.mubr.msk.bf16.vlgmr.msra.gmra.mrb[4].mxu1 %vm193_vm2, %v164_v29 }
 0x117   :  { %462 = vmatpush1.bf16.msra.mxu1 %v3436_v19  ;;  %493 = vmatprep.mubr.bf16.mxu1 %v3317_v17 }
 0x118   :  { %463 = vmatprep.subr.bf16.mxu1 %v3443_v20 }
 0x11a   :  { %v401_v32 = vpop.f32.mrb[4].mxu0 }
 0x11b   :  { %464 = vmatpush1.bf16.msra.mxu1 %v3448_v21  ;;  %v403_v33 = vpop.f32.mrb[5].mxu0 }
 0x11c   :  { %465 = vmatprep.subr.bf16.mxu1 %v3455_v22  ;;  %v405_v34 = vpop.f32.mrb[6].mxu0 }
 0x11d   :  { %v406_v35 = vpop.f32.mrb[7].mxu0 }
 0x11f   :  { %466 = vmatpush1.bf16.msra.mxu1 %v3460_v23 }
 0x120   :  { %467 = vmatprep.subr.bf16.mxu1 %v3465_v24 }
 0x123   :  { %468 = vmatpush1.bf16.msra.mxu1 %v3472_v25 }
 0x124   :  { %669 = vmatprep.subr.bf16.mxu1 %v3431_v18 }
 0x1e1   :  { %v231_v44 = vpop.f32.mrb[0].mxu1 }
 0x1e2   :  { %v232_v45 = vadd.f32 %v231_v44, %v168_v42  ;;  %v233_v46 = vpop.f32.mrb[1].mxu1 }
 0x1e3   :  { %v234_v47 = vadd.f32 %v233_v46, %v172_v43  ;;  %v235_v48 = vpop.f32.mrb[2].mxu1 }
 0x1e4   :  { %240 = vst [vmem:[#allocation2] sm:$0xff] %v232_v45  ;;  %v236_v49 = vadd.f32 %v235_v48, %v168_v42  ;;  %v237_v50 = vpop.f32.mrb[3].mxu1 }
 0x1e5   :  { %241 = vst [vmem:[#allocation2 + $0x8] sm:$0xff] %v234_v47  ;;  %v238_v51 = vadd.f32 %v237_v50, %v172_v43 }
 0x1e6   :  { %242 = vst [vmem:[#allocation2 + $0x10] sm:$0xff] %v236_v49 }
 0x1e7   :  { %243 = vst [vmem:[#allocation2 + $0x18] sm:$0xff] %v238_v51 }
 0x1e9   :  { %v298_v52 = vpop.f32.mrb[4].mxu1 }
 0x1ea   :  { %307 = vst [vmem:[#allocation3] sm:$0xff] %v298_v52  ;;  %v300_v53 = vpop.f32.mrb[5].mxu1 }
 0x1eb   :  { %308 = vst [vmem:[#allocation3 + $0x8] sm:$0xff] %v300_v53  ;;  %v302_v54 = vpop.f32.mrb[6].mxu1  ;;  %v311_v58 = vld [vmem:[#allocation2] sm:$0x3]  ;;  %v442_v30 = vld [vmem:[#allocation2] sm:$0xc] }
 0x1ec   :  { %309 = vst [vmem:[#allocation3 + $0x10] sm:$0xff] %v302_v54  ;;  %v304_v55 = vpop.f32.mrb[7].mxu1  ;;  %v312_v0 = vld [vmem:[#allocation2 + $0x8] sm:$0x3]  ;;  %v443_v43 = vld [vmem:[#allocation2 + $0x8] sm:$0xc] }
 0x1ed   :  { %310 = vst [vmem:[#allocation3 + $0x18] sm:$0xff] %v304_v55 }
 0x1f3   :  { %v313_v56 = vld [vmem:[#allocation3 + $0x10] sm:$0xc0]  ;;  %v444_v28 = vld [vmem:[#allocation3 + $0x10] sm:$0x30] }
 0x1f4   :  { %v317_v57 = vrot.slane %v313_v56, 6  ;;  %v314_v61 = vld [vmem:[#allocation3 + $0x18] sm:$0xc0]  ;;  %v448_v29 = vrot.slane %v444_v28, 2  ;;  %v445_v39 = vld [vmem:[#allocation3 + $0x18] sm:$0x30] }
 0x1f5   :  { %v318_v63 = vrot.slane %v314_v61, 6  ;;  %v449_v41 = vrot.slane %v445_v39, 2 }
 0x1f6   :  { %v321_v59 = vadd.f32 %v317_v57, %v311_v58 }
 0x1f7   :  { %v322_v1 = vadd.f32 %v318_v63, %v312_v0  ;;  %v453_v44 = vadd.f32 %v449_v41, %v443_v43  ;;  %v547_v0 = vld [vmem:[#allocation3 + $0x10] sm:$0xc] }
 0x1f8   :  { %v408_v60 = vadd.f32 %v401_v32, %v321_v59  ;;  %v452_v32 = vadd.f32 %v448_v29, %v442_v30 }
 0x1f9   :  { %v409_v2 = vadd.f32 %v403_v33, %v322_v1  ;;  %v551_v1 = vrot.slane %v547_v0, 6 }
 0x1fa   :  { %v2731_v62 = vmul.f32 -1.442695, %v408_v60 }
 0x1fb   :  { %v2732_v8 = vmul.f32 -1.442695, %v409_v2 }
 0x1fc   :  { %3033 = vpow2.f32 %v2731_v62 }
 0x1fd   :  { %3035 = vtanh.f32 %v409_v2  ;;  %v545_v2 = vld [vmem:[#allocation2] sm:$0x30] }
 0x206   :  { %v3034_v3 = vpop.eup %3033 }
 0x207   :  { %v413_v4 = vadd.f32 1.0, %v3034_v3  ;;  %v3036_v5 = vpop.eup %3035 }
 0x209   :  { %3037 = vrcp.f32 %v413_v4  ;;  %v555_v4 = vadd.f32 %v551_v1, %v545_v2 }
 0x20a   :  { %3039 = vpow2.f32 %v2732_v8 }
 0x213   :  { %v3038_v6 = vpop.eup %3037 }
 0x214   :  { %v424_v7 = vmul.f32 %v3038_v6, %v3036_v5  ;;  %v3040_v9 = vpop.eup %3039  ;;  %v423_v11 = vmul.f32 0.0, %v3038_v6 }
 0x215   :  { %v420_v10 = vadd.f32 1.0, %v3040_v9 }
 0x216   :  { %426 = vrot.lane.b32.xlu0 %v424_v7, %s3318_s2 }
 0x217   :  { %3041 = vrcp.f32 %v420_v10 }
 0x221   :  { %v3042_v14 = vpop.eup %3041 }
 0x288   :  { %v427_v12 = vpop.permute.xlu0 %426 }
 0x289   :  { %v429_v13 = vadd.f32 %v427_v12, %v423_v11  ;;  %v548_v11 = vld [vmem:[#allocation3 + $0x18] sm:$0xc] }
 0x28a   :  { %v552_v12 = vrot.slane %v548_v11, 6 }
 0x28b   :  { %3043 = vtanh.f32 %v429_v13  ;;  %v524_v49 = vrot.slane %v429_v13, 6 }
 0x295   :  { %v3044_v15 = vpop.eup %3043 }
 0x296   :  { %v3517_v16 = vmul.f32 %v3044_v15, %v3042_v14  ;;  %v546_v14 = vld [vmem:[#allocation2 + $0x8] sm:$0x30] }
 0x297   :  { %v556_v15 = vadd.f32 %v552_v12, %v546_v14 }
 0x298   :  { %v454_v26 = vpack.c.bf16 %v3517_v16, %v3517_v16 }
 0x29a   :  { %456 = vrot.lane.b32.xlu0 %v454_v26, %s3318_s2 }
 0x30c   :  { %v457_v27 = vpop.permute.xlu0 %456 }
 0x30d   :  { %2733 = vmatmul.mubr.msk.bf16.vlgmr.msra.gmra.mrb[8].mxu1 %vm363_vm3, %v457_v27 }
 0x30e   :  { %670 = vmatpush1.bf16.msra.mxu1 %v3436_v19  ;;  %701 = vmatprep.mubr.bf16.mxu1 %v3317_v17 }
 0x30f   :  { %671 = vmatprep.subr.bf16.mxu1 %v3443_v20 }
 0x312   :  { %672 = vmatpush1.bf16.msra.mxu1 %v3448_v21 }
 0x313   :  { %673 = vmatprep.subr.bf16.mxu1 %v3455_v22 }
 0x316   :  { %674 = vmatpush1.bf16.msra.mxu1 %v3460_v23 }
 0x317   :  { %675 = vmatprep.subr.bf16.mxu1 %v3465_v24 }
 0x31a   :  { %676 = vmatpush1.bf16.msra.mxu1 %v3472_v25 }
 0x31b   :  { %869 = vmatprep.subr.bf16.mxu1 %v3431_v18 }
 0x3e0   :  { %v495_v31 = vpop.f32.mrb[8].mxu1 }
 0x3e1   :  { %v504_v33 = vrot.slane %v495_v31, 6  ;;  %v497_v34 = vpop.f32.mrb[9].mxu1 }
 0x3e2   :  { %v499_v35 = vpop.f32.mrb[10].mxu1  ;;  %v505_v42 = vrot.slane %v497_v34, 6 }
 0x3e3   :  { %v508_v36 = vadd.f32 %v504_v33, %v452_v32  ;;  %v500_v37 = vpop.f32.mrb[11].mxu1 }
 0x3e4   :  { %v509_v45 = vadd.f32 %v505_v42, %v453_v44 }
 0x3e5   :  { %v2734_v38 = vmul.f32 -1.442695, %v508_v36 }
 0x3e6   :  { %v2735_v53 = vmul.f32 -1.442695, %v509_v45 }
 0x3e7   :  { %3045 = vpow2.f32 %v2734_v38 }
 0x3e8   :  { %3047 = vtanh.f32 %v509_v45 }
 0x3f1   :  { %v3046_v46 = vpop.eup %3045 }
 0x3f2   :  { %v513_v47 = vadd.f32 1.0, %v3046_v46  ;;  %v3048_v48 = vpop.eup %3047  ;;  %v651_v46 = vld [vmem:[#allocation3 + $0x10] sm:$0x3] }
 0x3f4   :  { %3049 = vrcp.f32 %v513_v47  ;;  %v655_v47 = vrot.slane %v651_v46, 2 }
 0x3f5   :  { %3051 = vpow2.f32 %v2735_v53 }
 0x3fe   :  { %v3050_v50 = vpop.eup %3049 }
 0x3ff   :  { %v527_v51 = vmul.f32 %v3050_v50, %v3048_v48  ;;  %v526_v52 = vmul.f32 %v3050_v50, %v524_v49  ;;  %v3052_v54 = vpop.eup %3051  ;;  %v649_v48 = vld [vmem:[#allocation2] sm:$0xc0] }
 0x400   :  { %v520_v55 = vadd.f32 1.0, %v3052_v54  ;;  %v659_v50 = vadd.f32 %v655_v47, %v649_v48 }
 0x401   :  { %529 = vrot.lane.b32.xlu1 %v527_v51, %s3318_s2 }
 0x402   :  { %3053 = vrcp.f32 %v520_v55 }
 0x40c   :  { %v3054_v58 = vpop.eup %3053 }
 0x473   :  { %v530_v56 = vpop.permute.xlu1 %529 }
 0x474   :  { %v532_v57 = vadd.f32 %v530_v56, %v526_v52 }
 0x476   :  { %3055 = vtanh.f32 %v532_v57  ;;  %v628_v30 = vrot.slane %v532_v57, 6  ;;  %v652_v57 = vld [vmem:[#allocation3 + $0x18] sm:$0x3] }
 0x480   :  { %v3056_v59 = vpop.eup %3055 }
 0x481   :  { %v3533_v60 = vmul.f32 %v3056_v59, %v3054_v58  ;;  %v656_v58 = vrot.slane %v652_v57, 2 }
 0x483   :  { %v557_v61 = vpack.c.bf16 %v3533_v60, %v3533_v60 }
 0x485   :  { %v559_v62 = vrot.slane %v557_v61, 1  ;;  %v650_v61 = vld [vmem:[#allocation2 + $0x8] sm:$0xc0] }
 0x487   :  { %560 = vrot.lane.b32.xlu1 %v559_v62, %s3318_s2  ;;  %v660_v62 = vadd.f32 %v656_v58, %v650_v61 }
 0x4f9   :  { %v561_v63 = vpop.permute.xlu1 %560 }
 0x4fa   :  { %2736 = vmatmul.mubr.msk.bf16.vlgmr.msra.gmra.mrb[8].mxu0 %vm363_vm3, %v561_v63 }
 0x4fb   :  { %774 = vmatpush1.bf16.msra.mxu0 %v3436_v19  ;;  %805 = vmatprep.mubr.bf16.mxu0 %v3317_v17 }
 0x4fc   :  { %775 = vmatprep.subr.bf16.mxu0 %v3443_v20 }
 0x4ff   :  { %776 = vmatpush1.bf16.msra.mxu0 %v3448_v21 }
 0x500   :  { %777 = vmatprep.subr.bf16.mxu0 %v3455_v22 }
 0x503   :  { %778 = vmatpush1.bf16.msra.mxu0 %v3460_v23 }
 0x504   :  { %779 = vmatprep.subr.bf16.mxu0 %v3465_v24 }
 0x507   :  { %780 = vmatpush1.bf16.msra.mxu0 %v3472_v25 }
 0x508   :  { %972 = vmatprep.subr.bf16.mxu0 %v3431_v18 }
 0x5cd   :  { %v599_v3 = vpop.f32.mrb[8].mxu0 }
 0x5ce   :  { %v608_v5 = vrot.slane %v599_v3, 4  ;;  %v601_v6 = vpop.f32.mrb[9].mxu0 }
 0x5cf   :  { %v603_v7 = vpop.f32.mrb[10].mxu0  ;;  %v609_v13 = vrot.slane %v601_v6, 4 }
 0x5d0   :  { %v612_v8 = vadd.f32 %v608_v5, %v555_v4  ;;  %v604_v9 = vpop.f32.mrb[11].mxu0 }
 0x5d1   :  { %v613_v26 = vadd.f32 %v609_v13, %v556_v15 }
 0x5d2   :  { %v2737_v10 = vmul.f32 -1.442695, %v612_v8 }
 0x5d3   :  { %v2738_v34 = vmul.f32 -1.442695, %v613_v26 }
 0x5d4   :  { %3057 = vpow2.f32 %v2737_v10 }
 0x5d5   :  { %3059 = vtanh.f32 %v613_v26 }
 0x5de   :  { %v3058_v27 = vpop.eup %3057 }
 0x5df   :  { %v617_v28 = vadd.f32 1.0, %v3058_v27  ;;  %v3060_v29 = vpop.eup %3059  ;;  %v755_v27 = vld [vmem:[#allocation3] sm:$0xc0] }
 0x5e1   :  { %3061 = vrcp.f32 %v617_v28  ;;  %v759_v28 = vrot.slane %v755_v27, 6 }
 0x5e2   :  { %3063 = vpow2.f32 %v2738_v34 }
 0x5eb   :  { %v3062_v31 = vpop.eup %3061 }
 0x5ec   :  { %v631_v32 = vmul.f32 %v3062_v31, %v3060_v29  ;;  %v630_v33 = vmul.f32 %v3062_v31, %v628_v30  ;;  %v3064_v35 = vpop.eup %3063  ;;  %v753_v29 = vld [vmem:[#allocation2 + $0x10] sm:$0x3] }
 0x5ed   :  { %v624_v36 = vadd.f32 1.0, %v3064_v35  ;;  %v763_v30 = vadd.f32 %v759_v28, %v753_v29 }
 0x5ee   :  { %633 = vrot.lane.b32.xlu0 %v631_v32, %s3318_s2 }
 0x5ef   :  { %3065 = vrcp.f32 %v624_v36 }
 0x5f9   :  { %v3066_v39 = vpop.eup %3065 }
 0x660   :  { %v634_v37 = vpop.permute.xlu0 %633 }
 0x661   :  { %v636_v38 = vadd.f32 %v634_v37, %v630_v33  ;;  %v756_v37 = vld [vmem:[#allocation3 + $0x8] sm:$0xc0] }
 0x663   :  { %3067 = vtanh.f32 %v636_v38  ;;  %v732_v2 = vrot.slane %v636_v38, 6  ;;  %v760_v38 = vrot.slane %v756_v37, 6 }
 0x66d   :  { %v3068_v41 = vpop.eup %3067 }
 0x66e   :  { %v3549_v42 = vmul.f32 %v3068_v41, %v3066_v39  ;;  %v754_v39 = vld [vmem:[#allocation2 + $0x18] sm:$0x3] }
 0x66f   :  { %v764_v41 = vadd.f32 %v760_v38, %v754_v39  ;;  %v952_v38 = vld [vmem:[#allocation2 + $0x10] sm:$0x30] }
 0x670   :  { %v661_v43 = vpack.c.bf16 %v3549_v42, %v3549_v42 }
 0x672   :  { %v663_v44 = vrot.slane %v661_v43, 2 }
 0x674   :  { %664 = vrot.lane.b32.xlu1 %v663_v44, %s3318_s2 }
 0x6e6   :  { %v665_v45 = vpop.permute.xlu1 %664 }
 0x6e7   :  { %2739 = vmatmul.mubr.msk.bf16.vlgmr.msra.gmra.mrb[12].mxu1 %vm363_vm3, %v665_v45 }
 0x6e8   :  { %870 = vmatpush1.bf16.msra.mxu1 %v3436_v19  ;;  %901 = vmatprep.mubr.bf16.mxu1 %v3317_v17 }
 0x6e9   :  { %871 = vmatprep.subr.bf16.mxu1 %v3443_v20 }
 0x6ec   :  { %872 = vmatpush1.bf16.msra.mxu1 %v3448_v21 }
 0x6ed   :  { %873 = vmatprep.subr.bf16.mxu1 %v3455_v22 }
 0x6f0   :  { %874 = vmatpush1.bf16.msra.mxu1 %v3460_v23 }
 0x6f1   :  { %875 = vmatprep.subr.bf16.mxu1 %v3465_v24 }
 0x6f4   :  { %876 = vmatpush1.bf16.msra.mxu1 %v3472_v25 }
 0x6f5   :  { %1075 = vmatprep.subr.bf16.mxu1 %v3431_v18 }
 0x7ba   :  { %v703_v49 = vpop.f32.mrb[12].mxu1 }
 0x7bb   :  { %v712_v51 = vrot.slane %v703_v49, 2  ;;  %v705_v52 = vpop.f32.mrb[13].mxu1 }
 0x7bc   :  { %v707_v53 = vpop.f32.mrb[14].mxu1  ;;  %v713_v59 = vrot.slane %v705_v52, 2 }
 0x7bd   :  { %v716_v54 = vadd.f32 %v712_v51, %v659_v50  ;;  %v708_v55 = vpop.f32.mrb[15].mxu1 }
 0x7be   :  { %v717_v63 = vadd.f32 %v713_v59, %v660_v62  ;;  %v852_v62 = vld [vmem:[#allocation3] sm:$0x30] }
 0x7bf   :  { %v2740_v56 = vmul.f32 -1.442695, %v716_v54 }
 0x7c0   :  { %v2741_v6 = vmul.f32 -1.442695, %v717_v63 }
 0x7c1   :  { %3069 = vpow2.f32 %v2740_v56 }
 0x7c2   :  { %3071 = vtanh.f32 %v717_v63  ;;  %v856_v63 = vrot.slane %v852_v62, 2 }
 0x7cb   :  { %v3070_v0 = vpop.eup %3069 }
 0x7cc   :  { %v721_v18 = vadd.f32 1.0, %v3070_v0  ;;  %v3072_v1 = vpop.eup %3071  ;;  %v850_v0 = vld [vmem:[#allocation2 + $0x10] sm:$0xc] }
 0x7ce   :  { %3073 = vrcp.f32 %v721_v18 }
 0x7cf   :  { %3075 = vpow2.f32 %v2741_v6 }
 0x7d8   :  { %v3074_v3 = vpop.eup %3073 }
 0x7d9   :  { %v735_v4 = vmul.f32 %v3074_v3, %v3072_v1  ;;  %v734_v5 = vmul.f32 %v3074_v3, %v732_v2  ;;  %v3076_v7 = vpop.eup %3075  ;;  %v860_v1 = vadd.f32 %v856_v63, %v850_v0 }
 0x7da   :  { %v728_v8 = vadd.f32 1.0, %v3076_v7 }
 0x7db   :  { %737 = vrot.lane.b32.xlu0 %v735_v4, %s3318_s2 }
 0x7dc   :  { %3077 = vrcp.f32 %v728_v8 }
 0x7e6   :  { %v3078_v11 = vpop.eup %3077 }
 0x84d   :  { %v738_v9 = vpop.permute.xlu0 %737 }
 0x84e   :  { %v740_v10 = vadd.f32 %v738_v9, %v734_v5 }
 0x850   :  { %3079 = vtanh.f32 %v740_v10  ;;  %v830_v47 = vrot.slane %v740_v10, 6 }
 0x85a   :  { %v3080_v12 = vpop.eup %3079 }
 0x85b   :  { %v3565_v13 = vmul.f32 %v3080_v12, %v3078_v11 }
 0x85d   :  { %v765_v14 = vpack.c.bf16 %v3565_v13, %v3565_v13 }
 0x85f   :  { %v767_v15 = vrot.slane %v765_v14, 3 }
 0x861   :  { %768 = vrot.lane.b32.xlu1 %v767_v15, %s3318_s2 }
 0x8d3   :  { %v769_v26 = vpop.permute.xlu1 %768 }
 0x8d4   :  { %2742 = vmatmul.mubr.msk.bf16.vlgmr.msra.gmra.mrb[12].mxu0 %vm363_vm3, %v769_v26 }
 0x8d5   :  { %973 = vmatpush1.bf16.msra.mxu0 %v3436_v19  ;;  %1004 = vmatprep.mubr.bf16.mxu0 %v3317_v17 }
 0x8d6   :  { %974 = vmatprep.subr.bf16.mxu0 %v3443_v20 }
 0x8d9   :  { %975 = vmatpush1.bf16.msra.mxu0 %v3448_v21 }
 0x8da   :  { %976 = vmatprep.subr.bf16.mxu0 %v3455_v22 }
 0x8dd   :  { %977 = vmatpush1.bf16.msra.mxu0 %v3460_v23 }
 0x8de   :  { %978 = vmatprep.subr.bf16.mxu0 %v3465_v24 }
 0x8e1   :  { %979 = vmatpush1.bf16.msra.mxu0 %v3472_v25 }
 0x9a7   :  { %v807_v31 = vpop.f32.mrb[12].mxu0 }
 0x9a8   :  { %v814_v32 = vadd.f32 %v807_v31, %v763_v30  ;;  %v809_v33 = vpop.f32.mrb[13].mxu0 }
 0x9a9   :  { %v811_v34 = vpop.f32.mrb[14].mxu0  ;;  %v815_v43 = vadd.f32 %v809_v33, %v764_v41 }
 0x9aa   :  { %v2743_v35 = vmul.f32 -1.442695, %v814_v32  ;;  %v812_v36 = vpop.f32.mrb[15].mxu0 }
 0x9ab   :  { %v2744_v51 = vmul.f32 -1.442695, %v815_v43  ;;  %v954_v36 = vld [vmem:[#allocation3] sm:$0xc] }
 0x9ac   :  { %3081 = vpow2.f32 %v2743_v35  ;;  %v958_v37 = vrot.slane %v954_v36, 6 }
 0x9ad   :  { %3083 = vtanh.f32 %v815_v43 }
 0x9ae   :  { %v962_v41 = vadd.f32 %v958_v37, %v952_v38 }
 0x9b6   :  { %v3082_v44 = vpop.eup %3081 }
 0x9b7   :  { %v819_v45 = vadd.f32 1.0, %v3082_v44  ;;  %v3084_v46 = vpop.eup %3083 }
 0x9b9   :  { %3085 = vrcp.f32 %v819_v45 }
 0x9ba   :  { %3087 = vpow2.f32 %v2744_v51 }
 0x9c3   :  { %v3086_v48 = vpop.eup %3085 }
 0x9c4   :  { %v833_v49 = vmul.f32 %v3086_v48, %v3084_v46  ;;  %v832_v50 = vmul.f32 %v3086_v48, %v830_v47  ;;  %v3088_v52 = vpop.eup %3087 }
 0x9c5   :  { %v826_v53 = vadd.f32 1.0, %v3088_v52  ;;  %v953_v52 = vld [vmem:[#allocation2 + $0x18] sm:$0x30] }
 0x9c6   :  { %835 = vrot.lane.b32.xlu0 %v833_v49, %s3318_s2  ;;  %v955_v49 = vld [vmem:[#allocation3 + $0x8] sm:$0xc] }
 0x9c7   :  { %3089 = vrcp.f32 %v826_v53 }
 0x9d1   :  { %v3090_v56 = vpop.eup %3089 }
 0xa38   :  { %v836_v54 = vpop.permute.xlu0 %835 }
 0xa39   :  { %v838_v55 = vadd.f32 %v836_v54, %v832_v50  ;;  %v959_v50 = vrot.slane %v955_v49, 6 }
 0xa3b   :  { %3091 = vtanh.f32 %v838_v55  ;;  %v932_v10 = vrot.slane %v838_v55, 6  ;;  %v963_v53 = vadd.f32 %v959_v50, %v953_v52 }
 0xa45   :  { %v3092_v57 = vpop.eup %3091 }
 0xa46   :  { %v3580_v58 = vmul.f32 %v3092_v57, %v3090_v56 }
 0xa48   :  { %v862_v59 = vpack.c.bf16 %v3580_v58, %v3580_v58 }
 0xa4a   :  { %864 = vrot.lane.b32.xlu1 %v862_v59, %s3318_s2 }
 0xabc   :  { %v865_v61 = vpop.permute.xlu1 %864 }
 0xabd   :  { %2745 = vmatmul.mubr.msk.bf16.vlgmr.msra.gmra.mrb[16].mxu1 %vm363_vm3, %v865_v61 }
 0xabe   :  { %1076 = vmatpush1.bf16.msra.mxu1 %v3436_v19  ;;  %1107 = vmatprep.mubr.bf16.mxu1 %v3317_v17 }
 0xabf   :  { %1077 = vmatprep.subr.bf16.mxu1 %v3443_v20 }
 0xac2   :  { %1078 = vmatpush1.bf16.msra.mxu1 %v3448_v21  ;;  %v853_v21 = vld [vmem:[#allocation3 + $0x8] sm:$0x30] }
 0xac3   :  { %1079 = vmatprep.subr.bf16.mxu1 %v3455_v22  ;;  %v857_v22 = vrot.slane %v853_v21, 2 }
 0xac6   :  { %1080 = vmatpush1.bf16.msra.mxu1 %v3460_v23  ;;  %v851_v23 = vld [vmem:[#allocation2 + $0x18] sm:$0xc] }
 0xac7   :  { %1081 = vmatprep.subr.bf16.mxu1 %v3465_v24  ;;  %v861_v7 = vadd.f32 %v857_v22, %v851_v23 }
 0xaca   :  { %1082 = vmatpush1.bf16.msra.mxu1 %v3472_v25 }
 0xb90   :  { %v903_v18 = vpop.f32.mrb[16].mxu1 }
 0xb91   :  { %v912_v19 = vrot.slane %v903_v18, 6  ;;  %v905_v2 = vpop.f32.mrb[17].mxu1 }
 0xb92   :  { %v907_v3 = vpop.f32.mrb[18].mxu1  ;;  %v913_v6 = vrot.slane %v905_v2, 6 }
 0xb93   :  { %v916_v4 = vadd.f32 %v912_v19, %v860_v1  ;;  %v908_v20 = vpop.f32.mrb[19].mxu1 }
 0xb94   :  { %v917_v24 = vadd.f32 %v913_v6, %v861_v7 }
 0xb95   :  { %v2746_v5 = vmul.f32 -1.442695, %v916_v4 }
 0xb96   :  { %v2747_v15 = vmul.f32 -1.442695, %v917_v24 }
 0xb97   :  { %3093 = vpow2.f32 %v2746_v5 }
 0xb98   :  { %3095 = vtanh.f32 %v917_v24 }
 0xba1   :  { %v3094_v8 = vpop.eup %3093 }
 0xba2   :  { %v921_v25 = vadd.f32 1.0, %v3094_v8  ;;  %v3096_v9 = vpop.eup %3095 }
 0xba4   :  { %3097 = vrcp.f32 %v921_v25  ;;  %v1057_v25 = vld [vmem:[#allocation3] sm:$0x3] }
 0xba5   :  { %3099 = vpow2.f32 %v2747_v15 }
 0xbae   :  { %v3098_v11 = vpop.eup %3097 }
 0xbaf   :  { %v935_v12 = vmul.f32 %v3098_v11, %v3096_v9  ;;  %v934_v14 = vmul.f32 %v3098_v11, %v932_v10  ;;  %v3100_v26 = vpop.eup %3099  ;;  %v1061_v9 = vrot.slane %v1057_v25, 2  ;;  %v1055_v10 = vld [vmem:[#allocation2 + $0x10] sm:$0xc0] }
 0xbb0   :  { %v928_v27 = vadd.f32 1.0, %v3100_v26 }
 0xbb1   :  { %937 = vrot.lane.b32.xlu0 %v935_v12, %s3318_s2  ;;  %v1065_v12 = vadd.f32 %v1061_v9, %v1055_v10 }
 0xbb2   :  { %3101 = vrcp.f32 %v928_v27 }
 0xbbc   :  { %v3102_v30 = vpop.eup %3101 }
 0xc23   :  { %v938_v28 = vpop.permute.xlu0 %937 }
 0xc24   :  { %v940_v29 = vadd.f32 %v938_v28, %v934_v14 }
 0xc26   :  { %3103 = vtanh.f32 %v940_v29  ;;  %v1035_v59 = vrot.slane %v940_v29, 6 }
 0xc30   :  { %v3104_v31 = vpop.eup %3103 }
 0xc31   :  { %v3595_v32 = vmul.f32 %v3104_v31, %v3102_v30  ;;  %v1058_v30 = vld [vmem:[#allocation3 + $0x8] sm:$0x3] }
 0xc32   :  { %v1062_v31 = vrot.slane %v1058_v30, 2  ;;  %v3682_v30 = vld [vmem:[#allocation6 + $0xb4] ss:$8 sps:$4 sm:$0xff]  }
 0xc33   :  { %v964_v33 = vpack.c.bf16 %v3595_v32, %v3595_v32 }
 0xc35   :  { %v966_v34 = vrot.slane %v964_v33, 1 }
 0xc37   :  { %967 = vrot.lane.b32.xlu1 %v966_v34, %s3318_s2  ;;  %v1056_v34 = vld [vmem:[#allocation2 + $0x18] sm:$0xc0] }
 0xca9   :  { %v968_v35 = vpop.permute.xlu1 %967 }
 0xcaa   :  { %2748 = vmatmul.mubr.msk.bf16.vlgmr.msra.gmra.mrb[16].mxu0 %vm363_vm3, %v968_v35  ;;  %v1066_v35 = vadd.f32 %v1062_v31, %v1056_v34  ;;  %v3687_v31 = vld [vmem:[#allocation6 + $0xb0] ss:$8 sps:$4 sm:$0xff]  }
 0xcab   :  { %1283 = vmatprep.mubr.bf16.mxu0 %v3317_v17 }
 0xd7d   :  { %v1006_v39 = vpop.f32.mrb[16].mxu0 }
 0xd7e   :  { %v1015_v43 = vrot.slane %v1006_v39, 4  ;;  %v1008_v44 = vpop.f32.mrb[17].mxu0 }
 0xd7f   :  { %v1010_v45 = vpop.f32.mrb[18].mxu0  ;;  %v1016_v51 = vrot.slane %v1008_v44, 4 }
 0xd80   :  { %v1019_v46 = vadd.f32 %v1015_v43, %v962_v41  ;;  %v1011_v47 = vpop.f32.mrb[19].mxu0 }
 0xd81   :  { %v1020_v54 = vadd.f32 %v1016_v51, %v963_v53 }
 0xd82   :  { %v2749_v48 = vmul.f32 -1.442695, %v1019_v46 }
 0xd83   :  { %v2750_v0 = vmul.f32 -1.442695, %v1020_v54 }
 0xd84   :  { %3105 = vpow2.f32 %v2749_v48 }
 0xd85   :  { %3107 = vtanh.f32 %v1020_v54 }
 0xd8e   :  { %v3106_v55 = vpop.eup %3105 }
 0xd8f   :  { %v1024_v56 = vadd.f32 1.0, %v3106_v55  ;;  %v3108_v57 = vpop.eup %3107 }
 0xd91   :  { %3109 = vrcp.f32 %v1024_v56 }
 0xd92   :  { %3111 = vpow2.f32 %v2750_v0  ;;  %v3008_v0 = vld [vmem:[#allocation6 + $0x54] ss:$8 sps:$4 sm:$0xff]  }
 0xd9b   :  { %v3110_v61 = vpop.eup %3109 }
 0xd9c   :  { %v1038_v62 = vmul.f32 %v3110_v61, %v3108_v57  ;;  %v1037_v63 = vmul.f32 %v3110_v61, %v1035_v59  ;;  %v3112_v18 = vpop.eup %3111  ;;  %v2997_v57 = vld [vmem:[#allocation6] ss:$8 sps:$4 sm:$0xff]   ;;  %v2999_v59 = vld [vmem:[#allocation6 + $0x4] ss:$8 sps:$4 sm:$0xff]  }
 0xd9d   :  { %v1031_v1 = vadd.f32 1.0, %v3112_v18  ;;  %v3000_v61 = vld [vmem:[#allocation6 + $0x40] ss:$8 sps:$4 sm:$0xff]   ;;  %1251 = vmatprep.subr.bf16.mxu0 %v2999_v59  ;;  %v3003_v18 = vld [vmem:[#allocation6 + $0x10] ss:$8 sps:$4 sm:$0xff]  }
 0xd9e   :  { %1040 = vrot.lane.b32.xlu0 %v1038_v62, %s3318_s2  ;;  %v3002_v62 = vld [vmem:[#allocation6 + $0x44] ss:$8 sps:$4 sm:$0xff]   ;;  %1252 = vmatpush1.bf16.msra.mxu0 %v2997_v57 }
 0xd9f   :  { %3113 = vrcp.f32 %v1031_v1  ;;  %1338 = vmatprep.subr.bf16.mxu1 %v3002_v62  ;;  %v3006_v1 = vld [vmem:[#allocation6 + $0x50] ss:$8 sps:$4 sm:$0xff]  }
 0xda9   :  { %v3114_v3 = vpop.eup %3113 }
 0xe10   :  { %v1041_v19 = vpop.permute.xlu0 %1040 }
 0xe11   :  { %v3603_v2 = vadd.f32 %v1041_v19, %v1037_v63  ;;  %v3005_v63 = vld [vmem:[#allocation6 + $0x14] ss:$8 sps:$4 sm:$0xff]   ;;  %v3011_v19 = vld [vmem:[#allocation6 + $0x24] ss:$8 sps:$4 sm:$0xff]  }
 0xe12   :  { %1253 = vmatprep.subr.bf16.mxu0 %v3005_v63 }
 0xe13   :  { %3115 = vtanh.f32 %v3603_v2  ;;  %v1138_v41 = vrot.slane %v3603_v2, 6  ;;  %v3014_v2 = vld [vmem:[#allocation6 + $0x64] ss:$8 sps:$4 sm:$0xff]   ;;  %1254 = vmatpush1.bf16.msra.mxu0 %v3003_v18 }
 0xe14   :  { %1255 = vmatprep.subr.bf16.mxu0 %v3011_v19 }
 0xe1d   :  { %v3116_v4 = vpop.eup %3115 }
 0xe1e   :  { %v1045_v20 = vmul.f32 %v3116_v4, %v3114_v3  ;;  %v3009_v3 = vld [vmem:[#allocation6 + $0x20] ss:$8 sps:$4 sm:$0xff]  }
 0xe1f   :  { %1256 = vmatpush1.bf16.msra.mxu0 %v3009_v3 }
 0xe20   :  { %v1067_v5 = vpack.c.bf16 %v1045_v20, %v1045_v20 }
 0xe22   :  { %v1069_v21 = vrot.slane %v1067_v5, 2  ;;  %v3018_v5 = vld [vmem:[#allocation6 + $0x70] ss:$8 sps:$4 sm:$0xff]  }
 0xe24   :  { %1070 = vrot.lane.b32.xlu1 %v1069_v21, %s3318_s2  ;;  %v3020_v21 = vld [vmem:[#allocation6 + $0x74] ss:$8 sps:$4 sm:$0xff]  }
 0xe28   :  { %438 = vrot.lane.b32.xlu1 %v3517_v16, %s3319_s16 }
 0xe2c   :  { %645 = vrot.lane.b32.xlu1 %v3549_v42, %s3319_s16 }
 0xe30   :  { %846 = vrot.lane.b32.xlu1 %v3580_v58, %s3319_s16 }
 0xe34   :  { %1051 = vrot.lane.b32.xlu1 %v1045_v20, %s3319_s16 }
 0xe38   :  { %433 = vrot.lane.b32.xlu1 %v3517_v16, %s3318_s2 }
 0xe3c   :  { %640 = vrot.lane.b32.xlu1 %v3549_v42, %s3318_s2 }
 0xe40   :  { %842 = vrot.lane.b32.xlu1 %v3580_v58, %s3318_s2 }
 0xe44   :  { %1047 = vrot.lane.b32.xlu1 %v1045_v20, %s3318_s2  ;;  %v3015_v20 = vld [vmem:[#allocation6 + $0x30] ss:$8 sps:$4 sm:$0xff]  }
 0xe96   :  { %v1071_v22 = vpop.permute.xlu1 %1070 }
 0xe97   :  { %2751 = vmatmul.mubr.msk.bf16.vlgmr.msra.gmra.mrb[20].mxu1 %vm363_vm3, %v1071_v22  ;;  %v3651_v22 = vld [vmem:[#allocation6 + $0x84] ss:$8 sps:$4 sm:$0xff]  }
 0xe98   :  { %1370 = vmatprep.mubr.bf16.mxu1 %v3317_v17  ;;  %1339 = vmatpush1.bf16.msra.mxu1 %v3000_v61 }
 0xe99   :  { %1340 = vmatprep.subr.bf16.mxu1 %v3008_v0 }
 0xe9a   :  { %v439_v6 = vpop.permute.xlu1 %438 }
 0xe9b   :  { %441 = vst.msk [vmem:[#allocation5 + $0xe] sm:$0x3] %vm436_vm4, %v439_v6 }
 0xe9c   :  { %1341 = vmatpush1.bf16.msra.mxu1 %v3006_v1 }
 0xe9d   :  { %1342 = vmatprep.subr.bf16.mxu1 %v3014_v2 }
 0xe9e   :  { %v646_v23 = vpop.permute.xlu1 %645 }
 0xe9f   :  { %648 = vst.msk [vmem:[#allocation5 + $0x6] sm:$0x30] %vm643_vm5, %v646_v23 }
 0xea2   :  { %v847_v16 = vpop.permute.xlu1 %846 }
 0xea3   :  { %849 = vst.msk [vmem:[#allocation5 + $0x6] sm:$0x3] %vm436_vm4, %v847_v16 }
 0xea6   :  { %v1052_v42 = vpop.permute.xlu1 %1051 }
 0xea7   :  { %1054 = vst.msk [vmem:[#allocation5 - $0x2] sm:$0x30] %vm643_vm5, %v1052_v42 }
 0xeaa   :  { %v434_v58 = vpop.permute.xlu1 %433 }
 0xeab   :  { %437 = vst.msk [vmem:[#allocation4] sm:$0x3] %vm436_vm4, %v434_v58 }
 0xeae   :  { %v641_v7 = vpop.permute.xlu1 %640 }
 0xeaf   :  { %644 = vst.msk [vmem:[#allocation4] sm:$0x30] %vm643_vm5, %v641_v7 }
 0xeb2   :  { %v843_v24 = vpop.permute.xlu1 %842 }
 0xeb3   :  { %845 = vst.msk [vmem:[#allocation4 + $0x8] sm:$0x3] %vm436_vm4, %v843_v24 }
 0xeb6   :  { %v1048_v8 = vpop.permute.xlu1 %1047 }
 0xeb7   :  { %1050 = vst.msk [vmem:[#allocation4 + $0x8] sm:$0x30] %vm643_vm5, %v1048_v8 }
 0xf6a   :  { %v1109_v11 = vpop.f32.mrb[20].mxu1 }
 0xf6b   :  { %v1118_v14 = vrot.slane %v1109_v11, 2  ;;  %v1111_v15 = vpop.f32.mrb[21].mxu1 }
 0xf6c   :  { %v1113_v26 = vpop.f32.mrb[22].mxu1  ;;  %v1119_v33 = vrot.slane %v1111_v15, 2 }
 0xf6d   :  { %v1122_v27 = vadd.f32 %v1118_v14, %v1065_v12  ;;  %v1114_v28 = vpop.f32.mrb[23].mxu1  ;;  %v3662_v14 = vld [vmem:[#allocation6 + $0x80] ss:$8 sps:$4 sm:$0xff]   ;;  %v3664_v26 = vld [vmem:[#allocation6 + $0x94] ss:$8 sps:$4 sm:$0xff]  }
 0xf6e   :  { %v1123_v36 = vadd.f32 %v1119_v33, %v1066_v35  ;;  %v3673_v28 = vld [vmem:[#allocation6 + $0xa4] ss:$8 sps:$4 sm:$0xff]  }
 0xf6f   :  { %v2752_v29 = vmul.f32 -1.442695, %v1122_v27  ;;  %v3669_v27 = vld [vmem:[#allocation6 + $0x90] ss:$8 sps:$4 sm:$0xff]   ;;  %v1196_v33 = vld [vmem:[#allocation6 + $0xc0] sm:$0x11] }
 0xf70   :  { %v2753_v46 = vmul.f32 -1.442695, %v1123_v36  ;;  %v1197_v34 = vunpack.c.l.bf16 %v1196_v33  ;;  %v1198_v35 = vunpack.c.h.bf16 %v1196_v33 }
 0xf71   :  { %3117 = vpow2.f32 %v2752_v29  ;;  %v3679_v29 = vld [vmem:[#allocation6 + $0xa0] ss:$8 sps:$4 sm:$0xff]  }
 0xf72   :  { %3119 = vtanh.f32 %v1123_v36  ;;  %v1203_v36 = vrot.slane %v1197_v34, %v3512_v40 }
 0xf7b   :  { %v3118_v37 = vpop.eup %3117 }
 0xf7c   :  { %v1127_v38 = vadd.f32 1.0, %v3118_v37  ;;  %v3120_v39 = vpop.eup %3119  ;;  %v1207_v37 = vrot.slane %v1198_v35, %v3512_v40 }
 0xf7e   :  { %3121 = vrcp.f32 %v1127_v38 }
 0xf7f   :  { %3123 = vpow2.f32 %v2753_v46 }
 0xf88   :  { %v3122_v43 = vpop.eup %3121 }
 0xf89   :  { %v1141_v44 = vmul.f32 %v3122_v43, %v3120_v39  ;;  %v1140_v45 = vmul.f32 %v3122_v43, %v1138_v41  ;;  %v3124_v47 = vpop.eup %3123 }
 0xf8a   :  { %v1134_v48 = vadd.f32 1.0, %v3124_v47 }
 0xf8b   :  { %1143 = vrot.lane.b32.xlu0 %v1141_v44, %s3318_s2 }
 0xf8c   :  { %3125 = vrcp.f32 %v1134_v48 }
 0xf8f   :  { %541 = vrot.lane.b32.xlu0 %v3533_v60, %s3319_s16 }
 0xf93   :  { %749 = vrot.lane.b32.xlu0 %v3565_v13, %s3319_s16 }
 0xf96   :  { %v3126_v53 = vpop.eup %3125 }
 0xf97   :  { %948 = vrot.lane.b32.xlu0 %v3595_v32, %s3319_s16 }
 0xffd   :  { %v1144_v49 = vpop.permute.xlu0 %1143 }
 0xffe   :  { %v1146_v50 = vadd.f32 %v1144_v49, %v1140_v45 }
0x1000   :  { %3127 = vtanh.f32 %v1146_v50 }
0x1001   :  { %v542_v51 = vpop.permute.xlu0 %541 }
0x1002   :  { %544 = vst.msk [vmem:[#allocation5 + $0xa] sm:$0xc] %vm539_vm6, %v542_v51 }
0x1005   :  { %v750_v52 = vpop.permute.xlu0 %749 }
0x1006   :  { %752 = vst.msk [vmem:[#allocation5 + $0x2] sm:$0xc0] %vm747_vm7, %v750_v52 }
0x1009   :  { %v949_v54 = vpop.permute.xlu0 %948 }
0x100a   :  { %v3128_v55 = vpop.eup %3127  ;;  %951 = vst.msk [vmem:[#allocation5 + $0x2] sm:$0xc] %vm539_vm6, %v949_v54 }
0x100b   :  { %v1148_v56 = vmul.f32 %v3128_v55, %v3126_v53 }
0x100d   :  { %1154 = vrot.lane.b32.xlu0 %v1148_v56, %s3319_s16  ;;  %v1161_v16 = vld [vmem:[#allocation5 + $0x8] sm:$0xff] }
0x1011   :  { %536 = vrot.lane.b32.xlu0 %v3533_v60, %s3318_s2  ;;  %v3012_v60 = vld [vmem:[#allocation6 + $0x60] ss:$8 sps:$4 sm:$0xff]  }
0x1012   :  { %1343 = vmatpush1.bf16.msra.mxu1 %v3012_v60 }
0x1013   :  { %1344 = vmatprep.subr.bf16.mxu1 %v3020_v21 }
0x1015   :  { %744 = vrot.lane.b32.xlu0 %v3565_v13, %s3318_s2  ;;  %v3017_v13 = vld [vmem:[#allocation6 + $0x34] ss:$8 sps:$4 sm:$0xff]  }
0x1016   :  { %1257 = vmatprep.subr.bf16.mxu0 %v3017_v13  ;;  %1345 = vmatpush1.bf16.msra.mxu1 %v3018_v5 }
0x1017   :  { %1258 = vmatpush1.bf16.msra.mxu0 %v3015_v20  ;;  %1530 = vmatprep.subr.bf16.mxu1 %v3651_v22 }
0x1018   :  { %1437 = vmatprep.subr.bf16.mxu0 %v3651_v22 }
0x1019   :  { %944 = vrot.lane.b32.xlu0 %v3595_v32, %s3318_s2 }
0x101d   :  { %1150 = vrot.lane.b32.xlu0 %v1148_v56, %s3318_s2 }
0x107f   :  { %v1155_v4 = vpop.permute.xlu0 %1154 }
0x1080   :  { %1157 = vst.msk [vmem:[#allocation5 - $0x6] sm:$0xc0] %vm747_vm7, %v1155_v4 }
0x1083   :  { %v537_v6 = vpop.permute.xlu0 %536 }
0x1084   :  { %540 = vst.msk [vmem:[#allocation4] sm:$0xc] %vm539_vm6, %v537_v6 }
0x1087   :  { %v745_v32 = vpop.permute.xlu0 %744  ;;  %v1160_v23 = vld [vmem:[#allocation5] sm:$0xff] }
0x1088   :  { %748 = vst.msk [vmem:[#allocation4] sm:$0xc0] %vm747_vm7, %v745_v32  ;;  %v2959_v42 = vpack.i.bf16 %v1161_v16, %v1160_v23 }
0x108a   :  { %2960 = vrot.lane.b32.xlu1 %v2959_v42, %s3319_s16 }
0x108b   :  { %v945_v58 = vpop.permute.xlu0 %944 }
0x108c   :  { %947 = vst.msk [vmem:[#allocation4 + $0x8] sm:$0xc] %vm539_vm6, %v945_v58 }
0x108f   :  { %v1151_v7 = vpop.permute.xlu0 %1150  ;;  %v1158_v9 = vld [vmem:[#allocation4] sm:$0xff] }
0x1090   :  { %1153 = vst.msk [vmem:[#allocation4 + $0x8] sm:$0xc0] %vm747_vm7, %v1151_v7 }
0x1097   :  { %v1159_v10 = vld [vmem:[#allocation4 + $0x8] sm:$0xff] }
0x10fc   :  { %v2961_v24 = vpop.permute.xlu1 %2960 }
0x10fd   :  { %v2963_v8 = vunpack.i.h.bf16 %v2961_v24  ;;  %v2962_v25 = vunpack.i.l.bf16 %v2961_v24 }
0x10ff   :  { %v1170_v11 = vsel %vm193_vm2, %v1158_v9, %v2962_v25  ;;  %v1171_v12 = vsel %vm193_vm2, %v1159_v10, %v2963_v8 }
0x1100   :  { %v1199_v15 = vpack.c.bf16 %v1171_v12, %v1170_v11 }
0x1102   :  { %2762 = vmatmul.mubr.msk.bf16.vlgmr.msra.gmra.mrb[20].mxu0 %vm363_vm3, %v1199_v15  ;;  %2771 = vmatmul.mubr.msk.bf16.vlgmr.msra.gmra.mrb[24].mxu1 %vm363_vm3, %v1199_v15 }
0x1103   :  { %1438 = vmatpush1.bf16.msra.mxu0 %v3662_v14  ;;  %1469 = vmatprep.mubr.bf16.mxu0 %v3317_v17 }
0x1104   :  { %1439 = vmatprep.subr.bf16.mxu0 %v3664_v26  ;;  %1531 = vmatpush1.bf16.msra.mxu1 %v3662_v14 }
0x1105   :  { %1532 = vmatprep.subr.bf16.mxu1 %v3664_v26  ;;  %1562 = vmatprep.mubr.bf16.mxu1 %v3317_v17 }
0x1107   :  { %1440 = vmatpush1.bf16.msra.mxu0 %v3669_v27 }
0x1108   :  { %1441 = vmatprep.subr.bf16.mxu0 %v3673_v28  ;;  %1533 = vmatpush1.bf16.msra.mxu1 %v3669_v27 }
0x1109   :  { %1534 = vmatprep.subr.bf16.mxu1 %v3673_v28 }
0x110b   :  { %1442 = vmatpush1.bf16.msra.mxu0 %v3679_v29 }
0x110c   :  { %1443 = vmatprep.subr.bf16.mxu0 %v3682_v30  ;;  %1535 = vmatpush1.bf16.msra.mxu1 %v3679_v29 }
0x110d   :  { %1536 = vmatprep.subr.bf16.mxu1 %v3682_v30 }
0x110f   :  { %1444 = vmatpush1.bf16.msra.mxu0 %v3687_v31 }
0x1110   :  { %1537 = vmatpush1.bf16.msra.mxu1 %v3687_v31  ;;  %1633 = vmatprep.subr.bf16.mxu0 %v3651_v22 }
0x1111   :  { %1736 = vmatprep.subr.bf16.mxu1 %v3651_v22 }
0x1112   :  { %1470 = vmatmul.mubr.bf16.vlgmr.msra.gmra.mrb[24].mxu0 %v3317_v17 }
0x1113   :  { %1634 = vmatpush1.bf16.msra.mxu0 %v3662_v14  ;;  %1665 = vmatprep.mubr.bf16.mxu0 %v3317_v17 }
0x1114   :  { %1635 = vmatprep.subr.bf16.mxu0 %v3664_v26 }
0x1117   :  { %1636 = vmatpush1.bf16.msra.mxu0 %v3669_v27 }
0x1118   :  { %1637 = vmatprep.subr.bf16.mxu0 %v3673_v28 }
0x111b   :  { %1638 = vmatpush1.bf16.msra.mxu0 %v3679_v29 }
0x111c   :  { %1639 = vmatprep.subr.bf16.mxu0 %v3682_v30 }
0x111f   :  { %1640 = vmatpush1.bf16.msra.mxu0 %v3687_v31 }
0x1120   :  { %1839 = vmatprep.subr.bf16.mxu0 %v3651_v22 }
0x11d5   :  { %v1285_v38 = vpop.f32.mrb[20].mxu0  ;;  %v1372_v39 = vpop.f32.mrb[24].mxu1 }
0x11d6   :  { %v1286_v41 = vadd.f32 %v1285_v38, %v1203_v36  ;;  %1381 = vst [vmem:[#allocation3] sm:$0xff] %v1372_v39  ;;  %v1287_v43 = vpop.f32.mrb[21].mxu0  ;;  %v1374_v44 = vpop.f32.mrb[25].mxu1 }
0x11d7   :  { %v1288_v45 = vadd.f32 %v1287_v43, %v1207_v37  ;;  %1382 = vst [vmem:[#allocation3 + $0x8] sm:$0xff] %v1374_v44  ;;  %v1289_v46 = vpop.f32.mrb[22].mxu0  ;;  %v1376_v47 = vpop.f32.mrb[26].mxu1 }
0x11d8   :  { %1294 = vst [vmem:[#allocation2] sm:$0xff] %v1286_v41  ;;  %v1290_v48 = vadd.f32 %v1289_v46, %v1203_v36  ;;  %1383 = vst [vmem:[#allocation3 + $0x10] sm:$0xff] %v1376_v47  ;;  %v1291_v49 = vpop.f32.mrb[23].mxu0  ;;  %v1378_v50 = vpop.f32.mrb[27].mxu1 }
0x11d9   :  { %1295 = vst [vmem:[#allocation2 + $0x8] sm:$0xff] %v1288_v45  ;;  %v1292_v51 = vadd.f32 %v1291_v49, %v1207_v37  ;;  %1384 = vst [vmem:[#allocation3 + $0x18] sm:$0xff] %v1378_v50 }
0x11da   :  { %1296 = vst [vmem:[#allocation2 + $0x10] sm:$0xff] %v1290_v48 }
0x11db   :  { %1297 = vst [vmem:[#allocation2 + $0x18] sm:$0xff] %v1292_v51 }
0x11df   :  { %v1387_v40 = vld [vmem:[#allocation3 + $0x10] sm:$0xc0]  ;;  %v1385_v53 = vld [vmem:[#allocation2] sm:$0x3]  ;;  %v1513_v8 = vld [vmem:[#allocation3 + $0x10] sm:$0x30] }
0x11e0   :  { %v1391_v52 = vrot.slane %v1387_v40, 6  ;;  %v1388_v59 = vld [vmem:[#allocation3 + $0x18] sm:$0xc0]  ;;  %v1386_v18 = vld [vmem:[#allocation2 + $0x8] sm:$0x3]  ;;  %v1517_v25 = vrot.slane %v1513_v8, 2 }
0x11e1   :  { %v1392_v0 = vrot.slane %v1388_v59, 6  ;;  %v1511_v9 = vld [vmem:[#allocation2] sm:$0xc]  ;;  %v1514_v37 = vld [vmem:[#allocation3 + $0x18] sm:$0x30] }
0x11e2   :  { %v1395_v54 = vadd.f32 %v1391_v52, %v1385_v53  ;;  %v1521_v11 = vadd.f32 %v1517_v25, %v1511_v9  ;;  %v1518_v38 = vrot.slane %v1514_v37, 2  ;;  %v1512_v41 = vld [vmem:[#allocation2 + $0x8] sm:$0xc] }
0x11e3   :  { %v1396_v1 = vadd.f32 %v1392_v0, %v1386_v18  ;;  %v1615_v0 = vld [vmem:[#allocation3 + $0x10] sm:$0xc] }
0x11e4   :  { %v1522_v43 = vadd.f32 %v1518_v38, %v1512_v41  ;;  %v1619_v18 = vrot.slane %v1615_v0, 6 }
0x11e5   :  { %v1471_v55 = vpop.f32.mrb[24].mxu0 }
0x11e6   :  { %v1478_v56 = vadd.f32 %v1471_v55, %v1395_v54  ;;  %v1473_v57 = vpop.f32.mrb[25].mxu0 }
0x11e7   :  { %v1475_v61 = vpop.f32.mrb[26].mxu0  ;;  %v1479_v19 = vadd.f32 %v1473_v57, %v1396_v1  ;;  %v1613_v1 = vld [vmem:[#allocation2] sm:$0x30] }
0x11e8   :  { %v2780_v62 = vmul.f32 -1.442695, %v1478_v56  ;;  %v1476_v63 = vpop.f32.mrb[27].mxu0 }
0x11e9   :  { %v2781_v13 = vmul.f32 -1.442695, %v1479_v19 }
0x11ea   :  { %3129 = vpow2.f32 %v2780_v62 }
0x11eb   :  { %3131 = vtanh.f32 %v1479_v19 }
0x11f4   :  { %v3130_v2 = vpop.eup %3129 }
0x11f5   :  { %v1483_v3 = vadd.f32 1.0, %v3130_v2  ;;  %v3132_v60 = vpop.eup %3131  ;;  %v1623_v2 = vadd.f32 %v1619_v18, %v1613_v1 }
0x11f7   :  { %3133 = vrcp.f32 %v1483_v3 }
0x11f8   :  { %3135 = vpow2.f32 %v2781_v13 }
0x1201   :  { %v3134_v4 = vpop.eup %3133 }
0x1202   :  { %v1494_v20 = vmul.f32 %v3134_v4, %v3132_v60  ;;  %v3136_v5 = vpop.eup %3135  ;;  %v1493_v6 = vmul.f32 0.0, %v3134_v4 }
0x1203   :  { %v1490_v21 = vadd.f32 1.0, %v3136_v5 }
0x1204   :  { %1496 = vrot.lane.b32.xlu0 %v1494_v20, %s3318_s2 }
0x1205   :  { %3137 = vrcp.f32 %v1490_v21  ;;  %v1616_v21 = vld [vmem:[#allocation3 + $0x18] sm:$0xc] }
0x120f   :  { %v3138_v16 = vpop.eup %3137 }
0x1276   :  { %v1497_v32 = vpop.permute.xlu0 %1496 }
0x1277   :  { %v1499_v23 = vadd.f32 %v1497_v32, %v1493_v6  ;;  %v1620_v6 = vrot.slane %v1616_v21, 6 }
0x1279   :  { %3139 = vtanh.f32 %v1499_v23  ;;  %v1593_v48 = vrot.slane %v1499_v23, 6  ;;  %v1614_v23 = vld [vmem:[#allocation2 + $0x8] sm:$0x30] }
0x1283   :  { %v3140_v42 = vpop.eup %3139 }
0x1284   :  { %v3709_v58 = vmul.f32 %v3140_v42, %v3138_v16  ;;  %v1624_v16 = vadd.f32 %v1620_v6, %v1614_v23 }
0x1286   :  { %v1523_v7 = vpack.c.bf16 %v3709_v58, %v3709_v58 }
0x1288   :  { %1525 = vrot.lane.b32.xlu1 %v1523_v7, %s3318_s2 }
0x12fa   :  { %v1526_v24 = vpop.permute.xlu1 %1525 }
0x12fb   :  { %2782 = vmatmul.mubr.msk.bf16.vlgmr.msra.gmra.mrb[28].mxu1 %vm363_vm3, %v1526_v24 }
0x12fc   :  { %1737 = vmatpush1.bf16.msra.mxu1 %v3662_v14  ;;  %1768 = vmatprep.mubr.bf16.mxu1 %v3317_v17 }
0x12fd   :  { %1738 = vmatprep.subr.bf16.mxu1 %v3664_v26 }
0x1300   :  { %1739 = vmatpush1.bf16.msra.mxu1 %v3669_v27 }
0x1301   :  { %1740 = vmatprep.subr.bf16.mxu1 %v3673_v28 }
0x1304   :  { %1741 = vmatpush1.bf16.msra.mxu1 %v3679_v29 }
0x1305   :  { %1742 = vmatprep.subr.bf16.mxu1 %v3682_v30 }
0x1308   :  { %1743 = vmatpush1.bf16.msra.mxu1 %v3687_v31 }
0x1309   :  { %1935 = vmatprep.subr.bf16.mxu1 %v3651_v22 }
0x13ce   :  { %v1564_v10 = vpop.f32.mrb[28].mxu1 }
0x13cf   :  { %v1573_v12 = vrot.slane %v1564_v10, 6  ;;  %v1566_v15 = vpop.f32.mrb[29].mxu1 }
0x13d0   :  { %v1568_v33 = vpop.f32.mrb[30].mxu1  ;;  %v1574_v39 = vrot.slane %v1566_v15, 6 }
0x13d1   :  { %v1577_v34 = vadd.f32 %v1573_v12, %v1521_v11  ;;  %v1569_v35 = vpop.f32.mrb[31].mxu1 }
0x13d2   :  { %v1578_v44 = vadd.f32 %v1574_v39, %v1522_v43 }
0x13d3   :  { %v2783_v36 = vmul.f32 -1.442695, %v1577_v34 }
0x13d4   :  { %v2784_v40 = vmul.f32 -1.442695, %v1578_v44 }
0x13d5   :  { %3141 = vpow2.f32 %v2783_v36 }
0x13d6   :  { %3143 = vtanh.f32 %v1578_v44  ;;  %v1718_v44 = vld [vmem:[#allocation3 + $0x10] sm:$0x3] }
0x13df   :  { %v3142_v45 = vpop.eup %3141 }
0x13e0   :  { %v1582_v46 = vadd.f32 1.0, %v3142_v45  ;;  %v3144_v47 = vpop.eup %3143  ;;  %v1722_v45 = vrot.slane %v1718_v44, 2 }
0x13e2   :  { %3145 = vrcp.f32 %v1582_v46  ;;  %v1716_v46 = vld [vmem:[#allocation2] sm:$0xc0] }
0x13e3   :  { %3147 = vpow2.f32 %v2784_v40 }
0x13ec   :  { %v3146_v49 = vpop.eup %3145 }
0x13ed   :  { %v1596_v50 = vmul.f32 %v3146_v49, %v3144_v47  ;;  %v1595_v51 = vmul.f32 %v3146_v49, %v1593_v48  ;;  %v3148_v52 = vpop.eup %3147  ;;  %v1726_v48 = vadd.f32 %v1722_v45, %v1716_v46 }
0x13ee   :  { %v1589_v53 = vadd.f32 1.0, %v3148_v52 }
0x13ef   :  { %1598 = vrot.lane.b32.xlu0 %v1596_v50, %s3318_s2 }
0x13f0   :  { %3149 = vrcp.f32 %v1589_v53 }
0x13fa   :  { %v3150_v56 = vpop.eup %3149 }
0x1461   :  { %v1599_v54 = vpop.permute.xlu0 %1598 }
0x1462   :  { %v1601_v55 = vadd.f32 %v1599_v54, %v1595_v51  ;;  %v1719_v54 = vld [vmem:[#allocation3 + $0x18] sm:$0x3] }
0x1464   :  { %3151 = vtanh.f32 %v1601_v55  ;;  %v1696_v25 = vrot.slane %v1601_v55, 6  ;;  %v1723_v55 = vrot.slane %v1719_v54, 2 }
0x146e   :  { %v3152_v57 = vpop.eup %3151 }
0x146f   :  { %v3725_v59 = vmul.f32 %v3152_v57, %v3150_v56  ;;  %v1717_v57 = vld [vmem:[#allocation2 + $0x8] sm:$0xc0] }
0x1471   :  { %v1625_v61 = vpack.c.bf16 %v3725_v59, %v3725_v59 }
0x1473   :  { %v1627_v62 = vrot.slane %v1625_v61, 1  ;;  %v1727_v61 = vadd.f32 %v1723_v55, %v1717_v57  ;;  %v1918_v57 = vld [vmem:[#allocation3] sm:$0x30] }
0x1475   :  { %1628 = vrot.lane.b32.xlu1 %v1627_v62, %s3318_s2 }
0x14e7   :  { %v1629_v63 = vpop.permute.xlu1 %1628 }
0x14e8   :  { %2785 = vmatmul.mubr.msk.bf16.vlgmr.msra.gmra.mrb[28].mxu0 %vm363_vm3, %v1629_v63 }
0x14e9   :  { %1840 = vmatpush1.bf16.msra.mxu0 %v3662_v14  ;;  %1871 = vmatprep.mubr.bf16.mxu0 %v3317_v17 }
0x14ea   :  { %1841 = vmatprep.subr.bf16.mxu0 %v3664_v26 }
0x14ed   :  { %1842 = vmatpush1.bf16.msra.mxu0 %v3669_v27 }
0x14ee   :  { %1843 = vmatprep.subr.bf16.mxu0 %v3673_v28 }
0x14f1   :  { %1844 = vmatpush1.bf16.msra.mxu0 %v3679_v29 }
0x14f2   :  { %1845 = vmatprep.subr.bf16.mxu0 %v3682_v30 }
0x14f5   :  { %1846 = vmatpush1.bf16.msra.mxu0 %v3687_v31 }
0x14f6   :  { %2038 = vmatprep.subr.bf16.mxu0 %v3651_v22 }
0x15bb   :  { %v1667_v19 = vpop.f32.mrb[28].mxu0 }
0x15bc   :  { %v1676_v3 = vrot.slane %v1667_v19, 4  ;;  %v1669_v60 = vpop.f32.mrb[29].mxu0 }
0x15bd   :  { %v1671_v4 = vpop.f32.mrb[30].mxu0  ;;  %v1677_v32 = vrot.slane %v1669_v60, 4 }
0x15be   :  { %v1680_v20 = vadd.f32 %v1676_v3, %v1623_v2  ;;  %v1672_v13 = vpop.f32.mrb[31].mxu0 }
0x15bf   :  { %v1681_v42 = vadd.f32 %v1677_v32, %v1624_v16 }
0x15c0   :  { %v2786_v5 = vmul.f32 -1.442695, %v1680_v20 }
0x15c1   :  { %v2787_v12 = vmul.f32 -1.442695, %v1681_v42 }
0x15c2   :  { %3153 = vpow2.f32 %v2786_v5 }
0x15c3   :  { %3155 = vtanh.f32 %v1681_v42  ;;  %v1821_v42 = vld [vmem:[#allocation3] sm:$0xc0] }
0x15cc   :  { %v3154_v7 = vpop.eup %3153 }
0x15cd   :  { %v1685_v24 = vadd.f32 1.0, %v3154_v7  ;;  %v3156_v8 = vpop.eup %3155  ;;  %v1819_v7 = vld [vmem:[#allocation2 + $0x10] sm:$0x3] }
0x15cf   :  { %3157 = vrcp.f32 %v1685_v24  ;;  %v1825_v24 = vrot.slane %v1821_v42, 6 }
0x15d0   :  { %3159 = vpow2.f32 %v2787_v12 }
0x15d9   :  { %v3158_v9 = vpop.eup %3157 }
0x15da   :  { %v1699_v10 = vmul.f32 %v3158_v9, %v3156_v8  ;;  %v1698_v11 = vmul.f32 %v3158_v9, %v1696_v25  ;;  %v3160_v15 = vpop.eup %3159  ;;  %v1829_v8 = vadd.f32 %v1825_v24, %v1819_v7 }
0x15db   :  { %v1692_v33 = vadd.f32 1.0, %v3160_v15 }
0x15dc   :  { %1701 = vrot.lane.b32.xlu0 %v1699_v10, %s3318_s2 }
0x15dd   :  { %3161 = vrcp.f32 %v1692_v33  ;;  %v1822_v33 = vld [vmem:[#allocation3 + $0x8] sm:$0xc0] }
0x15e7   :  { %v3162_v36 = vpop.eup %3161 }
0x164e   :  { %v1702_v34 = vpop.permute.xlu0 %1701 }
0x164f   :  { %v1704_v35 = vadd.f32 %v1702_v34, %v1698_v11  ;;  %v1820_v34 = vld [vmem:[#allocation2 + $0x18] sm:$0x3] }
0x1651   :  { %3163 = vtanh.f32 %v1704_v35  ;;  %v1799_v18 = vrot.slane %v1704_v35, 6  ;;  %v1826_v35 = vrot.slane %v1822_v33, 6 }
0x165b   :  { %v3164_v37 = vpop.eup %3163 }
0x165c   :  { %v3741_v38 = vmul.f32 %v3164_v37, %v3162_v36  ;;  %v1830_v36 = vadd.f32 %v1826_v35, %v1820_v34 }
0x165e   :  { %v1728_v39 = vpack.c.bf16 %v3741_v38, %v3741_v38 }
0x1660   :  { %v1730_v41 = vrot.slane %v1728_v39, 2 }
0x1662   :  { %1731 = vrot.lane.b32.xlu1 %v1730_v41, %s3318_s2 }
0x16d4   :  { %v1732_v43 = vpop.permute.xlu1 %1731 }
0x16d5   :  { %2788 = vmatmul.mubr.msk.bf16.vlgmr.msra.gmra.mrb[32].mxu1 %vm363_vm3, %v1732_v43 }
0x16d6   :  { %1936 = vmatpush1.bf16.msra.mxu1 %v3662_v14  ;;  %1967 = vmatprep.mubr.bf16.mxu1 %v3317_v17 }
0x16d7   :  { %1937 = vmatprep.subr.bf16.mxu1 %v3664_v26 }
0x16da   :  { %1938 = vmatpush1.bf16.msra.mxu1 %v3669_v27 }
0x16db   :  { %1939 = vmatprep.subr.bf16.mxu1 %v3673_v28 }
0x16de   :  { %1940 = vmatpush1.bf16.msra.mxu1 %v3679_v29 }
0x16df   :  { %1941 = vmatprep.subr.bf16.mxu1 %v3682_v30 }
0x16e2   :  { %1942 = vmatpush1.bf16.msra.mxu1 %v3687_v31 }
0x16e3   :  { %2141 = vmatprep.subr.bf16.mxu1 %v3651_v22 }
0x17a8   :  { %v1770_v47 = vpop.f32.mrb[32].mxu1 }
0x17a9   :  { %v1779_v49 = vrot.slane %v1770_v47, 2  ;;  %v1772_v50 = vpop.f32.mrb[33].mxu1 }
0x17aa   :  { %v1774_v51 = vpop.f32.mrb[34].mxu1  ;;  %v1780_v56 = vrot.slane %v1772_v50, 2 }
0x17ab   :  { %v1783_v40 = vadd.f32 %v1779_v49, %v1726_v48  ;;  %v1775_v52 = vpop.f32.mrb[35].mxu1 }
0x17ac   :  { %v1784_v62 = vadd.f32 %v1780_v56, %v1727_v61  ;;  %v1916_v61 = vld [vmem:[#allocation2 + $0x10] sm:$0xc] }
0x17ad   :  { %v2789_v53 = vmul.f32 -1.442695, %v1783_v40 }
0x17ae   :  { %v2790_v3 = vmul.f32 -1.442695, %v1784_v62 }
0x17af   :  { %3165 = vpow2.f32 %v2789_v53 }
0x17b0   :  { %3167 = vtanh.f32 %v1784_v62  ;;  %v1922_v62 = vrot.slane %v1918_v57, 2 }
0x17b9   :  { %v3166_v63 = vpop.eup %3165 }
0x17ba   :  { %v1788_v22 = vadd.f32 1.0, %v3166_v63  ;;  %v3168_v0 = vpop.eup %3167 }
0x17bc   :  { %3169 = vrcp.f32 %v1788_v22  ;;  %v1926_v22 = vadd.f32 %v1922_v62, %v1916_v61 }
0x17bd   :  { %3171 = vpow2.f32 %v2790_v3 }
0x17c6   :  { %v3170_v1 = vpop.eup %3169 }
0x17c7   :  { %v1802_v19 = vmul.f32 %v3170_v1, %v3168_v0  ;;  %v1801_v2 = vmul.f32 %v3170_v1, %v1799_v18  ;;  %v3172_v60 = vpop.eup %3171 }
0x17c8   :  { %v1795_v4 = vadd.f32 1.0, %v3172_v60 }
0x17c9   :  { %1804 = vrot.lane.b32.xlu0 %v1802_v19, %s3318_s2 }
0x17ca   :  { %3173 = vrcp.f32 %v1795_v4 }
0x17d4   :  { %v3174_v5 = vpop.eup %3173 }
0x183b   :  { %v1805_v20 = vpop.permute.xlu0 %1804 }
0x183c   :  { %v1807_v13 = vadd.f32 %v1805_v20, %v1801_v2 }
0x183e   :  { %3175 = vtanh.f32 %v1807_v13  ;;  %v1896_v44 = vrot.slane %v1807_v13, 6 }
0x1848   :  { %v3176_v21 = vpop.eup %3175 }
0x1849   :  { %v3757_v6 = vmul.f32 %v3176_v21, %v3174_v5 }
0x184b   :  { %v1831_v32 = vpack.c.bf16 %v3757_v6, %v3757_v6 }
0x184d   :  { %v1833_v23 = vrot.slane %v1831_v32, 3 }
0x184f   :  { %1834 = vrot.lane.b32.xlu1 %v1833_v23, %s3318_s2 }
0x18c1   :  { %v1835_v16 = vpop.permute.xlu1 %1834 }
0x18c2   :  { %2791 = vmatmul.mubr.msk.bf16.vlgmr.msra.gmra.mrb[32].mxu0 %vm363_vm3, %v1835_v16 }
0x18c3   :  { %2039 = vmatpush1.bf16.msra.mxu0 %v3662_v14  ;;  %2070 = vmatprep.mubr.bf16.mxu0 %v3317_v17 }
0x18c4   :  { %2040 = vmatprep.subr.bf16.mxu0 %v3664_v26 }
0x18c7   :  { %2041 = vmatpush1.bf16.msra.mxu0 %v3669_v27 }
0x18c8   :  { %2042 = vmatprep.subr.bf16.mxu0 %v3673_v28 }
0x18cb   :  { %2043 = vmatpush1.bf16.msra.mxu0 %v3679_v29 }
0x18cc   :  { %2044 = vmatprep.subr.bf16.mxu0 %v3682_v30 }
0x18cf   :  { %2045 = vmatpush1.bf16.msra.mxu0 %v3687_v31 }
0x1995   :  { %v1873_v25 = vpop.f32.mrb[32].mxu0 }
0x1996   :  { %v1880_v9 = vadd.f32 %v1873_v25, %v1829_v8  ;;  %v1875_v10 = vpop.f32.mrb[33].mxu0 }
0x1997   :  { %v1877_v11 = vpop.f32.mrb[34].mxu0  ;;  %v1881_v37 = vadd.f32 %v1875_v10, %v1830_v36 }
0x1998   :  { %v2792_v12 = vmul.f32 -1.442695, %v1880_v9  ;;  %v1878_v15 = vpop.f32.mrb[35].mxu0  ;;  %v2020_v11 = vld [vmem:[#allocation3] sm:$0xc] }
0x1999   :  { %v2793_v48 = vmul.f32 -1.442695, %v1881_v37  ;;  %v2024_v15 = vrot.slane %v2020_v11, 6 }
0x199a   :  { %3177 = vpow2.f32 %v2792_v12  ;;  %v2018_v12 = vld [vmem:[#allocation2 + $0x10] sm:$0x30] }
0x199b   :  { %3179 = vtanh.f32 %v1881_v37  ;;  %v2028_v34 = vadd.f32 %v2024_v15, %v2018_v12 }
0x19a4   :  { %v3178_v39 = vpop.eup %3177 }
0x19a5   :  { %v1885_v41 = vadd.f32 1.0, %v3178_v39  ;;  %v3180_v43 = vpop.eup %3179 }
0x19a7   :  { %3181 = vrcp.f32 %v1885_v41 }
0x19a8   :  { %3183 = vpow2.f32 %v2793_v48 }
0x19b1   :  { %v3182_v45 = vpop.eup %3181 }
0x19b2   :  { %v1899_v46 = vmul.f32 %v3182_v45, %v3180_v43  ;;  %v1898_v47 = vmul.f32 %v3182_v45, %v1896_v44  ;;  %v3184_v49 = vpop.eup %3183  ;;  %v2021_v44 = vld [vmem:[#allocation3 + $0x8] sm:$0xc]  ;;  %v2019_v45 = vld [vmem:[#allocation2 + $0x18] sm:$0x30] }
0x19b3   :  { %v1892_v50 = vadd.f32 1.0, %v3184_v49 }
0x19b4   :  { %1901 = vrot.lane.b32.xlu0 %v1899_v46, %s3318_s2  ;;  %v2025_v46 = vrot.slane %v2021_v44, 6 }
0x19b5   :  { %3185 = vrcp.f32 %v1892_v50 }
0x19b6   :  { %v2029_v48 = vadd.f32 %v2025_v46, %v2019_v45 }
0x19bf   :  { %v3186_v52 = vpop.eup %3185 }
0x1a26   :  { %v1902_v51 = vpop.permute.xlu0 %1901 }
0x1a27   :  { %v1904_v40 = vadd.f32 %v1902_v51, %v1898_v47 }
0x1a29   :  { %3187 = vtanh.f32 %v1904_v40  ;;  %v1998_v4 = vrot.slane %v1904_v40, 6 }
0x1a33   :  { %v3188_v53 = vpop.eup %3187 }
0x1a34   :  { %v3772_v54 = vmul.f32 %v3188_v53, %v3186_v52 }
0x1a36   :  { %v1928_v55 = vpack.c.bf16 %v3772_v54, %v3772_v54 }
0x1a38   :  { %1930 = vrot.lane.b32.xlu1 %v1928_v55, %s3318_s2 }
0x1aaa   :  { %v1931_v56 = vpop.permute.xlu1 %1930 }
0x1aab   :  { %2794 = vmatmul.mubr.msk.bf16.vlgmr.msra.gmra.mrb[36].mxu1 %vm363_vm3, %v1931_v56 }
0x1aac   :  { %2142 = vmatpush1.bf16.msra.mxu1 %v3662_v14  ;;  %2173 = vmatprep.mubr.bf16.mxu1 %v3317_v17 }
0x1aad   :  { %2143 = vmatprep.subr.bf16.mxu1 %v3664_v26 }
0x1ab0   :  { %2144 = vmatpush1.bf16.msra.mxu1 %v3669_v27  ;;  %v1919_v27 = vld [vmem:[#allocation3 + $0x8] sm:$0x30] }
0x1ab1   :  { %2145 = vmatprep.subr.bf16.mxu1 %v3673_v28  ;;  %v1917_v28 = vld [vmem:[#allocation2 + $0x18] sm:$0xc]  ;;  %v1923_v19 = vrot.slane %v1919_v27, 2 }
0x1ab3   :  { %v1927_v2 = vadd.f32 %v1923_v19, %v1917_v28 }
0x1ab4   :  { %2146 = vmatpush1.bf16.msra.mxu1 %v3679_v29 }
0x1ab5   :  { %2147 = vmatprep.subr.bf16.mxu1 %v3682_v30 }
0x1ab8   :  { %2148 = vmatpush1.bf16.msra.mxu1 %v3687_v31 }
0x1b7e   :  { %v1969_v63 = vpop.f32.mrb[36].mxu1 }
0x1b7f   :  { %v1978_v14 = vrot.slane %v1969_v63, 6  ;;  %v1971_v0 = vpop.f32.mrb[37].mxu1 }
0x1b80   :  { %v1973_v17 = vpop.f32.mrb[38].mxu1  ;;  %v1979_v29 = vrot.slane %v1971_v0, 6 }
0x1b81   :  { %v1982_v18 = vadd.f32 %v1978_v14, %v1926_v22  ;;  %v1974_v26 = vpop.f32.mrb[39].mxu1 }
0x1b82   :  { %v1983_v30 = vadd.f32 %v1979_v29, %v1927_v2 }
0x1b83   :  { %v2795_v1 = vmul.f32 -1.442695, %v1982_v18 }
0x1b84   :  { %v2796_v21 = vmul.f32 -1.442695, %v1983_v30 }
0x1b85   :  { %3189 = vpow2.f32 %v2795_v1 }
0x1b86   :  { %3191 = vtanh.f32 %v1983_v30  ;;  %v2123_v30 = vld [vmem:[#allocation3] sm:$0x3] }
0x1b8f   :  { %v3190_v3 = vpop.eup %3189 }
0x1b90   :  { %v1987_v31 = vadd.f32 1.0, %v3190_v3  ;;  %v3192_v60 = vpop.eup %3191  ;;  %v2121_v3 = vld [vmem:[#allocation2 + $0x10] sm:$0xc0] }
0x1b92   :  { %3193 = vrcp.f32 %v1987_v31  ;;  %v2127_v31 = vrot.slane %v2123_v30, 2  ;;  %v2803_v30 = vld [vmem:[#allocation9] ss:$0 sm:$0xff] }
0x1b93   :  { %3195 = vpow2.f32 %v2796_v21 }
0x1b9c   :  { %v3194_v20 = vpop.eup %3193 }
0x1b9d   :  { %v2001_v13 = vmul.f32 %v3194_v20, %v3192_v60  ;;  %v2000_v5 = vmul.f32 %v3194_v20, %v1998_v4  ;;  %v3196_v32 = vpop.eup %3195  ;;  %v2131_v4 = vadd.f32 %v2127_v31, %v2121_v3  ;;  %v2804_v31 = vld [vmem:[#allocation9 + $0x1] ss:$0 sm:$0xff] }
0x1b9e   :  { %v1994_v23 = vadd.f32 1.0, %v3196_v32 }
0x1b9f   :  { %2003 = vrot.lane.b32.xlu0 %v2001_v13, %s3318_s2 }
0x1ba0   :  { %3197 = vrcp.f32 %v1994_v23 }
0x1baa   :  { %v3198_v7 = vpop.eup %3197 }
0x1c11   :  { %v2004_v16 = vpop.permute.xlu0 %2003 }
0x1c12   :  { %v2006_v42 = vadd.f32 %v2004_v16, %v2000_v5  ;;  %v2124_v16 = vld [vmem:[#allocation3 + $0x8] sm:$0x3] }
0x1c14   :  { %3199 = vtanh.f32 %v2006_v42  ;;  %v2101_v52 = vrot.slane %v2006_v42, 6  ;;  %v2122_v42 = vld [vmem:[#allocation2 + $0x18] sm:$0xc0] }
0x1c1e   :  { %v3200_v24 = vpop.eup %3199 }
0x1c1f   :  { %v3787_v8 = vmul.f32 %v3200_v24, %v3198_v7  ;;  %v2128_v7 = vrot.slane %v2124_v16, 2 }
0x1c21   :  { %v2030_v25 = vpack.c.bf16 %v3787_v8, %v3787_v8 }
0x1c23   :  { %v2032_v9 = vrot.slane %v2030_v25, 1  ;;  %v2132_v25 = vadd.f32 %v2128_v7, %v2122_v42 }
0x1c25   :  { %2033 = vrot.lane.b32.xlu1 %v2032_v9, %s3318_s2 }
0x1c97   :  { %v2034_v10 = vpop.permute.xlu1 %2033 }
0x1c98   :  { %2797 = vmatmul.mubr.msk.bf16.vlgmr.msra.gmra.mrb[36].mxu0 %vm363_vm3, %v2034_v10 }
0x1d6b   :  { %v2072_v33 = vpop.f32.mrb[36].mxu0 }
0x1d6c   :  { %v2081_v35 = vrot.slane %v2072_v33, 4  ;;  %v2074_v36 = vpop.f32.mrb[37].mxu0 }
0x1d6d   :  { %v2076_v37 = vpop.f32.mrb[38].mxu0  ;;  %v2082_v47 = vrot.slane %v2074_v36, 4 }
0x1d6e   :  { %v2085_v39 = vadd.f32 %v2081_v35, %v2028_v34  ;;  %v2077_v41 = vpop.f32.mrb[39].mxu0 }
0x1d6f   :  { %v2086_v49 = vadd.f32 %v2082_v47, %v2029_v48 }
0x1d70   :  { %v2798_v43 = vmul.f32 -1.442695, %v2085_v39 }
0x1d71   :  { %v2799_v57 = vmul.f32 -1.442695, %v2086_v49 }
0x1d72   :  { %3201 = vpow2.f32 %v2798_v43 }
0x1d73   :  { %3203 = vtanh.f32 %v2086_v49 }
0x1d7c   :  { %v3202_v50 = vpop.eup %3201 }
0x1d7d   :  { %v2090_v51 = vadd.f32 1.0, %v3202_v50  ;;  %v3204_v40 = vpop.eup %3203 }
0x1d7f   :  { %3205 = vrcp.f32 %v2090_v51 }
0x1d80   :  { %3207 = vpow2.f32 %v2799_v57 }
0x1d89   :  { %v3206_v53 = vpop.eup %3205 }
0x1d8a   :  { %v2104_v55 = vmul.f32 %v3206_v53, %v3204_v40  ;;  %v2103_v56 = vmul.f32 %v3206_v53, %v2101_v52  ;;  %v3208_v61 = vpop.eup %3207 }
0x1d8b   :  { %v2097_v62 = vadd.f32 1.0, %v3208_v61 }
0x1d8c   :  { %2106 = vrot.lane.b32.xlu0 %v2104_v55, %s3318_s2 }
0x1d8d   :  { %3209 = vrcp.f32 %v2097_v62 }
0x1d97   :  { %v3210_v14 = vpop.eup %3209 }
0x1dfe   :  { %v2107_v63 = vpop.permute.xlu0 %2106 }
0x1dff   :  { %v2109_v22 = vadd.f32 %v2107_v63, %v2103_v56 }
0x1e01   :  { %3211 = vtanh.f32 %v2109_v22  ;;  %v2204_v15 = vrot.slane %v2109_v22, 6 }
0x1e0b   :  { %v3212_v0 = vpop.eup %3211 }
0x1e0c   :  { %v2111_v17 = vmul.f32 %v3212_v0, %v3210_v14 }
0x1e0e   :  { %v2133_v18 = vpack.c.bf16 %v2111_v17, %v2111_v17 }
0x1e10   :  { %v2135_v26 = vrot.slane %v2133_v18, 2 }
0x1e12   :  { %2136 = vrot.lane.b32.xlu1 %v2135_v26, %s3318_s2 }
0x1e16   :  { %1507 = vrot.lane.b32.xlu1 %v3709_v58, %s3319_s16 }
0x1e1a   :  { %1712 = vrot.lane.b32.xlu1 %v3741_v38, %s3319_s16 }
0x1e1e   :  { %1912 = vrot.lane.b32.xlu1 %v3772_v54, %s3319_s16 }
0x1e22   :  { %2117 = vrot.lane.b32.xlu1 %v2111_v17, %s3319_s16 }
0x1e26   :  { %1503 = vrot.lane.b32.xlu1 %v3709_v58, %s3318_s2 }
0x1e2a   :  { %1708 = vrot.lane.b32.xlu1 %v3741_v38, %s3318_s2 }
0x1e2e   :  { %1908 = vrot.lane.b32.xlu1 %v3772_v54, %s3318_s2 }
0x1e32   :  { %2113 = vrot.lane.b32.xlu1 %v2111_v17, %s3318_s2 }
0x1e84   :  { %v2137_v1 = vpop.permute.xlu1 %2136 }
0x1e85   :  { %2800 = vmatmul.mubr.msk.bf16.vlgmr.msra.gmra.mrb[40].mxu1 %vm363_vm3, %v2137_v1 }
0x1e88   :  { %v1508_v27 = vpop.permute.xlu1 %1507 }
0x1e89   :  { %1510 = vst.msk [vmem:[#allocation5 + $0xe] sm:$0x3] %vm436_vm4, %v1508_v27 }
0x1e8c   :  { %v1713_v28 = vpop.permute.xlu1 %1712 }
0x1e8d   :  { %1715 = vst.msk [vmem:[#allocation5 + $0x6] sm:$0x30] %vm643_vm5, %v1713_v28 }
0x1e90   :  { %v1913_v19 = vpop.permute.xlu1 %1912 }
0x1e91   :  { %1915 = vst.msk [vmem:[#allocation5 + $0x6] sm:$0x3] %vm436_vm4, %v1913_v19 }
0x1e94   :  { %v2118_v58 = vpop.permute.xlu1 %2117 }
0x1e95   :  { %2120 = vst.msk [vmem:[#allocation5 - $0x2] sm:$0x30] %vm643_vm5, %v2118_v58 }
0x1e98   :  { %v1504_v38 = vpop.permute.xlu1 %1503 }
0x1e99   :  { %1506 = vst.msk [vmem:[#allocation4] sm:$0x3] %vm436_vm4, %v1504_v38 }
0x1e9c   :  { %v1709_v54 = vpop.permute.xlu1 %1708 }
0x1e9d   :  { %1711 = vst.msk [vmem:[#allocation4] sm:$0x30] %vm643_vm5, %v1709_v54 }
0x1ea0   :  { %v1909_v29 = vpop.permute.xlu1 %1908 }
0x1ea1   :  { %1911 = vst.msk [vmem:[#allocation4 + $0x8] sm:$0x3] %vm436_vm4, %v1909_v29 }
0x1ea4   :  { %v2114_v2 = vpop.permute.xlu1 %2113 }
0x1ea5   :  { %2116 = vst.msk [vmem:[#allocation4 + $0x8] sm:$0x30] %vm643_vm5, %v2114_v2 }
0x1f58   :  { %v2175_v60 = vpop.f32.mrb[40].mxu1 }
0x1f59   :  { %v2184_v20 = vrot.slane %v2175_v60, 2  ;;  %v2177_v13 = vpop.f32.mrb[41].mxu1 }
0x1f5a   :  { %v2179_v5 = vpop.f32.mrb[42].mxu1  ;;  %v2185_v24 = vrot.slane %v2177_v13, 2 }
0x1f5b   :  { %v2188_v21 = vadd.f32 %v2184_v20, %v2131_v4  ;;  %v2180_v32 = vpop.f32.mrb[43].mxu1  ;;  %v2805_v4 = vld [vmem:[#allocation9 + $0x2] ss:$0 sm:$0xff] }
0x1f5c   :  { %v2189_v9 = vadd.f32 %v2185_v24, %v2132_v25 }
0x1f5d   :  { %v2801_v23 = vmul.f32 -1.442695, %v2188_v21 }
0x1f5e   :  { %v2802_v36 = vmul.f32 -1.442695, %v2189_v9 }
0x1f5f   :  { %3213 = vpow2.f32 %v2801_v23 }
0x1f60   :  { %3215 = vtanh.f32 %v2189_v9 }
0x1f69   :  { %v3214_v10 = vpop.eup %3213 }
0x1f6a   :  { %v2193_v11 = vadd.f32 1.0, %v3214_v10  ;;  %v3216_v12 = vpop.eup %3215  ;;  %v2806_v10 = vld [vmem:[#allocation9 + $0x3] ss:$0 sm:$0xff] }
0x1f6c   :  { %3217 = vrcp.f32 %v2193_v11 }
0x1f6d   :  { %3219 = vpow2.f32 %v2802_v36 }
0x1f76   :  { %v3218_v33 = vpop.eup %3217 }
0x1f77   :  { %v2207_v34 = vmul.f32 %v3218_v33, %v3216_v12  ;;  %v2206_v35 = vmul.f32 %v3218_v33, %v2204_v15  ;;  %v3220_v37 = vpop.eup %3219  ;;  %v3320_v15 = vmov 50  }
0x1f78   :  { %v2200_v39 = vadd.f32 1.0, %v3220_v37  ;;  %2965 = vset.pattern.permute.xlu0 %v3320_v15  ;;  %2964 = vset.pattern.permute.xlu1 %v3320_v15  ;;  %v3239_v37 = vld [vmem:[%s3883_s0 + $0x8] sm:$0xff] }
0x1f79   :  { %2209 = vrot.lane.b32.xlu0 %v2207_v34, %s3318_s2  ;;  %vm2302_vm8 = vcmp.gt.f32.partialorder %v3239_v37, 0.5  ;;  %v2814_v37 = vld [vmem:[#allocation9 + $0x8] ss:$0 sm:$0xff] }
0x1f7a   :  { %3221 = vrcp.f32 %v2200_v39 }
0x1f7d   :  { %1609 = vrot.lane.b32.xlu0 %v3725_v59, %s3319_s16 }
0x1f81   :  { %1815 = vrot.lane.b32.xlu0 %v3757_v6, %s3319_s16 }
0x1f84   :  { %v3222_v46 = vpop.eup %3221 }
0x1f85   :  { %2014 = vrot.lane.b32.xlu0 %v3787_v8, %s3319_s16 }
0x1feb   :  { %v2210_v41 = vpop.permute.xlu0 %2209 }
0x1fec   :  { %v2212_v43 = vadd.f32 %v2210_v41, %v2206_v35 }
0x1fee   :  { %3223 = vtanh.f32 %v2212_v43 }
0x1fef   :  { %v1610_v44 = vpop.permute.xlu0 %1609 }
0x1ff0   :  { %1612 = vst.msk [vmem:[#allocation5 + $0xa] sm:$0xc] %vm539_vm6, %v1610_v44 }
0x1ff3   :  { %v1816_v45 = vpop.permute.xlu0 %1815 }
0x1ff4   :  { %1818 = vst.msk [vmem:[#allocation5 + $0x2] sm:$0xc0] %vm747_vm7, %v1816_v45  ;;  %v3240_v45 = vld [vmem:[%s3883_s0] sm:$0xff]  ;;  %s3327_s0 = smov [#allocation11]  }
0x1ff5   :  { %vm2301_vm9 = vcmp.gt.f32.partialorder %v3240_v45, 0.5  ;;  %v2816_v45 = vld [vmem:[#allocation9 + $0xa] ss:$0 sm:$0xff]  ;;  %s2700_s21 = sshll.u32 %s3327_s0, 4  ;;  %s2701_s21 = int_to_ptr.vmem [resolvable:$true] %s2700_s21 }
0x1ff6   :  { %s3285_s22 = scalar_lea.vmem %s2701_s21, 32  ;;  %p3290_p3 = scmp.lt.s32.totalorder %s2701_s21, %s2701_s21 }
0x1ff7   :  { %v2015_v47 = vpop.permute.xlu0 %2014  ;;  %p3286_p2 = scmp.ne.s32.totalorder %s2701_s21, %s3285_s22  ;;  %p3291_p4 = scmp.lt.s32.totalorder %s3285_s22, %s3285_s22 }
0x1ff8   :  { %v3224_v48 = vpop.eup %3223  ;;  %2017 = vst.msk [vmem:[#allocation5 + $0x2] sm:$0xc] %vm539_vm6, %v2015_v47 }
0x1ff9   :  { %v2214_v49 = vmul.f32 %v3224_v48, %v3222_v46  ;;  %p3292_p5 = por %p3291_p4, %p3290_p3 }
0x1ffb   :  { %2220 = vrot.lane.b32.xlu0 %v2214_v49, %s3319_s16  ;;  %v2227_v50 = vld [vmem:[#allocation5 + $0x8] sm:$0xff]  ;;  %p3293_p6 = pnand %p3292_p5, %p3286_p2 }
0x1fff   :  { %1605 = vrot.lane.b32.xlu0 %v3725_v59, %s3318_s2 }
0x2003   :  { %1811 = vrot.lane.b32.xlu0 %v3757_v6, %s3318_s2 }
0x2007   :  { %2010 = vrot.lane.b32.xlu0 %v3787_v8, %s3318_s2 }
0x200b   :  { %2216 = vrot.lane.b32.xlu0 %v2214_v49, %s3318_s2 }
0x200f   :  { %2232 = vrot.lane.b32.xlu0 %v2227_v50, %s3319_s16 }
0x206d   :  { %v2221_v51 = vpop.permute.xlu0 %2220 }
0x206e   :  { %2223 = vst.msk [vmem:[#allocation5 - $0x6] sm:$0xc0] %vm747_vm7, %v2221_v51  ;;  %v3323_v51 = vmov 0.0|0.0  }
0x206f   :  { %2920 = vmatprep.subr.bf16.mxu0 %v3323_v51  ;;  %2923 = vmatprep.subr.bf16.mxu1 %v3323_v51 }
0x2071   :  { %v1606_v40 = vpop.permute.xlu0 %1605 }
0x2072   :  { %1608 = vst.msk [vmem:[#allocation4] sm:$0xc] %vm539_vm6, %v1606_v40  ;;  %v3325_v40 = vmov 0.0  }
0x2073   :  { %2868 = vmatprep.mubr.msk.f32.mxu0 %vm3324_vm10, %v3325_v40  ;;  %2887 = vmatprep.mubr.msk.f32.mxu1 %vm3324_vm10, %v3325_v40 }
0x2075   :  { %v1812_v52 = vpop.permute.xlu0 %1811  ;;  %v2226_v53 = vld [vmem:[#allocation5] sm:$0xff] }
0x2076   :  { %1814 = vst.msk [vmem:[#allocation4] sm:$0xc0] %vm747_vm7, %v1812_v52  ;;  %2230 = vrot.lane.b32.xlu1 %v2226_v53, %s3319_s16 }
0x2079   :  { %v2011_v59 = vpop.permute.xlu0 %2010 }
0x207a   :  { %2013 = vst.msk [vmem:[#allocation4 + $0x8] sm:$0xc] %vm539_vm6, %v2011_v59 }
0x207d   :  { %v2217_v6 = vpop.permute.xlu0 %2216  ;;  %v2224_v62 = vld [vmem:[#allocation4] sm:$0xff] }
0x207e   :  { %2219 = vst.msk [vmem:[#allocation4 + $0x8] sm:$0xc0] %vm747_vm7, %v2217_v6 }
0x2081   :  { %v2233_v8 = vpop.permute.xlu0 %2232 }
0x2085   :  { %v2225_v55 = vld [vmem:[#allocation4 + $0x8] sm:$0xff] }
0x2086   :  { %v2237_v56 = vsel %vm193_vm2, %v2225_v55, %v2233_v8 }
0x2087   :  { %v2243_v57 = vsel %vm363_vm3, %v2237_v56, 0.0 }
0x2088   :  { %2244 = vadd.xlane.f32.xlu0 %v2243_v57 }
0x20e8   :  { %v2231_v61 = vpop.permute.xlu1 %2230 }
0x20e9   :  { %v2236_v63 = vsel %vm193_vm2, %v2224_v62, %v2231_v61 }
0x20ea   :  { %v2240_v22 = vsel %vm363_vm3, %v2236_v63, 0.0 }
0x20eb   :  { %2241 = vadd.xlane.f32.xlu1 %v2240_v22  ;;  %v3326_v22 = vmov 64  }
0x2115   :  { %v2245_v14 = vpop.xlane.xlu0 %2244 }
0x2116   :  { %v2248_v0 = vmul.f32 0.015625, %v2245_v14  ;;  %v2419_v14 = vld [vmem:[#allocation9 + $0x10] sm:$0xff] }
0x2118   :  { %v2250_v17 = vsub.f32 %v2237_v56, %v2248_v0  ;;  %v2420_v0 = vld [vmem:[#allocation9 + $0x18] sm:$0xff] }
0x211a   :  { %v2252_v18 = vmul.f32 %v2250_v17, %v2250_v17 }
0x211c   :  { %v2256_v26 = vsel %vm363_vm3, %v2252_v18, 0.0  ;;  %v2924_v18 = vpack.c.bf16 %v2420_v0, %v2419_v14 }
0x211d   :  { %2257 = vadd.xlane.f32.xlu1 %v2256_v26  ;;  %v2422_v26 = vld [vmem:[#allocation9 + $0x28] sm:$0xff] }
0x211e   :  { %2925 = vmatpush3.bf16.msra.mxu1 %v2924_v18 }
0x211f   :  { %2926 = vmatprep.subr.bf16.mxu1 %v3323_v51 }
0x2178   :  { %v2242_v1 = vpop.xlane.xlu1 %2241 }
0x2179   :  { %v2247_v27 = vmul.f32 0.015625, %v2242_v1 }
0x217b   :  { %v2249_v28 = vsub.f32 %v2236_v63, %v2247_v27  ;;  %v2317_v63 = vld [vmem:[#allocation9 + $0xc] sm:$0x3]  ;;  %v2423_v27 = vld [vmem:[#allocation9 + $0x30] sm:$0xff] }
0x217d   :  { %v2251_v19 = vmul.f32 %v2249_v28, %v2249_v28 }
0x217f   :  { %v2253_v58 = vsel %vm363_vm3, %v2251_v19, 0.0 }
0x2180   :  { %2254 = vadd.xlane.f32.xlu0 %v2253_v58  ;;  %v2425_v58 = vld [vmem:[#allocation9 + $0x40] sm:$0xff] }
0x21aa   :  { %v2258_v38 = vpop.xlane.xlu1 %2257 }
0x21ab   :  { %v2260_v54 = vmul.f32 0.015625, %v2258_v38  ;;  %v2426_v38 = vld [vmem:[#allocation9 + $0x48] sm:$0xff] }
0x21ad   :  { %v2262_v29 = vadd.f32 1e-05, %v2260_v54  ;;  %v2933_v54 = vpack.c.bf16 %v2426_v38, %v2425_v58 }
0x21af   :  { %3225 = vrsqrt.f32 %v2262_v29 }
0x21b9   :  { %v3226_v2 = vpop.eup %3225 }
0x21ba   :  { %v2266_v3 = vmul.f32 %v3226_v2, %v2250_v17  ;;  %v2421_v17 = vld [vmem:[#allocation9 + $0x20] sm:$0xff] }
0x21bb   :  { %v2927_v1 = vpack.c.bf16 %v2422_v26, %v2421_v17 }
0x21bc   :  { %v2272_v60 = vmul.f32 %v2803_v30, %v2266_v3 }
0x21bd   :  { %2928 = vmatpush3.bf16.msra.mxu1 %v2927_v1 }
0x21be   :  { %v2278_v20 = vadd.f32 %v2804_v31, %v2272_v60  ;;  %2929 = vmatprep.subr.bf16.mxu1 %v3323_v51  ;;  %v2518_v60 = vld [vmem:[#allocation9 + $0x50] sm:$0xff] }
0x21c0   :  { %v2286_v13 = vmul.f32 %v2805_v4, %v2278_v20 }
0x21c2   :  { %v2290_v5 = vsel %vm363_vm3, %v2286_v13, 0.0 }
0x21c3   :  { %2291 = vadd.xlane.f32.xlu1 %v2290_v5  ;;  %v2521_v5 = vld [vmem:[#allocation9 + $0x68] sm:$0xff] }
0x220d   :  { %v2255_v21 = vpop.xlane.xlu0 %2254 }
0x220e   :  { %v2259_v32 = vmul.f32 0.015625, %v2255_v21 }
0x2210   :  { %v2261_v23 = vadd.f32 1e-05, %v2259_v32  ;;  %v2808_v32 = vld [vmem:[#allocation9 + $0x4] ss:$0 sm:$0xff] }
0x2212   :  { %3227 = vrsqrt.f32 %v2261_v23 }
0x221c   :  { %v3228_v16 = vpop.eup %3227 }
0x221d   :  { %v2265_v42 = vmul.f32 %v3228_v16, %v2249_v28  ;;  %v2424_v28 = vld [vmem:[#allocation9 + $0x38] sm:$0xff] }
0x221e   :  { %v2930_v19 = vpack.c.bf16 %v2424_v28, %v2423_v27 }
0x221f   :  { %v2271_v7 = vmul.f32 %v2803_v30, %v2265_v42 }
0x2220   :  { %2931 = vmatpush3.bf16.msra.mxu1 %v2930_v19 }
0x2221   :  { %v2277_v24 = vadd.f32 %v2804_v31, %v2271_v7  ;;  %2932 = vmatprep.subr.bf16.mxu1 %v3323_v51  ;;  %v2810_v7 = vld [vmem:[#allocation9 + $0x5] ss:$0 sm:$0xff] }
0x2223   :  { %v2285_v25 = vmul.f32 %v2805_v4, %v2277_v24  ;;  %v2519_v4 = vld [vmem:[#allocation9 + $0x58] sm:$0xff] }
0x2224   :  { %2934 = vmatpush3.bf16.msra.mxu1 %v2933_v54  ;;  %v2936_v13 = vpack.c.bf16 %v2519_v4, %v2518_v60 }
0x2225   :  { %v2287_v9 = vsel %vm363_vm3, %v2285_v25, 0.0  ;;  %v2811_v25 = vld [vmem:[#allocation9 + $0x6] ss:$0 sm:$0xff] }
0x2226   :  { %2288 = vadd.xlane.f32.xlu0 %v2287_v9 }
0x2250   :  { %v2292_v11 = vpop.xlane.xlu1 %2291 }
0x2251   :  { %v2298_v12 = vadd.f32 %v2806_v10, %v2292_v11  ;;  %v2613_v11 = vld [vmem:[#allocation9 + $0x70] sm:$0xff] }
0x2253   :  { %3229 = vtanh.f32 %v2298_v12  ;;  %v2614_v12 = vld [vmem:[#allocation9 + $0x78] sm:$0xff] }
0x2254   :  { %v2942_v15 = vpack.c.bf16 %v2614_v12, %v2613_v11 }
0x225d   :  { %v3230_v33 = vpop.eup %3229 }
0x225e   :  { %2307 = vrot.lane.b32.xlu1 %v3230_v33, %s3321_s3  ;;  %v2812_v33 = vld [vmem:[#allocation9 + $0x7] ss:$0 sm:$0xff] }
0x22b3   :  { %v2289_v34 = vpop.xlane.xlu0 %2288 }
0x22b4   :  { %v2297_v35 = vadd.f32 %v2806_v10, %v2289_v34 }
0x22b6   :  { %3231 = vtanh.f32 %v2297_v35 }
0x22c0   :  { %v3232_v36 = vpop.eup %3231 }
0x22c1   :  { %2305 = vrot.lane.b32.xlu0 %v3232_v36, %s3321_s3 }
0x22d0   :  { %v2308_v39 = vpop.permute.xlu1 %2307 }
0x22d1   :  { %v2312_v41 = vsel %vm2302_vm8, %v2308_v39, -1e+09 }
0x22d2   :  { %v2315_v43 = vmul.f32 1.442695, %v2312_v41  ;;  %v2815_v41 = vld [vmem:[#allocation9 + $0x9] ss:$0 sm:$0xff] }
0x22d4   :  { %3233 = vpow2.f32 %v2315_v43 }
0x22de   :  { %v3234_v44 = vpop.eup %3233 }
0x22df   :  { %2325 = vperm.xlu0 %2965, %v3234_v44  }
0x22e3   :  { %2972 = vset.pattern.permute.xlu0 %v3326_v22 }
0x2333   :  { %v2306_v46 = vpop.permute.xlu0 %2305 }
0x2334   :  { %v2311_v47 = vsel %vm2301_vm9, %v2306_v46, -1e+09 }
0x2335   :  { %v2313_v48 = vmul.f32 1.442695, %v2311_v47 }
0x2337   :  { %3235 = vpow2.f32 %v2313_v48 }
0x2341   :  { %v3236_v49 = vpop.eup %3235 }
0x2342   :  { %2320 = vperm.xlu1 %2964, %v3236_v49   ;;  %v2966_v50 = vpack.i.bf16 %v3234_v44, %v3236_v49 }
0x2346   :  { %2967 = vrot.lane.b32.xlu1 %v2966_v50, %s3322_s20 }
0x2347   :  { %2971 = vset.pattern.permute.xlu1 %v3326_v22 }
0x235e   :  { %v2326_v53 = vpop.permute.xlu0 %2325 }
0x235f   :  { %v2329_v6 = vmul.f32 %v2326_v53, %v2278_v20  ;;  %v2520_v20 = vld [vmem:[#allocation9 + $0x60] sm:$0xff] }
0x2360   :  { %v2939_v21 = vpack.c.bf16 %v2521_v5, %v2520_v20 }
0x23c1   :  { %v2321_v52 = vpop.permute.xlu1 %2320 }
0x23c2   :  { %v2328_v8 = vmul.f32 %v2321_v52, %v2277_v24 }
0x23c5   :  { %v2968_v59 = vpop.permute.xlu1 %2967 }
0x23c6   :  { %v2970_v55 = vunpack.i.h.bf16 %v2968_v59  ;;  %v2969_v56 = vunpack.i.l.bf16 %v2968_v59 }
0x23c8   :  { %v2336_v57 = vsel %vm363_vm3, %v2328_v8, %v2969_v56  ;;  %v2337_v61 = vsel %vm363_vm3, %v2329_v6, %v2970_v55 }
0x23c9   :  { %v2921_v62 = vpack.c.bf16 %v2337_v61, %v2336_v57 }
0x23cb   :  { %2922 = vmatpush3.bf16.msra.mxu0 %v2921_v62 }
0x23cc   :  { %2935 = vmatprep.subr.bf16.mxu0 %v3323_v51 }
0x23ce   :  { %2869 = vmatmul.mubr.msk.f32.vlgmr.msra.gmra.mrb[2].mxu0 %vm2338_vm11, %v2317_v63 }
0x23cf   :  { %2898 = vmatprep.mubr.msk.f32.mxu0 %vm3324_vm10, %v3325_v40  ;;  %2937 = vmatpush3.bf16.msra.mxu0 %v2936_v13 }
0x23d0   :  { %2938 = vmatprep.subr.bf16.mxu0 %v3323_v51 }
0x23d3   :  { %2940 = vmatpush3.bf16.msra.mxu0 %v2939_v21 }
0x23d4   :  { %2941 = vmatprep.subr.bf16.mxu0 %v3323_v51 }
0x24a1   :  { %v2408_v29 = vpop.f32.mrb[2].mxu0 }
0x24a2   :  { %3237 = vrcp.f32 %v2408_v29  ;;  %v2870_v2 = vpop.f32.mrb[3].mxu0 }
0x24ac   :  { %v3238_v30 = vpop.eup %3237 }
0x24ad   :  { %2415 = vperm.xlu1 %2971, %v3238_v30  }
0x252c   :  { %v2416_v3 = vpop.permute.xlu1 %2415 }
0x252d   :  { %v2418_v31 = vmul.f32 %v2416_v3, %v2408_v29 }
0x252f   :  { %2888 = vmatmul.mubr.msk.f32.vlgmr.msra.gmra.mrb[44].mxu1 %vm363_vm3, %v2418_v31 }
0x2602   :  { %v2501_v23 = vpop.f32.mrb[44].mxu1 }
0x2603   :  { %v2502_v16 = vadd.f32 %v2808_v32, %v2501_v23  ;;  %v2889_v42 = vpop.f32.mrb[45].mxu1 }
0x2605   :  { %v2505_v24 = vmax.f32 %v2502_v16, 0.0 }
0x2607   :  { %v2511_v9 = vmul.f32 %v2810_v7, %v2505_v24 }
0x2609   :  { %v2517_v10 = vadd.f32 %v2811_v25, %v2511_v9 }
0x260b   :  { %2899 = vmatmul.mubr.msk.f32.vlgmr.msra.gmra.mrb[40].mxu0 %vm193_vm2, %v2517_v10 }
0x260c   :  { %2905 = vmatprep.mubr.msk.f32.mxu0 %vm3324_vm10, %v3325_v40  ;;  %2943 = vmatpush3.bf16.msra.mxu0 %v2942_v15 }
0x26de   :  { %v2596_v34 = vpop.f32.mrb[40].mxu0 }
0x26df   :  { %v2597_v35 = vadd.f32 %v2812_v33, %v2596_v34  ;;  %v2900_v36 = vpop.f32.mrb[41].mxu0 }
0x26e1   :  { %v2600_v39 = vmax.f32 %v2597_v35, 0.0 }
0x26e3   :  { %v2606_v43 = vmul.f32 %v2814_v37, %v2600_v39 }
0x26e5   :  { %v2612_v44 = vadd.f32 %v2815_v41, %v2606_v43 }
0x26e7   :  { %2906 = vmatmul.mubr.msk.f32.vlgmr.msra.gmra.mrb[42].mxu0 %vm2338_vm11, %v2612_v44 }
0x27ba   :  { %v2689_v46 = vpop.f32.mrb[42].mxu0 }
0x27bb   :  { %v2690_v47 = vadd.f32 %v2816_v45, %v2689_v46  ;;  %v2907_v48 = vpop.f32.mrb[43].mxu0 }
0x27bd   :  { %2693 = vst [vmem:[#allocation11] sm:$0x3] %v2690_v47 }
0x27be   :  { %3296 = shalt.err (!%p3293_p6)
}
0x27bf   :  { %s3297_s4 = scalar_lea.hbm %s3888_s5, 32 }
0x27c0   :  { %p3298_p7 = scmp.ne.s32.totalorder %s3888_s5, %s3297_s4  ;;  %p3301_p8 = scmp.lt.u32.totalorder %s3297_s4, %s3888_s5 }
0x27c2   :  { %p3303_p9 = pnand %p3301_p8, %p3298_p7 }
0x27c4   :  { %3306 = shalt.err (!%p3303_p9)
}
0x27c5   :  { %2703 = dma.vmem_to_hbm [thread:$0]  %s2701_s21, 32, %s3888_s5, [#allocation8]  }
0x27c6   :  { %3311 = dma.done.wait [#allocation8], 32  }
0x27c7   :  { %3312 = vsyncadd [#allocation8], 4294967264 }
0x27c8   :  { %2707 = vsyncpa [#allocation7], 1 }
0x27c9   :  { %2708 = vsyncpa [#allocation10], 1 }
0x27ca   :  { %2709 = vsyncpa [#allocation8], 1 }

</bundles_post_ra>
